<compile_context>
chip_gen: v7x
topology: tpu7x:2x2x1
jax: 0.10.0
libtpu: 0.0.40
codegen_flags: <defaults>
</compile_context>

<pallas_src>
import numpy as np
import jax
import jax.numpy as jnp
from jax import lax
from jax.experimental import pallas as pl
from jax.experimental.pallas import tpu as pltpu

LOG_STD_MAX = 2.0
LOG_STD_MIN = -20.0
EPS = 1e-8
NEG_SLOPE = 0.01      # F.leaky_relu default negative slope
RECIP_APPROX = True   # EUP approximate reciprocal for new_relu (review suggestion)

K = 4                 # number of GMM components
ACT_DIM = 2           # action dimension (small example)
T = 90                # sequence length
TP = 96               # padded sequence length (multiple of 8)
SEQ_FEAT = 6          # per-timestep features
TAIL = 8              # trailing features appended to CNN output
HID = 128
KA = K * ACT_DIM
GMM_OUT = K * (2 * ACT_DIM + 1)   # 20
SCAL_W = 16           # packed per-sample scalars: [tail(8) | u(1) | eps(A) | pad]
OUT_W = 8             # packed outputs: [xz_mu(A) | x_t(A) | logp(1) | pad]
CONST_COLS = 24       # packed small GMM-head constant matrices


def _round_up(n, m):
    return ((n + m - 1) // m) * m


def _leaky(x):
    # leaky ReLU in max form: for 0 < slope < 1, max(x, slope*x) == leaky_relu(x)
    return jnp.maximum(x, NEG_SLOPE * x)


def _make_const():
    """All small GMM-head selection matrices packed into one [16, 24] f32 array."""
    A = ACT_DIM
    cm = np.zeros((2 * KA, CONST_COLS), np.float32)
    # cols 0:4   : TRI (upper-triangular ones, KxK)      -> cumulative sum for inverse CDF
    cm[0:K, 0:K] = np.triu(np.ones((K, K), np.float32))
    # cols 4:8   : SEL2 (block-diag, 2KA x 2A)           -> selected component's [mu | sig]
    S = (np.arange(KA)[:, None] % A == np.arange(A)[None, :]).astype(np.float32)
    cm[0:KA, K:K + A] = S
    cm[KA:2 * KA, K + A:K + 2 * A] = S
    # cols 8:16  : GG (block-diag, 2KA x 2K)             -> per-component sums of [nd^2 | log_sig]
    Gm = (np.arange(KA)[:, None] // A == np.arange(K)[None, :]).astype(np.float32)
    cm[0:KA, K + 2 * A:K + 2 * A + K] = Gm
    cm[KA:2 * KA, K + 2 * A + K:K + 2 * A + 2 * K] = Gm
    # cols 16:24 : rows 0:2 = E (A x KA, tiles x_t across components); row 2 = j // A
    Em = (np.arange(KA)[None, :] % A == np.arange(A)[:, None]).astype(np.float32)
    cm[0:A, 16:16 + KA] = Em
    cm[A, 16:16 + KA] = (np.arange(KA) // A).astype(np.float32)
    return jnp.asarray(cm)


def make_policy_kernel(elemwise_bf16):
    """elemwise_bf16: run CNN activations (leaky / mask / maxpool) in bf16
    (v6e / v7x VPUs have native bf16; keep f32 on v5e)."""
    act_dt = jnp.bfloat16 if elemwise_bf16 else jnp.float32

    def mxu_in(x):
        return x if x.dtype == jnp.bfloat16 else x.astype(jnp.bfloat16)

    def policy_kernel(xseq_ref, scal_ref, const_ref, alpha_ref,
                      w1_ref, b1_ref, w2_ref, b2_ref, w3_ref, b3_ref,
                      wm_ref, bm_ref, wm1b_ref, wg_ref, bg_ref,
                      out_ref):
        A = ACT_DIM
        bb = out_ref.shape[0]                             # samples in this batch block

        alpha = alpha_ref[0, 0]                           # SMEM scalar

        xs = xseq_ref[...]                                # [bb*TP, 6] f32
        # new_relu on feature column 2: 1 / max(x + alpha, EPS).
        # Applied to every row (time-pad rows stay finite and are masked out of
        # the maxpool below; batch-pad rows replicate a real sample).
        v = jnp.maximum(xs + alpha, jnp.float32(EPS))
        r = pl.reciprocal(v, approx=RECIP_APPROX)         # EUP slot
        col = lax.broadcasted_iota(jnp.int32, (1, SEQ_FEAT), 1)
        xs = jnp.where(col == 2, r, xs)

        # CNN: kernel_size=1 Conv1d stack == per-timestep matmuls (6->32->64->128)
        h = jnp.dot(xs, w1_ref[...], preferred_element_type=jnp.float32) + b1_ref[...]
        h = _leaky(h.astype(act_dt))
        h = jnp.dot(mxu_in(h), w2_ref[...], preferred_element_type=jnp.float32) + b2_ref[...]
        h = _leaky(h.astype(act_dt))
        h = jnp.dot(mxu_in(h), w3_ref[...], preferred_element_type=jnp.float32) + b3_ref[...]
        h = _leaky(h.astype(act_dt))                      # [bb*TP, 128]

        # MaxPool1d(kernel_size=90): in-kernel time mask (rows T..TP-1 invalid)
        h3 = h.reshape(bb, TP, HID)
        tmask = lax.broadcasted_iota(jnp.int32, (1, TP, HID), 1) < T
        neg = jnp.asarray(jnp.finfo(h3.dtype).min, h3.dtype)
        h3 = jnp.where(tmask, h3, neg)
        feat = jnp.max(h3, axis=1)                        # [bb, 128] act_dt

        # packed per-sample scalars: [tail(8) | u(1) | eps(A) | pad]
        scal = scal_ref[...]                              # [bb, 16] f32
        wtail = scal[:, 0:TAIL]
        u = scal[:, TAIL:TAIL + 1]
        eps = scal[:, TAIL + 1:TAIL + 1 + A]

        # MLP (input 136 = 128 cnn + 8 tail; first layer split to avoid a lane concat)
        # wtail path kept in f32 (tiny dot) to preserve tail-feature precision.
        bm = bm_ref[...]                                  # [4, 128] f32
        z = _leaky(jnp.dot(mxu_in(feat), wm_ref[0],
                           preferred_element_type=jnp.float32)
                   + jnp.dot(wtail, wm1b_ref[...],
                             preferred_element_type=jnp.float32)
                   + bm[0:1])
        z = _leaky(jnp.dot(mxu_in(z), wm_ref[1],
                           preferred_element_type=jnp.float32) + bm[1:2])
        z = _leaky(jnp.dot(mxu_in(z), wm_ref[2],
                           preferred_element_type=jnp.float32) + bm[2:3])
        z = _leaky(jnp.dot(mxu_in(z), wm_ref[3],
                           preferred_element_type=jnp.float32) + bm[3:4])

        # GMM head; columns: [log_w (K) | mu (K*A, k-major) | log_sig (K*A, k-major)]
        g = jnp.dot(mxu_in(z), wg_ref[...],
                    preferred_element_type=jnp.float32) + bg_ref[...]        # [bb, 20]

        cmat = const_ref[...]                             # [16, 24] packed constants
        tri = cmat[0:K, 0:K]                              # [K, K]
        sel2 = cmat[:, K:K + 2 * A]                       # [2KA, 2A]
        gg = cmat[:, K + 2 * A:K + 2 * A + 2 * K]         # [2KA, 2K]
        em = cmat[0:A, 16:16 + KA]                        # [A, KA]
        kdiv = cmat[A:A + 1, 16:16 + KA]                  # [1, KA]  (j // A as float)

        log_w = g[:, 0:K]
        mu = g[:, K:K + KA]
        ls = jnp.tanh(g[:, K + KA:K + 2 * KA])
        ls = LOG_STD_MIN + 0.5 * (LOG_STD_MAX - LOG_STD_MIN) * (ls + 1.0)
        sig = jnp.exp(ls)

        # categorical sampling (torch.multinomial) via inverse CDF of softmax(log_w)
        mw = jnp.max(log_w, axis=-1, keepdims=True)
        p = jnp.exp(log_w - mw)
        p = p / jnp.sum(p, axis=-1, keepdims=True)
        cdf = jnp.dot(p, tri, preferred_element_type=jnp.float32)            # [bb, K]
        zidx = jnp.minimum(
            jnp.sum((cdf < u).astype(jnp.float32), axis=-1, keepdims=True),
            jnp.float32(K - 1))                                              # [bb, 1]
        msel = (kdiv == zidx).astype(jnp.float32)                            # [bb, KA]

        # selected component's (mu, sig) in a single block-diagonal dot
        xz = jnp.dot(jnp.concatenate([mu * msel, sig * msel], axis=-1), sel2,
                     preferred_element_type=jnp.float32)                     # [bb, 2A]
        xz_mu = xz[:, 0:A]
        xz_sig = xz[:, A:2 * A]
        x_t = xz_mu + xz_sig * eps

        # create_log_gaussian(mu, log_sig, x_t) for every component (one block-diag dot)
        x_tiled = jnp.dot(x_t, em, preferred_element_type=jnp.float32)       # [bb, KA]
        nd = (x_tiled - mu) * jnp.exp(-ls)
        rquad = jnp.dot(jnp.concatenate([nd * nd, ls], axis=-1), gg,
                        preferred_element_type=jnp.float32)                  # [bb, 2K]
        quad = -0.5 * rquad[:, 0:K]
        logz = rquad[:, K:2 * K] + jnp.float32(0.5 * A * np.log(2.0 * np.pi))
        log_p = quad - logz

        def lse(t):
            m = jnp.max(t, axis=-1, keepdims=True)
            return m + jnp.log(jnp.sum(jnp.exp(t - m), axis=-1, keepdims=True))

        logp_pi = lse(log_p + log_w) - lse(log_w)                            # [bb, 1]

        # packed output: [xz_mu(A) | x_t(A) | logp(1) | pad]
        out_ref[...] = jnp.concatenate(
            [xz_mu, x_t, logp_pi, jnp.zeros((bb, OUT_W - 2 * A - 1), jnp.float32)],
            axis=-1)

    return policy_kernel


def make_params(key):
    """Synthetic parameters, stored kernel-ready:
       - weights are [in, out] (PyTorch weight transposed)
       - the four 128x128 MLP weights are stacked into one [4,128,128] bf16 array
       - matmul weights (except conv1 and the tail slice of MLP layer 1) are bf16
       - GMM head columns laid out [log_w(K) | mu(K*A) | log_sig(K*A)] (k-major)."""
    def lin(k, fan_in, fan_out):
        k1, k2 = jax.random.split(k)
        bound = 1.0 / np.sqrt(fan_in)
        w = jax.random.uniform(k1, (fan_in, fan_out), jnp.float32, -bound, bound)
        b = jax.random.uniform(k2, (1, fan_out), jnp.float32, -bound, bound)
        return w, b

    keys = jax.random.split(key, 8)
    p = {}
    p["w1"], p["b1"] = lin(keys[0], SEQ_FEAT, 32)        # conv1 stays f32 (reciprocal feature)
    w2, p["b2"] = lin(keys[1], 32, 64)
    w3, p["b3"] = lin(keys[2], 64, 128)
    p["w2"] = w2.astype(jnp.bfloat16)
    p["w3"] = w3.astype(jnp.bfloat16)
    wm1, bm1 = lin(keys[3], HID + TAIL, HID)             # MLP input dim 136
    wm2, bm2 = lin(keys[4], HID, HID)
    wm3, bm3 = lin(keys[5], HID, HID)
    wm4, bm4 = lin(keys[6], HID, HID)
    p["wm_stack"] = jnp.stack([wm1[:HID], wm2, wm3, wm4]).astype(jnp.bfloat16)  # [4,128,128]
    p["wm1b"] = wm1[HID:]                                                        # [8,128] f32
    p["bm_stack"] = jnp.concatenate([bm1, bm2, bm3, bm4], axis=0)                # [4,128] f32
    wg, p["bg"] = lin(keys[7], HID, GMM_OUT)
    p["wg"] = wg.astype(jnp.bfloat16)
    p["alpha"] = jnp.zeros((1, 1), jnp.float32)          # alpha_actv1 init = 0.0
    return p


def _device_config():
    """(block_b, vmem_limit_bytes, elemwise_bf16) per TPU generation."""
    kind = ""
    try:
        kind = jax.devices()[0].device_kind.lower()
    except Exception:
        pass
    if "v5" in kind and ("lite" in kind or "v5e" in kind):
        # v5e: 16 MiB default scoped VMEM, no bf16 VALU
        return 64, 64 << 20, False
    if "v5" in kind:
        # v5p-ish: keep f32 elementwise, generous VMEM
        return 128, 96 << 20, False
    if "v7" in kind:
        # v7x: 64 MiB VMEM per TC -> smaller block, grid usually >= 2 steps
        return 96, 48 << 20, True
    # v6e / default
    return 128, 96 << 20, True


def mlp_gaussian_policy(x, params, key, block_b=None, vmem_limit_bytes=None,
                        elemwise_bf16=None):
    """Returns (xz_mu [B,A], x_t [B,A], logp_pi [B])."""
    B = x.shape[0]
    A = ACT_DIM

    d_bb, d_vmem, d_bf16 = _device_config()
    if block_b is None:
        block_b = d_bb
    if vmem_limit_bytes is None:
        vmem_limit_bytes = d_vmem
    if elemwise_bf16 is None:
        elemwise_bf16 = d_bf16

    # batch block size: multiple of 8, capped at block_b; pad the batch to a multiple.
    bb = _round_up(min(block_b, _round_up(B, 8)), 8)
    b_pad = _round_up(B, bb)
    grid = (b_pad // bb,)

    x = x.astype(jnp.float32)
    # batch padding replicates the last real sample (keeps padded rows numerically
    # tame through the 1/(x+alpha) feature; their outputs are discarded anyway)
    if b_pad > B:
        x = jnp.concatenate(
            [x, jnp.broadcast_to(x[B - 1:B], (b_pad - B, x.shape[1]))], axis=0)

    x_seq = x[:, :T * SEQ_FEAT].reshape(b_pad, T, SEQ_FEAT)
    x_seq = jnp.pad(x_seq, ((0, 0), (0, TP - T), (0, 0)))
    x_seq2d = x_seq.reshape(b_pad * TP, SEQ_FEAT)

    # sampling noise (torch.multinomial / torch.randn equivalents) drawn host-side
    ku, ke = jax.random.split(key)
    u = jax.random.uniform(ku, (B, 1), dtype=jnp.float32)
    eps = jax.random.normal(ke, (B, A), dtype=jnp.float32)
    u = jnp.pad(u, ((0, b_pad - B), (0, 0)))
    eps = jnp.pad(eps, ((0, b_pad - B), (0, 0)))
    tail_feats = x[:, T * SEQ_FEAT:T * SEQ_FEAT + TAIL]
    scal = jnp.concatenate(
        [tail_feats, u, eps,
         jnp.zeros((b_pad, SCAL_W - TAIL - 1 - A), jnp.float32)], axis=-1)

    const = _make_const()

    def inv(a):  # grid-invariant (whole-array) spec
        return pl.BlockSpec(a.shape, lambda b, _nd=a.ndim: (0,) * _nd)

    p = params
    in_specs = [
        pl.BlockSpec((bb * TP, SEQ_FEAT), lambda b: (b, 0)),     # xseq
        pl.BlockSpec((bb, SCAL_W), lambda b: (b, 0)),            # packed scalars
        inv(const),
        pl.BlockSpec(memory_space=pltpu.MemorySpace.SMEM),       # alpha (scalar)
        inv(p["w1"]), inv(p["b1"]), inv(p["w2"]), inv(p["b2"]),
        inv(p["w3"]), inv(p["b3"]),
        inv(p["wm_stack"]), inv(p["bm_stack"]), inv(p["wm1b"]),
        inv(p["wg"]), inv(p["bg"]),
    ]
    out_specs = pl.BlockSpec((bb, OUT_W), lambda b: (b, 0))
    out_shape = jax.ShapeDtypeStruct((b_pad, OUT_W), jnp.float32)

    out = pl.pallas_call(
        make_policy_kernel(elemwise_bf16),
        out_shape=out_shape,
        grid=grid,
        in_specs=in_specs,
        out_specs=out_specs,
        compiler_params=pltpu.CompilerParams(
            dimension_semantics=("parallel",),
            vmem_limit_bytes=int(vmem_limit_bytes)),
    )(x_seq2d, scal, const, p["alpha"],
      p["w1"], p["b1"], p["w2"], p["b2"], p["w3"], p["b3"],
      p["wm_stack"], p["bm_stack"], p["wm1b"], p["wg"], p["bg"])

    return out[:B, 0:A], out[:B, A:2 * A], out[:B, 2 * A]


if __name__ == "__main__":
    key = jax.random.PRNGKey(0)
    kp, kx, ks = jax.random.split(key, 3)
    params = make_params(kp)
    B = 2
    x = jax.random.normal(kx, (B, T * SEQ_FEAT + TAIL), jnp.float32)   # [2, 548]

    xz_mu, x_t, logp_pi = mlp_gaussian_policy(x, params, ks)
    jax.block_until_ready((xz_mu, x_t, logp_pi))

    assert xz_mu.shape == (B, ACT_DIM)
    assert x_t.shape == (B, ACT_DIM)
    assert logp_pi.shape == (B,)
    assert bool(jnp.all(jnp.isfinite(xz_mu)))
    assert bool(jnp.all(jnp.isfinite(x_t)))
    assert bool(jnp.all(jnp.isfinite(logp_pi)))
    print("KERNEL_OK")
</pallas_src>

<mosaic_0001>
module attributes {stable_mosaic.version = 11 : i64} {
  func.func @policy_kernel(%arg0: i32, %arg1: memref<768x6xf32, #tpu.memory_space<vmem>>, %arg2: memref<8x16xf32, #tpu.memory_space<vmem>>, %arg3: memref<16x24xf32, #tpu.memory_space<vmem>>, %arg4: memref<1x1xf32, #tpu.memory_space<smem>>, %arg5: memref<6x32xf32, #tpu.memory_space<vmem>>, %arg6: memref<1x32xf32, #tpu.memory_space<vmem>>, %arg7: memref<32x64xbf16, #tpu.memory_space<vmem>>, %arg8: memref<1x64xf32, #tpu.memory_space<vmem>>, %arg9: memref<64x128xbf16, #tpu.memory_space<vmem>>, %arg10: memref<1x128xf32, #tpu.memory_space<vmem>>, %arg11: memref<4x128x128xbf16, #tpu.memory_space<vmem>>, %arg12: memref<4x128xf32, #tpu.memory_space<vmem>>, %arg13: memref<8x128xf32, #tpu.memory_space<vmem>>, %arg14: memref<128x20xbf16, #tpu.memory_space<vmem>>, %arg15: memref<1x20xf32, #tpu.memory_space<vmem>>, %arg16: memref<8x8xf32, #tpu.memory_space<vmem>>) attributes {dimension_semantics = [#tpu.dimension_semantics<parallel>], iteration_bounds = array<i64: 1>, scalar_prefetch = 0 : i64, scratch_operands = 0 : i64, tpu.core_type = #tpu.core_type<tc>, window_params = [{transform_indices = @transform_0, window_bounds = array<i64: 768, 6>}, {transform_indices = @transform_1, window_bounds = array<i64: 8, 16>}, {pipeline_mode = #tpu.pipeline_mode<synchronous>, transform_indices = @transform_2, window_bounds = array<i64: 16, 24>}, {transform_indices = @transform_3, window_bounds = array<i64: 1, 1>}, {pipeline_mode = #tpu.pipeline_mode<synchronous>, transform_indices = @transform_4, window_bounds = array<i64: 6, 32>}, {pipeline_mode = #tpu.pipeline_mode<synchronous>, transform_indices = @transform_5, window_bounds = array<i64: 1, 32>}, {pipeline_mode = #tpu.pipeline_mode<synchronous>, transform_indices = @transform_6, window_bounds = array<i64: 32, 64>}, {pipeline_mode = #tpu.pipeline_mode<synchronous>, transform_indices = @transform_7, window_bounds = array<i64: 1, 64>}, {pipeline_mode = #tpu.pipeline_mode<synchronous>, transform_indices = @transform_8, window_bounds = array<i64: 64, 128>}, {pipeline_mode = #tpu.pipeline_mode<synchronous>, transform_indices = @transform_9, window_bounds = array<i64: 1, 128>}, {pipeline_mode = #tpu.pipeline_mode<synchronous>, transform_indices = @transform_10, window_bounds = array<i64: 4, 128, 128>}, {pipeline_mode = #tpu.pipeline_mode<synchronous>, transform_indices = @transform_11, window_bounds = array<i64: 4, 128>}, {pipeline_mode = #tpu.pipeline_mode<synchronous>, transform_indices = @transform_12, window_bounds = array<i64: 8, 128>}, {pipeline_mode = #tpu.pipeline_mode<synchronous>, transform_indices = @transform_13, window_bounds = array<i64: 128, 20>}, {pipeline_mode = #tpu.pipeline_mode<synchronous>, transform_indices = @transform_14, window_bounds = array<i64: 1, 20>}, {transform_indices = @transform_15, window_bounds = array<i64: 8, 8>}]} {
    %c0 = arith.constant 0 : index
    %c0_0 = arith.constant 0 : index
    %0 = memref.load %arg4[%c0, %c0_0] : memref<1x1xf32, #tpu.memory_space<smem>>
    %c0_1 = arith.constant 0 : index
    %c0_2 = arith.constant 0 : index
    %1 = vector.load %arg1[%c0_1, %c0_2] : memref<768x6xf32, #tpu.memory_space<vmem>>, vector<768x6xf32>
    %2 = vector.broadcast %0 : f32 to vector<768x6xf32>
    %3 = arith.addf %1, %2 : vector<768x6xf32>
    %cst = arith.constant 9.99999993E-9 : f32
    %4 = vector.broadcast %cst : f32 to vector<768x6xf32>
    %5 = arith.maximumf %3, %4 : vector<768x6xf32>
    %6 = tpu.reciprocal %5 {approx = true} : vector<768x6xf32> -> vector<768x6xf32>
    %7 = tpu.iota {dimensions = array<i32: 1>} : vector<1x6xi32>
    %c2_i32 = arith.constant 2 : i32
    %8 = vector.broadcast %c2_i32 : i32 to vector<1x6xi32>
    %9 = arith.cmpi eq, %7, %8 : vector<1x6xi32>
    %10 = vector.shape_cast %9 : vector<1x6xi1> to vector<1x6xi1>
    %11 = vector.broadcast %10 : vector<1x6xi1> to vector<768x6xi1>
    %12 = arith.select %11, %6, %1 : vector<768x6xi1>, vector<768x6xf32>
    %c0_3 = arith.constant 0 : index
    %c0_4 = arith.constant 0 : index
    %13 = vector.load %arg5[%c0_3, %c0_4] : memref<6x32xf32, #tpu.memory_space<vmem>>, vector<6x32xf32>
    %cst_5 = arith.constant dense<0.000000e+00> : vector<768x32xf32>
    %14 = tpu.matmul %12, %13, %cst_5 {dimension_numbers = #tpu.dot_dimension_numbers<[1], [0], [0], [1], [0, 0, 1, 1], [], []>} : vector<768x6xf32>, vector<6x32xf32>, vector<768x32xf32> -> vector<768x32xf32>
    %c0_6 = arith.constant 0 : index
    %c0_7 = arith.constant 0 : index
    %15 = vector.load %arg6[%c0_6, %c0_7] : memref<1x32xf32, #tpu.memory_space<vmem>>, vector<1x32xf32>
    %16 = vector.broadcast %15 : vector<1x32xf32> to vector<768x32xf32>
    %17 = arith.addf %14, %16 : vector<768x32xf32>
    %18 = arith.truncf %17 : vector<768x32xf32> to vector<768x32xbf16>
    %cst_8 = arith.constant 1.000980e-02 : bf16
    %19 = vector.broadcast %cst_8 : bf16 to vector<768x32xbf16>
    %20 = arith.mulf %19, %18 : vector<768x32xbf16>
    %21 = arith.maximumf %18, %20 : vector<768x32xbf16>
    %c0_9 = arith.constant 0 : index
    %c0_10 = arith.constant 0 : index
    %22 = vector.load %arg7[%c0_9, %c0_10] : memref<32x64xbf16, #tpu.memory_space<vmem>>, vector<32x64xbf16>
    %cst_11 = arith.constant dense<0.000000e+00> : vector<768x64xf32>
    %23 = tpu.matmul %21, %22, %cst_11 {dimension_numbers = #tpu.dot_dimension_numbers<[1], [0], [0], [1], [0, 0, 1, 1], [], []>} : vector<768x32xbf16>, vector<32x64xbf16>, vector<768x64xf32> -> vector<768x64xf32>
    %c0_12 = arith.constant 0 : index
    %c0_13 = arith.constant 0 : index
    %24 = vector.load %arg8[%c0_12, %c0_13] : memref<1x64xf32, #tpu.memory_space<vmem>>, vector<1x64xf32>
    %25 = vector.broadcast %24 : vector<1x64xf32> to vector<768x64xf32>
    %26 = arith.addf %23, %25 : vector<768x64xf32>
    %27 = arith.truncf %26 : vector<768x64xf32> to vector<768x64xbf16>
    %cst_14 = arith.constant 1.000980e-02 : bf16
    %28 = vector.broadcast %cst_14 : bf16 to vector<768x64xbf16>
    %29 = arith.mulf %28, %27 : vector<768x64xbf16>
    %30 = arith.maximumf %27, %29 : vector<768x64xbf16>
    %c0_15 = arith.constant 0 : index
    %c0_16 = arith.constant 0 : index
    %31 = vector.load %arg9[%c0_15, %c0_16] : memref<64x128xbf16, #tpu.memory_space<vmem>>, vector<64x128xbf16>
    %cst_17 = arith.constant dense<0.000000e+00> : vector<768x128xf32>
    %32 = tpu.matmul %30, %31, %cst_17 {dimension_numbers = #tpu.dot_dimension_numbers<[1], [0], [0], [1], [0, 0, 1, 1], [], []>} : vector<768x64xbf16>, vector<64x128xbf16>, vector<768x128xf32> -> vector<768x128xf32>
    %c0_18 = arith.constant 0 : index
    %c0_19 = arith.constant 0 : index
    %33 = vector.load %arg10[%c0_18, %c0_19] : memref<1x128xf32, #tpu.memory_space<vmem>>, vector<1x128xf32>
    %34 = vector.broadcast %33 : vector<1x128xf32> to vector<768x128xf32>
    %35 = arith.addf %32, %34 : vector<768x128xf32>
    %36 = arith.truncf %35 : vector<768x128xf32> to vector<768x128xbf16>
    %cst_20 = arith.constant 1.000980e-02 : bf16
    %37 = vector.broadcast %cst_20 : bf16 to vector<768x128xbf16>
    %38 = arith.mulf %37, %36 : vector<768x128xbf16>
    %39 = arith.maximumf %36, %38 : vector<768x128xbf16>
    %40 = vector.shape_cast %39 : vector<768x128xbf16> to vector<8x96x128xbf16>
    %41 = tpu.iota {dimensions = array<i32: 1>} : vector<1x96x128xi32>
    %c90_i32 = arith.constant 90 : i32
    %42 = vector.broadcast %c90_i32 : i32 to vector<1x96x128xi32>
    %43 = arith.cmpi slt, %41, %42 : vector<1x96x128xi32>
    %cst_21 = arith.constant -3.389530e+38 : bf16
    %44 = vector.shape_cast %43 : vector<1x96x128xi1> to vector<1x96x128xi1>
    %45 = vector.broadcast %44 : vector<1x96x128xi1> to vector<8x96x128xi1>
    %46 = vector.broadcast %cst_21 : bf16 to vector<8x96x128xbf16>
    %47 = arith.select %45, %40, %46 : vector<8x96x128xi1>, vector<8x96x128xbf16>
    %cst_22 = arith.constant dense<0xFF80> : vector<8x128xbf16>
    %48 = vector.multi_reduction <maximumf>, %47, %cst_22 [1] : vector<8x96x128xbf16> to vector<8x128xbf16>
    %c0_23 = arith.constant 0 : index
    %c0_24 = arith.constant 0 : index
    %49 = vector.load %arg2[%c0_23, %c0_24] : memref<8x16xf32, #tpu.memory_space<vmem>>, vector<8x16xf32>
    %50 = vector.extract_strided_slice %49 {offsets = [0, 0], sizes = [8, 8], strides = [1, 1]} : vector<8x16xf32> to vector<8x8xf32>
    %51 = vector.extract_strided_slice %49 {offsets = [0, 8], sizes = [8, 1], strides = [1, 1]} : vector<8x16xf32> to vector<8x1xf32>
    %52 = vector.extract_strided_slice %49 {offsets = [0, 9], sizes = [8, 2], strides = [1, 1]} : vector<8x16xf32> to vector<8x2xf32>
    %c0_25 = arith.constant 0 : index
    %c0_26 = arith.constant 0 : index
    %53 = vector.load %arg12[%c0_25, %c0_26] : memref<4x128xf32, #tpu.memory_space<vmem>>, vector<4x128xf32>
    %c0_27 = arith.constant 0 : index
    %c0_28 = arith.constant 0 : index
    %c0_29 = arith.constant 0 : index
    %54 = vector.load %arg11[%c0_27, %c0_28, %c0_29] : memref<4x128x128xbf16, #tpu.memory_space<vmem>>, vector<1x128x128xbf16>
    %55 = vector.shape_cast %54 : vector<1x128x128xbf16> to vector<128x128xbf16>
    %cst_30 = arith.constant dense<0.000000e+00> : vector<8x128xf32>
    %56 = tpu.matmul %48, %55, %cst_30 {dimension_numbers = #tpu.dot_dimension_numbers<[1], [0], [0], [1], [0, 0, 1, 1], [], []>} : vector<8x128xbf16>, vector<128x128xbf16>, vector<8x128xf32> -> vector<8x128xf32>
    %c0_31 = arith.constant 0 : index
    %c0_32 = arith.constant 0 : index
    %57 = vector.load %arg13[%c0_31, %c0_32] : memref<8x128xf32, #tpu.memory_space<vmem>>, vector<8x128xf32>
    %cst_33 = arith.constant dense<0.000000e+00> : vector<8x128xf32>
    %58 = tpu.matmul %50, %57, %cst_33 {dimension_numbers = #tpu.dot_dimension_numbers<[1], [0], [0], [1], [0, 0, 1, 1], [], []>} : vector<8x8xf32>, vector<8x128xf32>, vector<8x128xf32> -> vector<8x128xf32>
    %59 = arith.addf %56, %58 : vector<8x128xf32>
    %60 = vector.extract_strided_slice %53 {offsets = [0, 0], sizes = [1, 128], strides = [1, 1]} : vector<4x128xf32> to vector<1x128xf32>
    %61 = vector.broadcast %60 : vector<1x128xf32> to vector<8x128xf32>
    %62 = arith.addf %59, %61 : vector<8x128xf32>
    %cst_34 = arith.constant 0.00999999977 : f32
    %63 = vector.broadcast %cst_34 : f32 to vector<8x128xf32>
    %64 = arith.mulf %63, %62 : vector<8x128xf32>
    %65 = arith.maximumf %62, %64 : vector<8x128xf32>
    %66 = arith.truncf %65 : vector<8x128xf32> to vector<8x128xbf16>
    %c1 = arith.constant 1 : index
    %c0_35 = arith.constant 0 : index
    %c0_36 = arith.constant 0 : index
    %67 = vector.load %arg11[%c1, %c0_35, %c0_36] : memref<4x128x128xbf16, #tpu.memory_space<vmem>>, vector<1x128x128xbf16>
    %68 = vector.shape_cast %67 : vector<1x128x128xbf16> to vector<128x128xbf16>
    %cst_37 = arith.constant dense<0.000000e+00> : vector<8x128xf32>
    %69 = tpu.matmul %66, %68, %cst_37 {dimension_numbers = #tpu.dot_dimension_numbers<[1], [0], [0], [1], [0, 0, 1, 1], [], []>} : vector<8x128xbf16>, vector<128x128xbf16>, vector<8x128xf32> -> vector<8x128xf32>
    %70 = vector.extract_strided_slice %53 {offsets = [1, 0], sizes = [1, 128], strides = [1, 1]} : vector<4x128xf32> to vector<1x128xf32>
    %71 = vector.broadcast %70 : vector<1x128xf32> to vector<8x128xf32>
    %72 = arith.addf %69, %71 : vector<8x128xf32>
    %cst_38 = arith.constant 0.00999999977 : f32
    %73 = vector.broadcast %cst_38 : f32 to vector<8x128xf32>
    %74 = arith.mulf %73, %72 : vector<8x128xf32>
    %75 = arith.maximumf %72, %74 : vector<8x128xf32>
    %76 = arith.truncf %75 : vector<8x128xf32> to vector<8x128xbf16>
    %c2 = arith.constant 2 : index
    %c0_39 = arith.constant 0 : index
    %c0_40 = arith.constant 0 : index
    %77 = vector.load %arg11[%c2, %c0_39, %c0_40] : memref<4x128x128xbf16, #tpu.memory_space<vmem>>, vector<1x128x128xbf16>
    %78 = vector.shape_cast %77 : vector<1x128x128xbf16> to vector<128x128xbf16>
    %cst_41 = arith.constant dense<0.000000e+00> : vector<8x128xf32>
    %79 = tpu.matmul %76, %78, %cst_41 {dimension_numbers = #tpu.dot_dimension_numbers<[1], [0], [0], [1], [0, 0, 1, 1], [], []>} : vector<8x128xbf16>, vector<128x128xbf16>, vector<8x128xf32> -> vector<8x128xf32>
    %80 = vector.extract_strided_slice %53 {offsets = [2, 0], sizes = [1, 128], strides = [1, 1]} : vector<4x128xf32> to vector<1x128xf32>
    %81 = vector.broadcast %80 : vector<1x128xf32> to vector<8x128xf32>
    %82 = arith.addf %79, %81 : vector<8x128xf32>
    %cst_42 = arith.constant 0.00999999977 : f32
    %83 = vector.broadcast %cst_42 : f32 to vector<8x128xf32>
    %84 = arith.mulf %83, %82 : vector<8x128xf32>
    %85 = arith.maximumf %82, %84 : vector<8x128xf32>
    %86 = arith.truncf %85 : vector<8x128xf32> to vector<8x128xbf16>
    %c3 = arith.constant 3 : index
    %c0_43 = arith.constant 0 : index
    %c0_44 = arith.constant 0 : index
    %87 = vector.load %arg11[%c3, %c0_43, %c0_44] : memref<4x128x128xbf16, #tpu.memory_space<vmem>>, vector<1x128x128xbf16>
    %88 = vector.shape_cast %87 : vector<1x128x128xbf16> to vector<128x128xbf16>
    %cst_45 = arith.constant dense<0.000000e+00> : vector<8x128xf32>
    %89 = tpu.matmul %86, %88, %cst_45 {dimension_numbers = #tpu.dot_dimension_numbers<[1], [0], [0], [1], [0, 0, 1, 1], [], []>} : vector<8x128xbf16>, vector<128x128xbf16>, vector<8x128xf32> -> vector<8x128xf32>
    %90 = vector.extract_strided_slice %53 {offsets = [3, 0], sizes = [1, 128], strides = [1, 1]} : vector<4x128xf32> to vector<1x128xf32>
    %91 = vector.broadcast %90 : vector<1x128xf32> to vector<8x128xf32>
    %92 = arith.addf %89, %91 : vector<8x128xf32>
    %cst_46 = arith.constant 0.00999999977 : f32
    %93 = vector.broadcast %cst_46 : f32 to vector<8x128xf32>
    %94 = arith.mulf %93, %92 : vector<8x128xf32>
    %95 = arith.maximumf %92, %94 : vector<8x128xf32>
    %96 = arith.truncf %95 : vector<8x128xf32> to vector<8x128xbf16>
    %c0_47 = arith.constant 0 : index
    %c0_48 = arith.constant 0 : index
    %97 = vector.load %arg14[%c0_47, %c0_48] : memref<128x20xbf16, #tpu.memory_space<vmem>>, vector<128x20xbf16>
    %cst_49 = arith.constant dense<0.000000e+00> : vector<8x20xf32>
    %98 = tpu.matmul %96, %97, %cst_49 {dimension_numbers = #tpu.dot_dimension_numbers<[1], [0], [0], [1], [0, 0, 1, 1], [], []>} : vector<8x128xbf16>, vector<128x20xbf16>, vector<8x20xf32> -> vector<8x20xf32>
    %c0_50 = arith.constant 0 : index
    %c0_51 = arith.constant 0 : index
    %99 = vector.load %arg15[%c0_50, %c0_51] : memref<1x20xf32, #tpu.memory_space<vmem>>, vector<1x20xf32>
    %100 = vector.broadcast %99 : vector<1x20xf32> to vector<8x20xf32>
    %101 = arith.addf %98, %100 : vector<8x20xf32>
    %c0_52 = arith.constant 0 : index
    %c0_53 = arith.constant 0 : index
    %102 = vector.load %arg3[%c0_52, %c0_53] : memref<16x24xf32, #tpu.memory_space<vmem>>, vector<16x24xf32>
    %103 = vector.extract_strided_slice %102 {offsets = [0, 0], sizes = [4, 4], strides = [1, 1]} : vector<16x24xf32> to vector<4x4xf32>
    %104 = vector.extract_strided_slice %102 {offsets = [0, 4], sizes = [16, 4], strides = [1, 1]} : vector<16x24xf32> to vector<16x4xf32>
    %105 = vector.extract_strided_slice %102 {offsets = [0, 8], sizes = [16, 8], strides = [1, 1]} : vector<16x24xf32> to vector<16x8xf32>
    %106 = vector.extract_strided_slice %102 {offsets = [0, 16], sizes = [2, 8], strides = [1, 1]} : vector<16x24xf32> to vector<2x8xf32>
    %107 = vector.extract_strided_slice %102 {offsets = [2, 16], sizes = [1, 8], strides = [1, 1]} : vector<16x24xf32> to vector<1x8xf32>
    %108 = vector.extract_strided_slice %101 {offsets = [0, 0], sizes = [8, 4], strides = [1, 1]} : vector<8x20xf32> to vector<8x4xf32>
    %109 = vector.extract_strided_slice %101 {offsets = [0, 4], sizes = [8, 8], strides = [1, 1]} : vector<8x20xf32> to vector<8x8xf32>
    %110 = vector.extract_strided_slice %101 {offsets = [0, 12], sizes = [8, 8], strides = [1, 1]} : vector<8x20xf32> to vector<8x8xf32>
    %111 = math.tanh %110 : vector<8x8xf32>
    %cst_54 = arith.constant 1.000000e+00 : f32
    %112 = vector.broadcast %cst_54 : f32 to vector<8x8xf32>
    %113 = arith.addf %111, %112 : vector<8x8xf32>
    %cst_55 = arith.constant 1.100000e+01 : f32
    %114 = vector.broadcast %cst_55 : f32 to vector<8x8xf32>
    %115 = arith.mulf %114, %113 : vector<8x8xf32>
    %cst_56 = arith.constant -2.000000e+01 : f32
    %116 = vector.broadcast %cst_56 : f32 to vector<8x8xf32>
    %117 = arith.addf %116, %115 : vector<8x8xf32>
    %118 = math.exp %117 : vector<8x8xf32>
    %cst_57 = arith.constant dense<0xFF800000> : vector<8xf32>
    %119 = vector.multi_reduction <maximumf>, %108, %cst_57 [1] : vector<8x4xf32> to vector<8xf32>
    %120 = vector.shape_cast %119 : vector<8xf32> to vector<8x1xf32>
    %121 = vector.broadcast %120 : vector<8x1xf32> to vector<8x4xf32>
    %122 = arith.subf %108, %121 : vector<8x4xf32>
    %123 = math.exp %122 : vector<8x4xf32>
    %cst_58 = arith.constant dense<0.000000e+00> : vector<8xf32>
    %124 = vector.multi_reduction <add>, %123, %cst_58 [1] : vector<8x4xf32> to vector<8xf32>
    %125 = vector.shape_cast %124 : vector<8xf32> to vector<8x1xf32>
    %126 = vector.broadcast %125 : vector<8x1xf32> to vector<8x4xf32>
    %127 = arith.divf %123, %126 : vector<8x4xf32>
    %cst_59 = arith.constant dense<0.000000e+00> : vector<8x4xf32>
    %128 = tpu.matmul %127, %103, %cst_59 {dimension_numbers = #tpu.dot_dimension_numbers<[1], [0], [0], [1], [0, 0, 1, 1], [], []>} : vector<8x4xf32>, vector<4x4xf32>, vector<8x4xf32> -> vector<8x4xf32>
    %129 = vector.broadcast %51 : vector<8x1xf32> to vector<8x4xf32>
    %130 = arith.cmpf olt, %128, %129 : vector<8x4xf32>
    %131 = arith.extui %130 : vector<8x4xi1> to vector<8x4xi32>
    %132 = arith.sitofp %131 : vector<8x4xi32> to vector<8x4xf32>
    %cst_60 = arith.constant dense<0.000000e+00> : vector<8xf32>
    %133 = vector.multi_reduction <add>, %132, %cst_60 [1] : vector<8x4xf32> to vector<8xf32>
    %134 = vector.shape_cast %133 : vector<8xf32> to vector<8x1xf32>
    %cst_61 = arith.constant 3.000000e+00 : f32
    %135 = vector.broadcast %cst_61 : f32 to vector<8x1xf32>
    %136 = arith.minimumf %134, %135 : vector<8x1xf32>
    %137 = vector.broadcast %107 : vector<1x8xf32> to vector<8x8xf32>
    %138 = vector.broadcast %136 : vector<8x1xf32> to vector<8x8xf32>
    %139 = arith.cmpf oeq, %137, %138 : vector<8x8xf32>
    %140 = arith.extui %139 : vector<8x8xi1> to vector<8x8xi32>
    %141 = arith.sitofp %140 : vector<8x8xi32> to vector<8x8xf32>
    %142 = arith.mulf %109, %141 : vector<8x8xf32>
    %143 = arith.mulf %118, %141 : vector<8x8xf32>
    %144 = tpu.concatenate %142, %143 in 1 : vector<8x8xf32>, vector<8x8xf32> -> vector<8x16xf32>
    %cst_62 = arith.constant dense<0.000000e+00> : vector<8x4xf32>
    %145 = tpu.matmul %144, %104, %cst_62 {dimension_numbers = #tpu.dot_dimension_numbers<[1], [0], [0], [1], [0, 0, 1, 1], [], []>} : vector<8x16xf32>, vector<16x4xf32>, vector<8x4xf32> -> vector<8x4xf32>
    %146 = vector.extract_strided_slice %145 {offsets = [0, 0], sizes = [8, 2], strides = [1, 1]} : vector<8x4xf32> to vector<8x2xf32>
    %147 = vector.extract_strided_slice %145 {offsets = [0, 2], sizes = [8, 2], strides = [1, 1]} : vector<8x4xf32> to vector<8x2xf32>
    %148 = arith.mulf %147, %52 : vector<8x2xf32>
    %149 = arith.addf %146, %148 : vector<8x2xf32>
    %cst_63 = arith.constant dense<0.000000e+00> : vector<8x8xf32>
    %150 = tpu.matmul %149, %106, %cst_63 {dimension_numbers = #tpu.dot_dimension_numbers<[1], [0], [0], [1], [0, 0, 1, 1], [], []>} : vector<8x2xf32>, vector<2x8xf32>, vector<8x8xf32> -> vector<8x8xf32>
    %151 = arith.subf %150, %109 : vector<8x8xf32>
    %cst_64 = arith.constant 0.000000e+00 : f32
    %152 = vector.broadcast %cst_64 : f32 to vector<8x8xf32>
    %153 = arith.subf %152, %117 : vector<8x8xf32>
    %154 = math.exp %153 : vector<8x8xf32>
    %155 = arith.mulf %151, %154 : vector<8x8xf32>
    %156 = arith.mulf %155, %155 : vector<8x8xf32>
    %157 = tpu.concatenate %156, %117 in 1 : vector<8x8xf32>, vector<8x8xf32> -> vector<8x16xf32>
    %cst_65 = arith.constant dense<0.000000e+00> : vector<8x8xf32>
    %158 = tpu.matmul %157, %105, %cst_65 {dimension_numbers = #tpu.dot_dimension_numbers<[1], [0], [0], [1], [0, 0, 1, 1], [], []>} : vector<8x16xf32>, vector<16x8xf32>, vector<8x8xf32> -> vector<8x8xf32>
    %159 = vector.extract_strided_slice %158 {offsets = [0, 0], sizes = [8, 4], strides = [1, 1]} : vector<8x8xf32> to vector<8x4xf32>
    %cst_66 = arith.constant -5.000000e-01 : f32
    %160 = vector.broadcast %cst_66 : f32 to vector<8x4xf32>
    %161 = arith.mulf %160, %159 : vector<8x4xf32>
    %162 = vector.extract_strided_slice %158 {offsets = [0, 4], sizes = [8, 4], strides = [1, 1]} : vector<8x8xf32> to vector<8x4xf32>
    %cst_67 = arith.constant 1.83787704 : f32
    %163 = vector.broadcast %cst_67 : f32 to vector<8x4xf32>
    %164 = arith.addf %162, %163 : vector<8x4xf32>
    %165 = arith.subf %161, %164 : vector<8x4xf32>
    %166 = arith.addf %165, %108 : vector<8x4xf32>
    %cst_68 = arith.constant dense<0xFF800000> : vector<8xf32>
    %167 = vector.multi_reduction <maximumf>, %166, %cst_68 [1] : vector<8x4xf32> to vector<8xf32>
    %168 = vector.shape_cast %167 : vector<8xf32> to vector<8x1xf32>
    %169 = vector.broadcast %168 : vector<8x1xf32> to vector<8x4xf32>
    %170 = arith.subf %166, %169 : vector<8x4xf32>
    %171 = math.exp %170 : vector<8x4xf32>
    %cst_69 = arith.constant dense<0.000000e+00> : vector<8xf32>
    %172 = vector.multi_reduction <add>, %171, %cst_69 [1] : vector<8x4xf32> to vector<8xf32>
    %173 = vector.shape_cast %172 : vector<8xf32> to vector<8x1xf32>
    %174 = math.log %173 : vector<8x1xf32>
    %175 = arith.addf %168, %174 : vector<8x1xf32>
    %cst_70 = arith.constant dense<0xFF800000> : vector<8xf32>
    %176 = vector.multi_reduction <maximumf>, %108, %cst_70 [1] : vector<8x4xf32> to vector<8xf32>
    %177 = vector.shape_cast %176 : vector<8xf32> to vector<8x1xf32>
    %178 = vector.broadcast %177 : vector<8x1xf32> to vector<8x4xf32>
    %179 = arith.subf %108, %178 : vector<8x4xf32>
    %180 = math.exp %179 : vector<8x4xf32>
    %cst_71 = arith.constant dense<0.000000e+00> : vector<8xf32>
    %181 = vector.multi_reduction <add>, %180, %cst_71 [1] : vector<8x4xf32> to vector<8xf32>
    %182 = vector.shape_cast %181 : vector<8xf32> to vector<8x1xf32>
    %183 = math.log %182 : vector<8x1xf32>
    %184 = arith.addf %177, %183 : vector<8x1xf32>
    %185 = arith.subf %175, %184 : vector<8x1xf32>
    %cst_72 = arith.constant 0.000000e+00 : f32
    %186 = vector.broadcast %cst_72 : f32 to vector<8x3xf32>
    %187 = tpu.concatenate %146, %149, %185, %186 in 1 : vector<8x2xf32>, vector<8x2xf32>, vector<8x1xf32>, vector<8x3xf32> -> vector<8x8xf32>
    %c0_73 = arith.constant 0 : index
    %c0_74 = arith.constant 0 : index
    %188 = vector.load %arg16[%c0_73, %c0_74] : memref<8x8xf32, #tpu.memory_space<vmem>>, vector<8x8xf32>
    tpu.vector_store %arg16[%c0_73, %c0_74], %187 {strides = array<i32>} : memref<8x8xf32, #tpu.memory_space<vmem>>, vector<8x8xf32>,
    return
  }
  func.func @transform_0(%arg0: i32) -> (i32, i32) {
    %c0_i32 = arith.constant 0 : i32
    %c0_i32_0 = arith.constant 0 : i32
    return %arg0, %c0_i32 : i32, i32
  }
  func.func @transform_1(%arg0: i32) -> (i32, i32) {
    %c0_i32 = arith.constant 0 : i32
    %c0_i32_0 = arith.constant 0 : i32
    return %arg0, %c0_i32 : i32, i32
  }
  func.func @transform_2(%arg0: i32) -> (i32, i32) {
    %c0_i32 = arith.constant 0 : i32
    %c0_i32_0 = arith.constant 0 : i32
    %c0_i32_1 = arith.constant 0 : i32
    return %c0_i32, %c0_i32_0 : i32, i32
  }
  func.func @transform_3(%arg0: i32) -> (i32, i32) {
    %c0_i32 = arith.constant 0 : i32
    %c0_i32_0 = arith.constant 0 : i32
    %c0_i32_1 = arith.constant 0 : i32
    return %c0_i32, %c0_i32_0 : i32, i32
  }
  func.func @transform_4(%arg0: i32) -> (i32, i32) {
    %c0_i32 = arith.constant 0 : i32
    %c0_i32_0 = arith.constant 0 : i32
    %c0_i32_1 = arith.constant 0 : i32
    return %c0_i32, %c0_i32_0 : i32, i32
  }
  func.func @transform_5(%arg0: i32) -> (i32, i32) {
    %c0_i32 = arith.constant 0 : i32
    %c0_i32_0 = arith.constant 0 : i32
    %c0_i32_1 = arith.constant 0 : i32
    return %c0_i32, %c0_i32_0 : i32, i32
  }
  func.func @transform_6(%arg0: i32) -> (i32, i32) {
    %c0_i32 = arith.constant 0 : i32
    %c0_i32_0 = arith.constant 0 : i32
    %c0_i32_1 = arith.constant 0 : i32
    return %c0_i32, %c0_i32_0 : i32, i32
  }
  func.func @transform_7(%arg0: i32) -> (i32, i32) {
    %c0_i32 = arith.constant 0 : i32
    %c0_i32_0 = arith.constant 0 : i32
    %c0_i32_1 = arith.constant 0 : i32
    return %c0_i32, %c0_i32_0 : i32, i32
  }
  func.func @transform_8(%arg0: i32) -> (i32, i32) {
    %c0_i32 = arith.constant 0 : i32
    %c0_i32_0 = arith.constant 0 : i32
    %c0_i32_1 = arith.constant 0 : i32
    return %c0_i32, %c0_i32_0 : i32, i32
  }
  func.func @transform_9(%arg0: i32) -> (i32, i32) {
    %c0_i32 = arith.constant 0 : i32
    %c0_i32_0 = arith.constant 0 : i32
    %c0_i32_1 = arith.constant 0 : i32
    return %c0_i32, %c0_i32_0 : i32, i32
  }
  func.func @transform_10(%arg0: i32) -> (i32, i32, i32) {
    %c0_i32 = arith.constant 0 : i32
    %c0_i32_0 = arith.constant 0 : i32
    %c0_i32_1 = arith.constant 0 : i32
    %c0_i32_2 = arith.constant 0 : i32
    return %c0_i32, %c0_i32_0, %c0_i32_1 : i32, i32, i32
  }
  func.func @transform_11(%arg0: i32) -> (i32, i32) {
    %c0_i32 = arith.constant 0 : i32
    %c0_i32_0 = arith.constant 0 : i32
    %c0_i32_1 = arith.constant 0 : i32
    return %c0_i32, %c0_i32_0 : i32, i32
  }
  func.func @transform_12(%arg0: i32) -> (i32, i32) {
    %c0_i32 = arith.constant 0 : i32
    %c0_i32_0 = arith.constant 0 : i32
    %c0_i32_1 = arith.constant 0 : i32
    return %c0_i32, %c0_i32_0 : i32, i32
  }
  func.func @transform_13(%arg0: i32) -> (i32, i32) {
    %c0_i32 = arith.constant 0 : i32
    %c0_i32_0 = arith.constant 0 : i32
    %c0_i32_1 = arith.constant 0 : i32
    return %c0_i32, %c0_i32_0 : i32, i32
  }
  func.func @transform_14(%arg0: i32) -> (i32, i32) {
    %c0_i32 = arith.constant 0 : i32
    %c0_i32_0 = arith.constant 0 : i32
    %c0_i32_1 = arith.constant 0 : i32
    return %c0_i32, %c0_i32_0 : i32, i32
  }
  func.func @transform_15(%arg0: i32) -> (i32, i32) {
    %c0_i32 = arith.constant 0 : i32
    %c0_i32_0 = arith.constant 0 : i32
    return %arg0, %c0_i32 : i32, i32
  }
}

</mosaic_0001>

<bundles_post_ra>
// kernel: tpu_custom_call.1
= control target key start
LH: loop header
LB: loop body
LE: loop exit
PB: predicated region body
PF: predicated region fallthrough
CT: control target
= control target key end

     0   :  { %21 = vsyncpa [#allocation4], 0  ;;  %s7899_s0 = inlined_call_operand.hbm [shape: f32[768,6], index: 0, kind: input, shape index: {}]   ;;  %s7900_s1 = inlined_call_operand.hbm [shape: f32[8,16], index: 1, kind: input, shape index: {}]   ;;  %s7901_s2 = inlined_call_operand.hbm [shape: f32[16,24], index: 2, kind: input, shape index: {}]   ;;  %s7902_s3 = inlined_call_operand.<no memory space> [shape: f32[1,1], index: 3, kind: input, shape index: {}]   ;;  %s7903_s4 = inlined_call_operand.hbm [shape: f32[6,32], index: 4, kind: input, shape index: {}]   ;;  %s7904_s5 = inlined_call_operand.hbm [shape: f32[1,32], index: 5, kind: input, shape index: {}]   ;;  %s7905_s6 = inlined_call_operand.hbm [shape: bf16[32,64], index: 6, kind: input, shape index: {}]   ;;  %s7906_s7 = inlined_call_operand.hbm [shape: f32[1,64], index: 7, kind: input, shape index: {}]   ;;  %s7907_s8 = inlined_call_operand.hbm [shape: bf16[64,128], index: 8, kind: input, shape index: {}]   ;;  %s7908_s9 = inlined_call_operand.hbm [shape: f32[1,128], index: 9, kind: input, shape index: {}]   ;;  %s7909_s10 = inlined_call_operand.hbm [shape: bf16[4,128,128], index: 10, kind: input, shape index: {}]   ;;  %s7910_s11 = inlined_call_operand.hbm [shape: f32[4,128], index: 11, kind: input, shape index: {}]   ;;  %s7911_s12 = inlined_call_operand.hbm [shape: f32[8,128], index: 12, kind: input, shape index: {}]   ;;  %s7912_s13 = inlined_call_operand.hbm [shape: bf16[128,20], index: 13, kind: input, shape index: {}]   ;;  %s7913_s14 = inlined_call_operand.hbm [shape: f32[1,20], index: 14, kind: input, shape index: {}]   ;;  %s7914_s15 = inlined_call_operand.hbm [shape: f32[8,8], index: 15, kind: output, shape index: {}]  }
   0x1   :  { %22 = vsyncpa [#allocation7], 0 }
   0x2   :  { %23 = vsyncpa [#allocation10], 0 }
   0x3   :  { %24 = vsyncpa [#allocation13], 0 }
   0x4   :  { %25 = vsyncpa [#allocation16], 0 }
   0x5   :  { %26 = vsyncpa [#allocation19], 0 }
   0x6   :  { %27 = vsyncpa [#allocation22], 0 }
   0x7   :  { %28 = vsyncpa [#allocation25], 0 }
   0x8   :  { %29 = vsyncpa [#allocation5], 0  ;;  %s6216_s18 = smov [#allocation6]   ;;  %s6217_s20 = smov [#allocation9]  }
   0x9   :  { %s48_s19 = sshll.u32 %s6216_s18, 4  ;;  %s72_s21 = sshll.u32 %s6217_s20, 4  ;;  %s49_s19 = int_to_ptr.vmem [resolvable:$true] %s48_s19  ;;  %s73_s21 = int_to_ptr.vmem [resolvable:$true] %s72_s21 }
   0xa   :  { %s5868_s24 = scalar_lea.hbm %s7900_s1, 128 }
   0xb   :  { %p5869_p0 = scmp.ne.s32.totalorder %s7900_s1, %s5868_s24  ;;  %p5872_p1 = scmp.lt.u32.totalorder %s5868_s24, %s7900_s1 }
   0xd   :  { %p5874_p2 = pnand %p5872_p1, %p5869_p0 }
   0xf   :  { %5877 = shalt.err (!%p5874_p2)
}
  0x10   :  { %s5878_s29 = scalar_lea.vmem %s49_s19, 128  ;;  %p5883_p4 = scmp.lt.s32.totalorder %s49_s19, %s49_s19 }
  0x11   :  { %p5879_p3 = scmp.ne.s32.totalorder %s49_s19, %s5878_s29  ;;  %p5884_p5 = scmp.lt.s32.totalorder %s5878_s29, %s5878_s29 }
  0x13   :  { %p5885_p6 = por %p5884_p5, %p5883_p4 }
  0x15   :  { %p5886_p7 = pnand %p5885_p6, %p5879_p3 }
  0x17   :  { %5889 = shalt.err (!%p5886_p7)
}
  0x18   :  { %51 = dma.hbm_to_vmem [thread:$0]  %s7900_s1, 128, %s49_s19, [#allocation7]  }
  0x19   :  { %s5890_s20 = scalar_lea.hbm %s7903_s4, 128 }
  0x1a   :  { %p5891_p8 = scmp.ne.s32.totalorder %s7903_s4, %s5890_s20  ;;  %p5894_p9 = scmp.lt.u32.totalorder %s5890_s20, %s7903_s4 }
  0x1c   :  { %p5896_p10 = pnand %p5894_p9, %p5891_p8 }
  0x1e   :  { %5899 = shalt.err (!%p5896_p10)
}
  0x1f   :  { %s5900_s26 = scalar_lea.vmem %s73_s21, 128  ;;  %p5905_p12 = scmp.lt.s32.totalorder %s73_s21, %s73_s21 }
  0x20   :  { %p5901_p11 = scmp.ne.s32.totalorder %s73_s21, %s5900_s26  ;;  %p5906_p13 = scmp.lt.s32.totalorder %s5900_s26, %s5900_s26 }
  0x22   :  { %p5907_p0 = por %p5906_p13, %p5905_p12 }
  0x24   :  { %p5908_p1 = pnand %p5907_p0, %p5901_p11 }
  0x26   :  { %5911 = shalt.err (!%p5908_p1)
}
  0x27   :  { %75 = dma.hbm_to_vmem [thread:$0]  %s7903_s4, 128, %s73_s21, [#allocation10]  }
  0x28   :  { %s6218_s27 = smov [#allocation12]   ;;  %s5912_s16 = scalar_lea.hbm %s7905_s6, 256 }
  0x29   :  { %s91_s28 = sshll.u32 %s6218_s27, 4  ;;  %p5913_p2 = scmp.ne.s32.totalorder %s7905_s6, %s5912_s16  ;;  %s92_s28 = int_to_ptr.vmem [resolvable:$true] %s91_s28 }
  0x2a   :  { %p5916_p3 = scmp.lt.u32.totalorder %s5912_s16, %s7905_s6 }
  0x2c   :  { %p5918_p4 = pnand %p5916_p3, %p5913_p2 }
  0x2e   :  { %5921 = shalt.err (!%p5918_p4)
}
  0x2f   :  { %s5922_s23 = scalar_lea.vmem %s92_s28, 256  ;;  %p5927_p6 = scmp.lt.s32.totalorder %s92_s28, %s92_s28 }
  0x30   :  { %p5923_p5 = scmp.ne.s32.totalorder %s92_s28, %s5922_s23  ;;  %p5928_p7 = scmp.lt.s32.totalorder %s5922_s23, %s5922_s23 }
  0x32   :  { %p5929_p8 = por %p5928_p7, %p5927_p6 }
  0x34   :  { %p5930_p9 = pnand %p5929_p8, %p5923_p5 }
  0x36   :  { %5933 = shalt.err (!%p5930_p9)
}
  0x37   :  { %s6219_s4 = smov 64   ;;  %s6220_s21 = smov 4  }
  0x38   :  { %97 = dma.hbm_to_vmem [thread:$0]  %s7905_s6, 256, %s92_s28, [#allocation13], %s6219_s4, %s6219_s4, %s6220_s21  }
  0x39   :  { %s6221_s26 = smov [#allocation15]   ;;  %s6222_s19 = smov [#allocation18]  }
  0x3a   :  { %s113_s1 = sshll.u32 %s6221_s26, 4  ;;  %s135_s27 = sshll.u32 %s6222_s19, 4  ;;  %s114_s1 = int_to_ptr.vmem [resolvable:$true] %s113_s1  ;;  %s136_s27 = int_to_ptr.vmem [resolvable:$true] %s135_s27 }
  0x3b   :  { %s5934_s16 = scalar_lea.hbm %s7907_s8, 512 }
  0x3c   :  { %p5935_p10 = scmp.ne.s32.totalorder %s7907_s8, %s5934_s16  ;;  %p5938_p11 = scmp.lt.u32.totalorder %s5934_s16, %s7907_s8 }
  0x3e   :  { %p5940_p12 = pnand %p5938_p11, %p5935_p10 }
  0x40   :  { %5943 = shalt.err (!%p5940_p12)
}
  0x41   :  { %s5944_s6 = scalar_lea.vmem %s114_s1, 512  ;;  %p5949_p0 = scmp.lt.s32.totalorder %s114_s1, %s114_s1 }
  0x42   :  { %p5945_p13 = scmp.ne.s32.totalorder %s114_s1, %s5944_s6  ;;  %p5950_p1 = scmp.lt.s32.totalorder %s5944_s6, %s5944_s6 }
  0x44   :  { %p5951_p2 = por %p5950_p1, %p5949_p0 }
  0x46   :  { %p5952_p3 = pnand %p5951_p2, %p5945_p13 }
  0x48   :  { %5955 = shalt.err (!%p5952_p3)
}
  0x49   :  { %119 = dma.hbm_to_vmem [thread:$0]  %s7907_s8, 512, %s114_s1, [#allocation16], %s6219_s4, %s6219_s4, %s6220_s21  }
  0x4a   :  { %s5956_s26 = scalar_lea.hbm %s7909_s10, 4096 }
  0x4b   :  { %p5957_p4 = scmp.ne.s32.totalorder %s7909_s10, %s5956_s26  ;;  %p5960_p5 = scmp.lt.u32.totalorder %s5956_s26, %s7909_s10 }
  0x4d   :  { %p5962_p6 = pnand %p5960_p5, %p5957_p4 }
  0x4f   :  { %5965 = shalt.err (!%p5962_p6)
}
  0x50   :  { %s5966_s17 = scalar_lea.vmem %s136_s27, 4096  ;;  %p5971_p8 = scmp.lt.s32.totalorder %s136_s27, %s136_s27 }
  0x51   :  { %p5967_p7 = scmp.ne.s32.totalorder %s136_s27, %s5966_s17  ;;  %p5972_p9 = scmp.lt.s32.totalorder %s5966_s17, %s5966_s17 }
  0x53   :  { %p5973_p10 = por %p5972_p9, %p5971_p8 }
  0x55   :  { %p5974_p11 = pnand %p5973_p10, %p5967_p7 }
  0x57   :  { %5977 = shalt.err (!%p5974_p11)
}
  0x58   :  { %141 = dma.hbm_to_vmem [thread:$0]  %s7909_s10, 4096, %s136_s27, [#allocation19], %s6219_s4, %s6219_s4, %s6220_s21  }
  0x59   :  { %s6223_s18 = smov [#allocation21]   ;;  %s6224_s22 = smov [#allocation3]  }
  0x5a   :  { %s158_s20 = sshll.u32 %s6223_s18, 4  ;;  %s35_s6 = sshll.u32 %s6224_s22, 4  ;;  %s159_s20 = int_to_ptr.vmem [resolvable:$true] %s158_s20  ;;  %s36_s6 = int_to_ptr.vmem [resolvable:$true] %s35_s6 }
  0x5b   :  { %s5978_s24 = scalar_lea.hbm %s7911_s12, 128 }
  0x5c   :  { %p5979_p12 = scmp.ne.s32.totalorder %s7911_s12, %s5978_s24  ;;  %p5982_p13 = scmp.lt.u32.totalorder %s5978_s24, %s7911_s12 }
  0x5e   :  { %p5984_p0 = pnand %p5982_p13, %p5979_p12 }
  0x60   :  { %5987 = shalt.err (!%p5984_p0)
}
  0x61   :  { %s5988_s10 = scalar_lea.vmem %s159_s20, 128  ;;  %p5993_p2 = scmp.lt.s32.totalorder %s159_s20, %s159_s20 }
  0x62   :  { %p5989_p1 = scmp.ne.s32.totalorder %s159_s20, %s5988_s10  ;;  %p5994_p3 = scmp.lt.s32.totalorder %s5988_s10, %s5988_s10 }
  0x64   :  { %p5995_p4 = por %p5994_p3, %p5993_p2 }
  0x66   :  { %p5996_p5 = pnand %p5995_p4, %p5989_p1 }
  0x68   :  { %5999 = shalt.err (!%p5996_p5)
}
  0x69   :  { %161 = dma.hbm_to_vmem [thread:$0]  %s7911_s12, 128, %s159_s20, [#allocation22]  }
  0x6a   :  { %s6000_s8 = scalar_lea.hbm %s7899_s0, 12288 }
  0x6b   :  { %p6001_p6 = scmp.ne.s32.totalorder %s7899_s0, %s6000_s8  ;;  %p6004_p7 = scmp.lt.u32.totalorder %s6000_s8, %s7899_s0 }
  0x6d   :  { %p6006_p8 = pnand %p6004_p7, %p6001_p6 }
  0x6f   :  { %6009 = shalt.err (!%p6006_p8)
}
  0x70   :  { %s6010_s23 = scalar_lea.vmem %s36_s6, 12288  ;;  %p6015_p10 = scmp.lt.s32.totalorder %s36_s6, %s36_s6 }
  0x71   :  { %p6011_p9 = scmp.ne.s32.totalorder %s36_s6, %s6010_s23  ;;  %p6016_p11 = scmp.lt.s32.totalorder %s6010_s23, %s6010_s23 }
  0x73   :  { %p6017_p12 = por %p6016_p11, %p6015_p10 }
  0x75   :  { %p6018_p13 = pnand %p6017_p12, %p6011_p9 }
  0x77   :  { %6021 = shalt.err (!%p6018_p13)
}
  0x78   :  { %s6225_s12 = smov 128   ;;  %s6226_s20 = smov 8  }
  0x79   :  { %41 = dma.hbm_to_vmem [thread:$0]  %s7899_s0, 12288, %s36_s6, [#allocation4], %s6225_s12, %s6225_s12, %s6226_s20  }
  0x7a   :  { %s6227_s26 = smov [#allocation8]   ;;  %s6228_s29 = smov [#allocation11]  }
  0x7b   :  { %s57_s19 = sshll.u32 %s6227_s26, 4  ;;  %s82_s10 = sshll.u32 %s6228_s29, 4  ;;  %s58_s19 = int_to_ptr.vmem [resolvable:$true] %s57_s19  ;;  %s83_s10 = int_to_ptr.vmem [resolvable:$true] %s82_s10 }
  0x7c   :  { %s6022_s16 = scalar_lea.hbm %s7901_s2, 256 }
  0x7d   :  { %p6023_p0 = scmp.ne.s32.totalorder %s7901_s2, %s6022_s16  ;;  %p6026_p1 = scmp.lt.u32.totalorder %s6022_s16, %s7901_s2 }
  0x7f   :  { %p6028_p2 = pnand %p6026_p1, %p6023_p0 }
  0x81   :  { %6031 = shalt.err (!%p6028_p2)
}
  0x82   :  { %s6032_s0 = scalar_lea.vmem %s58_s19, 256  ;;  %p6037_p4 = scmp.lt.s32.totalorder %s58_s19, %s58_s19 }
  0x83   :  { %p6033_p3 = scmp.ne.s32.totalorder %s58_s19, %s6032_s0  ;;  %p6038_p5 = scmp.lt.s32.totalorder %s6032_s0, %s6032_s0 }
  0x85   :  { %p6039_p6 = por %p6038_p5, %p6037_p4 }
  0x87   :  { %p6040_p7 = pnand %p6039_p6, %p6033_p3 }
  0x89   :  { %6043 = shalt.err (!%p6040_p7)
}
  0x8a   :  { %63 = dma.hbm_to_vmem [thread:$0]  %s7901_s2, 256, %s58_s19, [#allocation7], %s6225_s12, %s6225_s12, %s6226_s20  }
  0x8b   :  { %s6044_s24 = scalar_lea.hbm %s7904_s5, 16 }
  0x8c   :  { %p6045_p8 = scmp.ne.s32.totalorder %s7904_s5, %s6044_s24  ;;  %p6048_p9 = scmp.lt.u32.totalorder %s6044_s24, %s7904_s5 }
  0x8e   :  { %p6050_p10 = pnand %p6048_p9, %p6045_p8 }
  0x90   :  { %6053 = shalt.err (!%p6050_p10)
}
  0x91   :  { %s6054_s30 = scalar_lea.vmem %s83_s10, 16  ;;  %s6058_s16 = scalar_lea.vmem %s83_s10, 32 }
  0x92   :  { %p6055_p11 = scmp.ne.s32.totalorder %s83_s10, %s6054_s30  ;;  %p6059_p12 = scmp.lt.s32.totalorder %s83_s10, %s83_s10 }
  0x93   :  { %p6060_p13 = scmp.lt.s32.totalorder %s6058_s16, %s6054_s30 }
  0x95   :  { %p6061_p0 = por %p6060_p13, %p6059_p12 }
  0x97   :  { %p6062_p1 = pnand %p6061_p0, %p6055_p11 }
  0x99   :  { %6065 = shalt.err (!%p6062_p1)
}
  0x9a   :  { %85 = dma.hbm_to_vmem [thread:$0]  %s7904_s5, 16, %s83_s10, [#allocation10]  }
  0x9b   :  { %s6229_s20 = smov [#allocation14]   ;;  %s6230_s17 = smov [#allocation17]  }
  0x9c   :  { %s104_s19 = sshll.u32 %s6229_s20, 4  ;;  %s126_s8 = sshll.u32 %s6230_s17, 4  ;;  %s105_s19 = int_to_ptr.vmem [resolvable:$true] %s104_s19  ;;  %s127_s8 = int_to_ptr.vmem [resolvable:$true] %s126_s8 }
  0x9d   :  { %s6066_s0 = scalar_lea.hbm %s7906_s7, 16 }
  0x9e   :  { %p6067_p2 = scmp.ne.s32.totalorder %s7906_s7, %s6066_s0  ;;  %p6070_p3 = scmp.lt.u32.totalorder %s6066_s0, %s7906_s7 }
  0xa0   :  { %p6072_p4 = pnand %p6070_p3, %p6067_p2 }
  0xa2   :  { %6075 = shalt.err (!%p6072_p4)
}
  0xa3   :  { %s6076_s5 = scalar_lea.vmem %s105_s19, 16  ;;  %s6080_s10 = scalar_lea.vmem %s105_s19, 32 }
  0xa4   :  { %p6077_p5 = scmp.ne.s32.totalorder %s105_s19, %s6076_s5  ;;  %p6081_p6 = scmp.lt.s32.totalorder %s105_s19, %s105_s19 }
  0xa5   :  { %p6082_p7 = scmp.lt.s32.totalorder %s6080_s10, %s6076_s5 }
  0xa7   :  { %p6083_p8 = por %p6082_p7, %p6081_p6 }
  0xa9   :  { %p6084_p9 = pnand %p6083_p8, %p6077_p5 }
  0xab   :  { %6087 = shalt.err (!%p6084_p9)
}
  0xac   :  { %107 = dma.hbm_to_vmem [thread:$0]  %s7906_s7, 16, %s105_s19, [#allocation13]  }
  0xad   :  { %s6088_s27 = scalar_lea.hbm %s7908_s9, 16 }
  0xae   :  { %p6089_p10 = scmp.ne.s32.totalorder %s7908_s9, %s6088_s27  ;;  %p6092_p11 = scmp.lt.u32.totalorder %s6088_s27, %s7908_s9 }
  0xb0   :  { %p6094_p12 = pnand %p6092_p11, %p6089_p10 }
  0xb2   :  { %6097 = shalt.err (!%p6094_p12)
}
  0xb3   :  { %s6098_s20 = scalar_lea.vmem %s127_s8, 16  ;;  %s6102_s17 = scalar_lea.vmem %s127_s8, 32 }
  0xb4   :  { %p6099_p13 = scmp.ne.s32.totalorder %s127_s8, %s6098_s20  ;;  %p6103_p0 = scmp.lt.s32.totalorder %s127_s8, %s127_s8 }
  0xb5   :  { %p6104_p1 = scmp.lt.s32.totalorder %s6102_s17, %s6098_s20 }
  0xb7   :  { %p6105_p2 = por %p6104_p1, %p6103_p0 }
  0xb9   :  { %p6106_p3 = pnand %p6105_p2, %p6099_p13 }
  0xbb   :  { %6109 = shalt.err (!%p6106_p3)
}
  0xbc   :  { %129 = dma.hbm_to_vmem [thread:$0]  %s7908_s9, 16, %s127_s8, [#allocation16]  }
  0xbd   :  { %s6231_s1 = smov [#allocation20]   ;;  %s6232_s0 = smov [#allocation23]  }
  0xbe   :  { %s148_s18 = sshll.u32 %s6231_s1, 4  ;;  %s167_s6 = sshll.u32 %s6232_s0, 4  ;;  %s149_s18 = int_to_ptr.vmem [resolvable:$true] %s148_s18  ;;  %s168_s6 = int_to_ptr.vmem [resolvable:$true] %s167_s6 }
  0xbf   :  { %s6110_s23 = scalar_lea.hbm %s7910_s11, 64 }
  0xc0   :  { %p6111_p4 = scmp.ne.s32.totalorder %s7910_s11, %s6110_s23  ;;  %p6114_p5 = scmp.lt.u32.totalorder %s6110_s23, %s7910_s11 }
  0xc2   :  { %p6116_p6 = pnand %p6114_p5, %p6111_p4 }
  0xc4   :  { %6119 = shalt.err (!%p6116_p6)
}
  0xc5   :  { %s6120_s9 = scalar_lea.vmem %s149_s18, 64  ;;  %p6125_p8 = scmp.lt.s32.totalorder %s149_s18, %s149_s18 }
  0xc6   :  { %p6121_p7 = scmp.ne.s32.totalorder %s149_s18, %s6120_s9  ;;  %p6126_p9 = scmp.lt.s32.totalorder %s6120_s9, %s6120_s9 }
  0xc8   :  { %p6127_p10 = por %p6126_p9, %p6125_p8 }
  0xca   :  { %p6128_p11 = pnand %p6127_p10, %p6121_p7 }
  0xcc   :  { %6131 = shalt.err (!%p6128_p11)
}
  0xcd   :  { %151 = dma.hbm_to_vmem [thread:$0]  %s7910_s11, 64, %s149_s18, [#allocation19]  }
  0xce   :  { %s6132_s30 = scalar_lea.hbm %s7912_s13, 1024 }
  0xcf   :  { %p6133_p12 = scmp.ne.s32.totalorder %s7912_s13, %s6132_s30  ;;  %p6136_p13 = scmp.lt.u32.totalorder %s6132_s30, %s7912_s13 }
  0xd1   :  { %p6138_p0 = pnand %p6136_p13, %p6133_p12 }
  0xd3   :  { %6141 = shalt.err (!%p6138_p0)
}
  0xd4   :  { %s6142_s17 = scalar_lea.vmem %s168_s6, 1024  ;;  %p6147_p2 = scmp.lt.s32.totalorder %s168_s6, %s168_s6 }
  0xd5   :  { %p6143_p1 = scmp.ne.s32.totalorder %s168_s6, %s6142_s17  ;;  %p6148_p3 = scmp.lt.s32.totalorder %s6142_s17, %s6142_s17 }
  0xd7   :  { %p6149_p4 = por %p6148_p3, %p6147_p2 }
  0xd9   :  { %p6150_p5 = pnand %p6149_p4, %p6143_p1 }
  0xdb   :  { %6153 = shalt.err (!%p6150_p5)
}
  0xdc   :  { %173 = dma.hbm_to_vmem [thread:$0]  %s7912_s13, 1024, %s168_s6, [#allocation22], %s6219_s4, %s6219_s4, %s6220_s21  }
  0xdd   :  { %s6233_s19 = smov [#allocation24]   ;;  %s6154_s22 = scalar_lea.hbm %s7913_s14, 16 }
  0xde   :  { %s180_s1 = sshll.u32 %s6233_s19, 4  ;;  %p6155_p6 = scmp.ne.s32.totalorder %s7913_s14, %s6154_s22  ;;  %s181_s1 = int_to_ptr.vmem [resolvable:$true] %s180_s1 }
  0xdf   :  { %p6158_p7 = scmp.lt.u32.totalorder %s6154_s22, %s7913_s14 }
  0xe1   :  { %p6160_p8 = pnand %p6158_p7, %p6155_p6 }
  0xe3   :  { %6163 = shalt.err (!%p6160_p8)
}
  0xe4   :  { %s6164_s24 = scalar_lea.vmem %s181_s1, 16  ;;  %s6168_s13 = scalar_lea.vmem %s181_s1, 32 }
  0xe5   :  { %p6165_p9 = scmp.ne.s32.totalorder %s181_s1, %s6164_s24  ;;  %p6169_p10 = scmp.lt.s32.totalorder %s181_s1, %s181_s1 }
  0xe6   :  { %p6170_p11 = scmp.lt.s32.totalorder %s6168_s13, %s6164_s24 }
  0xe8   :  { %p6171_p12 = por %p6170_p11, %p6169_p10 }
  0xea   :  { %p6172_p13 = pnand %p6171_p12, %p6165_p9 }
  0xec   :  { %6175 = shalt.err (!%p6172_p13)
}
  0xed   :  { %183 = dma.hbm_to_vmem [thread:$0]  %s7913_s14, 16, %s181_s1, [#allocation25]  }
  0xee   :  { %6198 = dma.done.wait [#allocation4], 12288  }
  0xef   :  { %6199 = vsyncadd [#allocation4], 4294955008 }
  0xf0   :  { %6200 = dma.done.wait [#allocation7], 384  }
  0xf1   :  { %6201 = vsyncadd [#allocation7], 4294966912 }
  0xf2   :  { %6202 = dma.done.wait [#allocation10], 144  }
  0xf3   :  { %6203 = vsyncadd [#allocation10], 4294967152 }
  0xf4   :  { %6204 = dma.done.wait [#allocation13], 272  }
  0xf5   :  { %6205 = vsyncadd [#allocation13], 4294967024 }
  0xf6   :  { %6206 = dma.done.wait [#allocation16], 528  }
  0xf7   :  { %6207 = vsyncadd [#allocation16], 4294966768 }
  0xf8   :  { %6208 = dma.done.wait [#allocation19], 4160  }
  0xf9   :  { %6209 = vsyncadd [#allocation19], 4294963136 }
  0xfa   :  { %6210 = dma.done.wait [#allocation22], 1152  }
  0xfb   :  { %6211 = vsyncadd [#allocation22], 4294966144 }
  0xfc   :  { %6212 = dma.done.wait [#allocation25], 16  }
  0xfd   :  { %6213 = vsyncadd [#allocation25], 4294967280  ;;  %vm1015_vm0 = vcmask 1045504   ;;  %v6511_v0 = vstv %s7902_s3  ;;  %v718_v1 = vld [vmem:[#allocation9] sm:$0x3f]  ;;  %v232_v2 = vld [vmem:[#allocation3] sm:$0xff]  ;;  %v617_v22 = vlaneseq }
  0xfe   :  { %v233_v3 = vld [vmem:[#allocation3 + $0x8] sm:$0xff]  ;;  %5083 = vmatprep.subr.msk.mxu0 %vm1015_vm0, %v718_v1  ;;  %v329_v4 = vadd.f32 %v6511_v0, %v232_v2  ;;  %v234_v6 = vld [vmem:[#allocation3 + $0x10] sm:$0xff]  ;;  %v6515_v7 = vld [vmem:[#allocation3 + $0x18] sm:$0xff]  ;;  %vm726_vm2 = vcmask 48128   ;;  %vm1731_vm3 = vcmask 261120   ;;  %vm2476_vm4 = vcmask 523264  }
  0xff   :  { %v330_v5 = vadd.f32 %v6511_v0, %v233_v3  ;;  %v6517_v8 = vld [vmem:[#allocation3 + $0x20] sm:$0xff]  ;;  %5084 = vmatpush3.msk.msra.mxu0 %vm1015_vm0, %v718_v1  ;;  %v331_v9 = vadd.f32 %v6511_v0, %v234_v6  ;;  %v332_v10 = vadd.f32 %v6511_v0, %v6515_v7  ;;  %v6524_v12 = vld [vmem:[#allocation3 + $0x28] sm:$0xff]  ;;  %v6526_v13 = vld [vmem:[#allocation3 + $0x30] sm:$0xff]  ;;  %v6545_v30 = vand.u32 127, %v617_v22  ;;  %s6239_s3 = smov 116   ;;  %s6240_s14 = smov 124  }
 0x100   :  { %v333_v11 = vadd.f32 %v6511_v0, %v6517_v8  ;;  %v425_v14 = vmax.f32 %v329_v4, 1e-08  ;;  %v334_v16 = vadd.f32 %v6511_v0, %v6524_v12  ;;  %v335_v17 = vadd.f32 %v6511_v0, %v6526_v13  ;;  %v6532_v18 = vld [vmem:[#allocation3 + $0x38] sm:$0xff]  ;;  %v6534_v21 = vld [vmem:[#allocation3 + $0x40] sm:$0xff]  ;;  %v6540_v28 = vld [vmem:[#allocation3 + $0x48] sm:$0xff]  ;;  %s6242_s9 = smov 121  }
 0x101   :  { %v426_v15 = vmax.f32 %v330_v5, 1e-08  ;;  %v427_v19 = vmax.f32 %v331_v9, 1e-08  ;;  %v428_v20 = vmax.f32 %v332_v10, 1e-08  ;;  %v336_v25 = vadd.f32 %v6511_v0, %v6532_v18 }
 0x102   :  { %5658 = vrcp.f32 %v425_v14  ;;  %v429_v23 = vmax.f32 %v333_v11, 1e-08  ;;  %v430_v24 = vmax.f32 %v334_v16, 1e-08  ;;  %v431_v26 = vmax.f32 %v335_v17, 1e-08 }
 0x103   :  { %5660 = vrcp.f32 %v426_v15  ;;  %v337_v27 = vadd.f32 %v6511_v0, %v6534_v21  ;;  %v6542_v29 = vld [vmem:[#allocation3 + $0x50] sm:$0xff]  ;;  %v432_v31 = vmax.f32 %v336_v25, 1e-08  ;;  %v338_v32 = vadd.f32 %v6511_v0, %v6540_v28  ;;  %v6551_v35 = vld [vmem:[#allocation3 + $0x58] sm:$0xff]  ;;  %v6553_v36 = vld [vmem:[#allocation3 + $0x60] sm:$0xff]  ;;  %s6243_s8 = smov 126  }
 0x104   :  { %5662 = vrcp.f32 %v427_v19  ;;  %v339_v34 = vadd.f32 %v6511_v0, %v6542_v29  ;;  %vm619_vm1 = vcmp.eq.s32.totalorder %v6545_v30, 2  ;;  %v340_v38 = vadd.f32 %v6511_v0, %v6551_v35  ;;  %v6560_v42 = vld [vmem:[#allocation3 + $0x68] sm:$0xff]  ;;  %v6564_v45 = vld [vmem:[#allocation3 + $0x70] sm:$0xff]  ;;  %v6580_v56 = vld [vmem:[#allocation3 + $0x78] sm:$0xff]  ;;  %s6244_s26 = smov 112   ;;  %s6245_s29 = smov 120  }
 0x105   :  { %5664 = vrcp.f32 %v428_v20  ;;  %v433_v33 = vmax.f32 %v337_v27, 1e-08  ;;  %v434_v37 = vmax.f32 %v338_v32, 1e-08  ;;  %v341_v41 = vadd.f32 %v6511_v0, %v6553_v36  ;;  %v6585_v59 = vld [vmem:[#allocation3 + $0x80] sm:$0xff]  ;;  %v6606_v10 = vld [vmem:[#allocation3 + $0x98] sm:$0xff] }
 0x106   :  { %5666 = vrcp.f32 %v429_v23  ;;  %v435_v40 = vmax.f32 %v339_v34, 1e-08  ;;  %v436_v50 = vmax.f32 %v340_v38, 1e-08  ;;  %v342_v51 = vadd.f32 %v6511_v0, %v6560_v42  ;;  %v6608_v11 = vld [vmem:[#allocation3 + $0xa0] sm:$0xff]  ;;  %v6624_v23 = vld [vmem:[#allocation3 + $0xa8] sm:$0xff] }
 0x107   :  { %5668 = vrcp.f32 %v430_v24  ;;  %v437_v54 = vmax.f32 %v341_v41, 1e-08  ;;  %v343_v55 = vadd.f32 %v6511_v0, %v6564_v45  ;;  %v344_v62 = vadd.f32 %v6511_v0, %v6580_v56  ;;  %v6626_v24 = vld [vmem:[#allocation3 + $0xb0] sm:$0xff]  ;;  %v6639_v38 = vld [vmem:[#allocation3 + $0xb8] sm:$0xff]  ;;  %s6246_s27 = smov 2   ;;  %s6247_s30 = smov [#allocation26]  }
 0x108   :  { %5670 = vrcp.f32 %v431_v26  ;;  %v438_v61 = vmax.f32 %v342_v51, 1e-08  ;;  %v348_v19 = vadd.f32 %v6511_v0, %v6606_v10  ;;  %v349_v20 = vadd.f32 %v6511_v0, %v6608_v11  ;;  %s4553_s16 = sshll.u32 %s6247_s30, 4  ;;  %s4554_s16 = int_to_ptr.vmem [resolvable:$true] %s4553_s16 }
 0x109   :  { %5672 = vrcp.f32 %v432_v31  ;;  %v439_v1 = vmax.f32 %v343_v55, 1e-08  ;;  %v350_v34 = vadd.f32 %v6511_v0, %v6624_v23  ;;  %vm6235_vm5 = vmmov 1   ;;  %s6176_s2 = scalar_lea.vmem %s4554_s16, 128  ;;  %p6181_p1 = scmp.lt.s32.totalorder %s4554_s16, %s4554_s16 }
 0x10a   :  { %5674 = vrcp.f32 %v433_v33  ;;  %v444_v32 = vmax.f32 %v348_v19, 1e-08  ;;  %v445_v33 = vmax.f32 %v349_v20, 1e-08  ;;  %vm3231_vm6 = vmpackc.low %vm6235_vm5, %vm6235_vm5  ;;  %vm6237_vm11 = vmmov 0   ;;  %p6177_p0 = scmp.ne.s32.totalorder %s4554_s16, %s6176_s2  ;;  %p6182_p2 = scmp.lt.s32.totalorder %s6176_s2, %s6176_s2 }
 0x10b   :  { %5676 = vrcp.f32 %v434_v37  ;;  %v351_v37 = vadd.f32 %v6511_v0, %v6626_v24  ;;  %vm3466_vm12 = vcmask 64512   ;;  %vm3556_vm13 = vcmask 1041409  }
 0x10c   :  { %v5659_v39 = vpop.eup %5658  ;;  %5678 = vrcp.f32 %v435_v40  ;;  %vm3558_vm14 = vcmask 1042434   ;;  %vm3560_vm15 = vcmask 1043459   ;;  %vm3562_vm0 = vcmask 1044484   ;;  %p6183_p3 = por %p6182_p2, %p6181_p1 }
 0x10d   :  { %v5661_v43 = vpop.eup %5660  ;;  %v622_v44 = vsel %vm619_vm1, %v5659_v39, %v232_v2  ;;  %5680 = vrcp.f32 %v436_v50  ;;  %v345_v2 = vadd.f32 %v6511_v0, %v6585_v59  ;;  %v6641_v39 = vld [vmem:[#allocation3 + $0xc0] sm:$0xff]  ;;  %vm4138_vm5 = vcmask 1043456  }
 0x10e   :  { %v5663_v46 = vpop.eup %5662  ;;  %5085 = vmatprep.mubr.msk.f32.mxu0 %vm726_vm2, %v622_v44  ;;  %v623_v47 = vsel %vm619_vm1, %v5661_v43, %v233_v3  ;;  %5682 = vrcp.f32 %v437_v54  ;;  %v6596_v3 = vld [vmem:[#allocation3 + $0x88] sm:$0xff]  ;;  %v446_v43 = vmax.f32 %v350_v34, 1e-08  ;;  %v447_v44 = vmax.f32 %v351_v37, 1e-08  ;;  %p6184_p4 = pnand %p6183_p3, %p6177_p0 }
 0x10f   :  { %v5665_v48 = vpop.eup %5664  ;;  %5086 = vmatmul.mubr.msk.f32.vlgmr.msra.gmra.mrb[0].mxu0 %vm726_vm2, %v623_v47  ;;  %v624_v49 = vsel %vm619_vm1, %v5663_v46, %v234_v6  ;;  %v6601_v6 = vld [vmem:[#allocation3 + $0x90] sm:$0xff]  ;;  %5684 = vrcp.f32 %v438_v61  ;;  %v346_v9 = vadd.f32 %v6511_v0, %v6596_v3  ;;  %v352_v46 = vadd.f32 %v6511_v0, %v6639_v38 }
 0x110   :  { %v5667_v52 = vpop.eup %5666  ;;  %5088 = vmatprep.mubr.msk.f32.mxu0 %vm726_vm2, %v624_v49  ;;  %v625_v53 = vsel %vm619_vm1, %v5665_v48, %v6515_v7  ;;  %5686 = vrcp.f32 %v439_v1  ;;  %v347_v14 = vadd.f32 %v6511_v0, %v6601_v6  ;;  %v353_v47 = vadd.f32 %v6511_v0, %v6641_v39  ;;  %v6655_v48 = vld [vmem:[#allocation3 + $0xc8] sm:$0xff]  ;;  %v6657_v49 = vld [vmem:[#allocation3 + $0xd0] sm:$0xff] }
 0x111   :  { %v5669_v57 = vpop.eup %5668  ;;  %v626_v58 = vsel %vm619_vm1, %v5667_v52, %v6517_v8  ;;  %v440_v8 = vmax.f32 %v344_v62, 1e-08  ;;  %v448_v52 = vmax.f32 %v352_v46, 1e-08  ;;  %v354_v54 = vadd.f32 %v6511_v0, %v6655_v48 }
 0x112   :  { %v5671_v60 = vpop.eup %5670  ;;  %v627_v63 = vsel %vm619_vm1, %v5669_v57, %v6524_v12  ;;  %v443_v25 = vmax.f32 %v347_v14, 1e-08  ;;  %v355_v55 = vadd.f32 %v6511_v0, %v6657_v49  ;;  %v6671_v57 = vld [vmem:[#allocation3 + $0xd8] sm:$0xff] }
 0x113   :  { %5089 = vmatmul.mubr.msk.f32.gmra.mrb[2].mxu0 %vm726_vm2, %v625_v53  ;;  %v5673_v4 = vpop.eup %5672  ;;  %v628_v5 = vsel %vm619_vm1, %v5671_v60, %v6526_v13  ;;  %v441_v13 = vmax.f32 %v345_v2, 1e-08  ;;  %5688 = vrcp.f32 %v440_v8  ;;  %v449_v53 = vmax.f32 %v353_v47, 1e-08 }
 0x114   :  { %5091 = vmatprep.mubr.msk.f32.mxu0 %vm726_vm2, %v626_v58  ;;  %v5675_v7 = vpop.eup %5674  ;;  %v629_v12 = vsel %vm619_vm1, %v5673_v4, %v6532_v18  ;;  %v442_v18 = vmax.f32 %v346_v9, 1e-08  ;;  %v6673_v58 = vld [vmem:[#allocation3 + $0xe0] sm:$0xff]  ;;  %v450_v62 = vmax.f32 %v354_v54, 1e-08  ;;  %v356_v1 = vadd.f32 %v6511_v0, %v6671_v57  ;;  %v6687_v4 = vld [vmem:[#allocation3 + $0xe8] sm:$0xff] }
 0x115   :  { %v5677_v15 = vpop.eup %5676  ;;  %v630_v16 = vsel %vm619_vm1, %v5675_v7, %v6534_v21  ;;  %5690 = vrcp.f32 %v441_v13  ;;  %v357_v2 = vadd.f32 %v6511_v0, %v6673_v58  ;;  %v358_v13 = vadd.f32 %v6511_v0, %v6687_v4 }
 0x116   :  { %v5679_v17 = vpop.eup %5678  ;;  %v631_v21 = vsel %vm619_vm1, %v5677_v15, %v6540_v28  ;;  %5692 = vrcp.f32 %v442_v18  ;;  %v452_v9 = vmax.f32 %v356_v1, 1e-08  ;;  %v6703_v15 = vld [vmem:[#allocation3 + $0xf8] sm:$0xff] }
 0x117   :  { %5092 = vmatmul.mubr.msk.f32.gmra.mrb[4].mxu0 %vm726_vm2, %v627_v63  ;;  %v5681_v26 = vpop.eup %5680  ;;  %v632_v27 = vsel %vm619_vm1, %v5679_v17, %v6542_v29  ;;  %5694 = vrcp.f32 %v443_v25  ;;  %v451_v63 = vmax.f32 %v355_v55, 1e-08  ;;  %v454_v20 = vmax.f32 %v358_v13, 1e-08 }
 0x118   :  { %5094 = vmatprep.mubr.msk.f32.mxu0 %vm726_vm2, %v628_v5  ;;  %v5683_v31 = vpop.eup %5682  ;;  %v633_v28 = vsel %vm619_vm1, %v5681_v26, %v6551_v35  ;;  %5696 = vrcp.f32 %v444_v32  ;;  %v6689_v5 = vld [vmem:[#allocation3 + $0xf0] sm:$0xff]  ;;  %v6719_v26 = vld [vmem:[#allocation3 + $0x108] sm:$0xff] }
 0x119   :  { %v5685_v29 = vpop.eup %5684  ;;  %v634_v40 = vsel %vm619_vm1, %v5683_v31, %v6553_v36  ;;  %5698 = vrcp.f32 %v445_v33  ;;  %v359_v14 = vadd.f32 %v6511_v0, %v6689_v5  ;;  %v362_v37 = vadd.f32 %v6511_v0, %v6719_v26 }
 0x11a   :  { %v5687_v41 = vpop.eup %5686  ;;  %v635_v35 = vsel %vm619_vm1, %v5685_v29, %v6560_v42  ;;  %5700 = vrcp.f32 %v446_v43  ;;  %v6735_v29 = vld [vmem:[#allocation3 + $0x118] sm:$0xff] }
 0x11b   :  { %5095 = vmatmul.mubr.msk.f32.gmra.mrb[6].mxu0 %vm726_vm2, %v629_v12  ;;  %v636_v50 = vsel %vm619_vm1, %v5687_v41, %v6564_v45  ;;  %5702 = vrcp.f32 %v447_v44  ;;  %v453_v12 = vmax.f32 %v357_v2, 1e-08  ;;  %v455_v18 = vmax.f32 %v359_v14, 1e-08 }
 0x11c   :  { %5097 = vmatprep.mubr.msk.f32.mxu0 %vm726_vm2, %v630_v16  ;;  %5704 = vrcp.f32 %v448_v52  ;;  %v6705_v16 = vld [vmem:[#allocation3 + $0x100] sm:$0xff]  ;;  %v458_v44 = vmax.f32 %v362_v37, 1e-08  ;;  %v364_v47 = vadd.f32 %v6511_v0, %v6735_v29  ;;  %v6763_v52 = vld [vmem:[#allocation3 + $0x138] sm:$0xff] }
 0x11d   :  { %v5689_v36 = vpop.eup %5688  ;;  %5706 = vrcp.f32 %v449_v53  ;;  %v361_v25 = vadd.f32 %v6511_v0, %v6705_v16  ;;  %v6765_v53 = vld [vmem:[#allocation3 + $0x140] sm:$0xff] }
 0x11e   :  { %v637_v42 = vsel %vm619_vm1, %v5689_v36, %v6580_v56  ;;  %5708 = vrcp.f32 %v450_v62  ;;  %v6751_v36 = vld [vmem:[#allocation3 + $0x128] sm:$0xff]  ;;  %v460_v55 = vmax.f32 %v364_v47, 1e-08 }
 0x11f   :  { %5098 = vmatmul.mubr.msk.f32.gmra.mrb[8].mxu0 %vm726_vm2, %v631_v21  ;;  %v5691_v51 = vpop.eup %5690  ;;  %5710 = vrcp.f32 %v451_v63  ;;  %v360_v21 = vadd.f32 %v6511_v0, %v6703_v15  ;;  %v457_v34 = vmax.f32 %v361_v25, 1e-08  ;;  %v6779_v62 = vld [vmem:[#allocation3 + $0x148] sm:$0xff]  ;;  %v6781_v63 = vld [vmem:[#allocation3 + $0x150] sm:$0xff] }
 0x120   :  { %5100 = vmatprep.mubr.msk.f32.mxu0 %vm726_vm2, %v632_v27  ;;  %v5693_v45 = vpop.eup %5692  ;;  %v638_v60 = vsel %vm619_vm1, %v5691_v51, %v6585_v59  ;;  %v6721_v27 = vld [vmem:[#allocation3 + $0x110] sm:$0xff]  ;;  %5712 = vrcp.f32 %v452_v9  ;;  %v6795_v9 = vld [vmem:[#allocation3 + $0x158] sm:$0xff] }
 0x121   :  { %v5695_v61 = vpop.eup %5694  ;;  %v639_v56 = vsel %vm619_vm1, %v5693_v45, %v6596_v3  ;;  %5714 = vrcp.f32 %v453_v12  ;;  %v456_v33 = vmax.f32 %v360_v21, 1e-08  ;;  %v366_v45 = vadd.f32 %v6511_v0, %v6751_v36  ;;  %v6797_v12 = vld [vmem:[#allocation3 + $0x160] sm:$0xff] }
 0x122   :  { %v5697_v59 = vpop.eup %5696  ;;  %v640_v7 = vsel %vm619_vm1, %v5695_v61, %v6601_v6  ;;  %5716 = vrcp.f32 %v454_v20  ;;  %v372_v25 = vadd.f32 %v6511_v0, %v6795_v9 }
 0x123   :  { %5101 = vmatmul.mubr.msk.f32.gmra.mrb[10].mxu0 %vm726_vm2, %v633_v28  ;;  %v5699_v8 = vpop.eup %5698  ;;  %v641_v3 = vsel %vm619_vm1, %v5697_v59, %v6606_v10  ;;  %v363_v28 = vadd.f32 %v6511_v0, %v6721_v27  ;;  %5718 = vrcp.f32 %v455_v18  ;;  %v462_v2 = vmax.f32 %v366_v45, 1e-08 }
 0x124   :  { %5103 = vmatprep.mubr.msk.f32.mxu0 %vm726_vm2, %v634_v40  ;;  %v5701_v6 = vpop.eup %5700  ;;  %v642_v17 = vsel %vm619_vm1, %v5699_v8, %v6608_v11  ;;  %v6737_v40 = vld [vmem:[#allocation3 + $0x120] sm:$0xff]  ;;  %5720 = vrcp.f32 %v456_v33  ;;  %v368_v59 = vadd.f32 %v6511_v0, %v6763_v52 }
 0x125   :  { %v5703_v19 = vpop.eup %5702  ;;  %v643_v10 = vsel %vm619_vm1, %v5701_v6, %v6624_v23  ;;  %v459_v46 = vmax.f32 %v363_v28, 1e-08  ;;  %5722 = vrcp.f32 %v457_v34  ;;  %v370_v6 = vadd.f32 %v6511_v0, %v6779_v62  ;;  %v6827_v28 = vld [vmem:[#allocation3 + $0x178] sm:$0xff] }
 0x126   :  { %v5705_v11 = vpop.eup %5704  ;;  %v644_v31 = vsel %vm619_vm1, %v5703_v19, %v6626_v24  ;;  %5724 = vrcp.f32 %v458_v44  ;;  %v464_v14 = vmax.f32 %v368_v59, 1e-08  ;;  %v468_v34 = vmax.f32 %v372_v25, 1e-08 }
 0x127   :  { %5104 = vmatmul.mubr.msk.f32.gmra.mrb[12].mxu0 %vm726_vm2, %v635_v35  ;;  %v5707_v32 = vpop.eup %5706  ;;  %v645_v23 = vsel %vm619_vm1, %v5705_v11, %v6639_v38  ;;  %v365_v35 = vadd.f32 %v6511_v0, %v6737_v40  ;;  %5726 = vrcp.f32 %v459_v46  ;;  %v466_v18 = vmax.f32 %v370_v6, 1e-08  ;;  %v6815_v11 = vld [vmem:[#allocation3 + $0x168] sm:$0xff] }
 0x128   :  { %5106 = vmatprep.mubr.msk.f32.mxu0 %vm726_vm2, %v636_v50  ;;  %v5709_v24 = vpop.eup %5708  ;;  %v646_v41 = vsel %vm619_vm1, %v5707_v32, %v6641_v39  ;;  %v6753_v50 = vld [vmem:[#allocation3 + $0x130] sm:$0xff]  ;;  %5728 = vrcp.f32 %v460_v55  ;;  %v376_v47 = vadd.f32 %v6511_v0, %v6827_v28 }
 0x129   :  { %v5711_v43 = vpop.eup %5710  ;;  %v647_v38 = vsel %vm619_vm1, %v5709_v24, %v6655_v48  ;;  %v6825_v32 = vld [vmem:[#allocation3 + $0x170] sm:$0xff] }
 0x12a   :  { %v5713_v39 = vpop.eup %5712  ;;  %v648_v51 = vsel %vm619_vm1, %v5711_v43, %v6657_v49  ;;  %v6841_v43 = vld [vmem:[#allocation3 + $0x180] sm:$0xff] }
 0x12b   :  { %5107 = vmatmul.mubr.msk.f32.gmra.mrb[14].mxu0 %vm726_vm2, %v637_v42  ;;  %v5715_v54 = vpop.eup %5714  ;;  %v461_v42 = vmax.f32 %v365_v35, 1e-08  ;;  %v649_v48 = vsel %vm619_vm1, %v5713_v39, %v6671_v57 }
 0x12c   :  { %5109 = vmatprep.mubr.msk.f32.mxu0 %vm726_vm2, %v638_v60  ;;  %v367_v60 = vadd.f32 %v6511_v0, %v6753_v50  ;;  %v5717_v49 = vpop.eup %5716  ;;  %v650_v61 = vsel %vm619_vm1, %v5715_v54, %v6673_v58  ;;  %v6857_v54 = vld [vmem:[#allocation3 + $0x190] sm:$0xff] }
 0x12d   :  { %v5719_v1 = vpop.eup %5718  ;;  %v651_v57 = vsel %vm619_vm1, %v5717_v49, %v6687_v4  ;;  %5730 = vrcp.f32 %v461_v42  ;;  %v472_v42 = vmax.f32 %v376_v47, 1e-08 }
 0x12e   :  { %v5721_v58 = vpop.eup %5720  ;;  %v652_v8 = vsel %vm619_vm1, %v5719_v1, %v6689_v5  ;;  %5732 = vrcp.f32 %v462_v2  ;;  %v6873_v1 = vld [vmem:[#allocation3 + $0x1a0] sm:$0xff] }
 0x12f   :  { %5110 = vmatmul.mubr.msk.f32.gmra.mrb[16].mxu0 %vm726_vm2, %v639_v56  ;;  %v463_v56 = vmax.f32 %v367_v60, 1e-08  ;;  %v5723_v13 = vpop.eup %5722  ;;  %v653_v4 = vsel %vm619_vm1, %v5721_v58, %v6703_v15 }
 0x130   :  { %5112 = vmatprep.mubr.msk.f32.mxu0 %vm726_vm2, %v640_v7  ;;  %v369_v7 = vadd.f32 %v6511_v0, %v6765_v53  ;;  %v5725_v5 = vpop.eup %5724  ;;  %v654_v19 = vsel %vm619_vm1, %v5723_v13, %v6705_v16  ;;  %v6889_v13 = vld [vmem:[#allocation3 + $0x1b0] sm:$0xff] }
 0x131   :  { %5734 = vrcp.f32 %v463_v56  ;;  %v5727_v20 = vpop.eup %5726  ;;  %v655_v15 = vsel %vm619_vm1, %v5725_v5, %v6719_v26 }
 0x132   :  { %5736 = vrcp.f32 %v464_v14  ;;  %v5729_v16 = vpop.eup %5728 }
 0x133   :  { %5113 = vmatmul.mubr.msk.f32.gmra.mrb[18].mxu0 %vm726_vm2, %v641_v3  ;;  %v465_v3 = vmax.f32 %v369_v7, 1e-08  ;;  %v657_v26 = vsel %vm619_vm1, %v5729_v16, %v6735_v29 }
 0x134   :  { %5115 = vmatprep.mubr.msk.f32.mxu0 %vm726_vm2, %v642_v17  ;;  %v371_v17 = vadd.f32 %v6511_v0, %v6781_v63 }
 0x135   :  { %5738 = vrcp.f32 %v465_v3 }
 0x136   :  { %v467_v21 = vmax.f32 %v371_v17, 1e-08  ;;  %5740 = vrcp.f32 %v466_v18 }
 0x137   :  { %5116 = vmatmul.mubr.msk.f32.gmra.mrb[20].mxu0 %vm726_vm2, %v643_v10  ;;  %v373_v10 = vadd.f32 %v6511_v0, %v6797_v12  ;;  %v5731_v33 = vpop.eup %5730 }
 0x138   :  { %5118 = vmatprep.mubr.msk.f32.mxu0 %vm726_vm2, %v644_v31  ;;  %v656_v31 = vsel %vm619_vm1, %v5727_v20, %v6721_v27  ;;  %5742 = vrcp.f32 %v467_v21  ;;  %v375_v27 = vadd.f32 %v6511_v0, %v6825_v32  ;;  %v5733_v24 = vpop.eup %5732  ;;  %v6905_v20 = vld [vmem:[#allocation3 + $0x1c0] sm:$0xff] }
 0x139   :  { %v469_v37 = vmax.f32 %v373_v10, 1e-08  ;;  %5744 = vrcp.f32 %v468_v34  ;;  %v659_v29 = vsel %vm619_vm1, %v5733_v24, %v6751_v36  ;;  %v6932_v24 = vld [vmem:[#allocation3 + $0x1d8] sm:$0xff] }
 0x13a   :  { %v471_v35 = vmax.f32 %v375_v27, 1e-08 }
 0x13b   :  { %5119 = vmatmul.mubr.msk.f32.gmra.mrb[22].mxu0 %vm726_vm2, %v645_v23  ;;  %v374_v23 = vadd.f32 %v6511_v0, %v6815_v11  ;;  %v5735_v44 = vpop.eup %5734  ;;  %5746 = vrcp.f32 %v469_v37  ;;  %v5612_v37 = vld [vmem:[#allocation12] sm:$0xff]  }
 0x13c   :  { %5121 = vmatprep.mubr.msk.f32.mxu0 %vm726_vm2, %v646_v41  ;;  %v658_v41 = vsel %vm619_vm1, %v5731_v33, %v6737_v40  ;;  %v377_v40 = vadd.f32 %v6511_v0, %v6841_v43  ;;  %v5737_v39 = vpop.eup %5736  ;;  %v6921_v33 = vld [vmem:[#allocation3 + $0x1d0] sm:$0xff]  ;;  %5229 = vmatprep.subr.bf16.mxu1 %v5612_v37 }
 0x13d   :  { %v470_v46 = vmax.f32 %v374_v23, 1e-08  ;;  %v661_v45 = vsel %vm619_vm1, %v5737_v39, %v6763_v52  ;;  %5230 = vmatpush3.bf16.msra.mxu1 %v5612_v37 }
 0x13e   :  { %v473_v60 = vmax.f32 %v377_v40, 1e-08 }
 0x13f   :  { %5122 = vmatmul.mubr.msk.f32.gmra.mrb[24].mxu0 %vm726_vm2, %v647_v38  ;;  %v6852_v38 = vld [vmem:[#allocation3 + $0x188] sm:$0xff]  ;;  %v5739_v55 = vpop.eup %5738  ;;  %5748 = vrcp.f32 %v470_v46  ;;  %v6937_v46 = vld [vmem:[#allocation3 + $0x1e0] sm:$0xff] }
 0x140   :  { %5124 = vmatprep.mubr.msk.f32.mxu0 %vm726_vm2, %v648_v51  ;;  %v660_v51 = vsel %vm619_vm1, %v5735_v44, %v6753_v50  ;;  %v378_v36 = vadd.f32 %v6511_v0, %v6852_v38  ;;  %5750 = vrcp.f32 %v471_v35  ;;  %v379_v50 = vadd.f32 %v6511_v0, %v6857_v54  ;;  %v5741_v49 = vpop.eup %5740 }
 0x141   :  { %5752 = vrcp.f32 %v472_v42  ;;  %v663_v59 = vsel %vm619_vm1, %v5741_v49, %v6779_v62  ;;  %v388_v35 = vadd.f32 %v6511_v0, %v6932_v24  ;;  %v389_v39 = vadd.f32 %v6511_v0, %v6937_v46 }
 0x142   :  { %v5743_v2 = vpop.eup %5742  ;;  %v474_v56 = vmax.f32 %v378_v36, 1e-08  ;;  %5754 = vrcp.f32 %v473_v60  ;;  %v475_v7 = vmax.f32 %v379_v50, 1e-08  ;;  %v6953_v36 = vld [vmem:[#allocation3 + $0x1f0] sm:$0xff] }
 0x143   :  { %5125 = vmatmul.mubr.msk.f32.gmra.mrb[26].mxu0 %vm726_vm2, %v649_v48  ;;  %v6868_v48 = vld [vmem:[#allocation3 + $0x198] sm:$0xff]  ;;  %v5745_v58 = vpop.eup %5744  ;;  %v485_v49 = vmax.f32 %v389_v39, 1e-08  ;;  %v7044_v39 = vld [vmem:[#allocation3 + $0x248] sm:$0xff] }
 0x144   :  { %5127 = vmatprep.mubr.msk.f32.mxu0 %vm726_vm2, %v650_v61  ;;  %v662_v61 = vsel %vm619_vm1, %v5739_v55, %v6765_v53  ;;  %v380_v52 = vadd.f32 %v6511_v0, %v6868_v48  ;;  %v381_v53 = vadd.f32 %v6511_v0, %v6873_v1  ;;  %5756 = vrcp.f32 %v474_v56 }
 0x145   :  { %v5747_v14 = vpop.eup %5746  ;;  %v665_v6 = vsel %vm619_vm1, %v5745_v58, %v6795_v9  ;;  %5758 = vrcp.f32 %v475_v7 }
 0x146   :  { %v476_v3 = vmax.f32 %v380_v52, 1e-08  ;;  %v477_v17 = vmax.f32 %v381_v53, 1e-08  ;;  %v6969_v52 = vld [vmem:[#allocation3 + $0x200] sm:$0xff] }
 0x147   :  { %5128 = vmatmul.mubr.msk.f32.gmra.mrb[28].mxu0 %vm726_vm2, %v651_v57  ;;  %v6884_v57 = vld [vmem:[#allocation3 + $0x1a8] sm:$0xff] }
 0x148   :  { %5130 = vmatprep.mubr.msk.f32.mxu0 %vm726_vm2, %v652_v8  ;;  %v664_v8 = vsel %vm619_vm1, %v5743_v2, %v6781_v63  ;;  %v382_v62 = vadd.f32 %v6511_v0, %v6884_v57  ;;  %v383_v63 = vadd.f32 %v6511_v0, %v6889_v13  ;;  %5760 = vrcp.f32 %v476_v3 }
 0x149   :  { %v5749_v5 = vpop.eup %5748  ;;  %5762 = vrcp.f32 %v477_v17 }
 0x14a   :  { %v5751_v18 = vpop.eup %5750  ;;  %v478_v21 = vmax.f32 %v382_v62, 1e-08  ;;  %v667_v25 = vsel %vm619_vm1, %v5749_v5, %v6815_v11  ;;  %v479_v10 = vmax.f32 %v383_v63, 1e-08  ;;  %v6985_v62 = vld [vmem:[#allocation3 + $0x210] sm:$0xff] }
 0x14b   :  { %5131 = vmatmul.mubr.msk.f32.gmra.mrb[30].mxu0 %vm726_vm2, %v653_v4  ;;  %v6900_v4 = vld [vmem:[#allocation3 + $0x1b8] sm:$0xff]  ;;  %v5753_v16 = vpop.eup %5752 }
 0x14c   :  { %5133 = vmatprep.mubr.msk.f32.mxu0 %vm726_vm2, %v654_v19  ;;  %v666_v19 = vsel %vm619_vm1, %v5747_v14, %v6797_v12  ;;  %v384_v9 = vadd.f32 %v6511_v0, %v6900_v4  ;;  %v385_v12 = vadd.f32 %v6511_v0, %v6905_v20  ;;  %v5755_v34 = vpop.eup %5754  ;;  %5764 = vrcp.f32 %v478_v21 }
 0x14d   :  { %5766 = vrcp.f32 %v479_v10  ;;  %v670_v44 = vsel %vm619_vm1, %v5755_v34, %v6841_v43 }
 0x14e   :  { %v480_v11 = vmax.f32 %v384_v9, 1e-08  ;;  %v481_v27 = vmax.f32 %v385_v12, 1e-08  ;;  %v7001_v9 = vld [vmem:[#allocation3 + $0x220] sm:$0xff] }
 0x14f   :  { %5134 = vmatmul.mubr.msk.f32.gmra.mrb[32].mxu0 %vm726_vm2, %v655_v15  ;;  %v6916_v15 = vld [vmem:[#allocation3 + $0x1c8] sm:$0xff] }
 0x150   :  { %5136 = vmatprep.mubr.msk.f32.mxu0 %vm726_vm2, %v656_v31  ;;  %v668_v31 = vsel %vm619_vm1, %v5751_v18, %v6825_v32  ;;  %v386_v23 = vadd.f32 %v6511_v0, %v6916_v15  ;;  %v387_v32 = vadd.f32 %v6511_v0, %v6921_v33  ;;  %5768 = vrcp.f32 %v480_v11  ;;  %v7017_v11 = vld [vmem:[#allocation3 + $0x230] sm:$0xff] }
 0x151   :  { %5770 = vrcp.f32 %v481_v27 }
 0x152   :  { %v483_v43 = vmax.f32 %v387_v32, 1e-08 }
 0x153   :  { %5137 = vmatmul.mubr.msk.f32.gmra.mrb[34].mxu0 %vm726_vm2, %v657_v26  ;;  %v669_v26 = vsel %vm619_vm1, %v5753_v16, %v6827_v28  ;;  %v482_v28 = vmax.f32 %v386_v23, 1e-08 }
 0x154   :  { %5139 = vmatprep.mubr.msk.f32.mxu0 %vm726_vm2, %v658_v41  ;;  %v5757_v41 = vpop.eup %5756 }
 0x155   :  { %v5759_v47 = vpop.eup %5758  ;;  %v671_v40 = vsel %vm619_vm1, %v5757_v41, %v6852_v38  ;;  %5772 = vrcp.f32 %v482_v28  ;;  %v484_v38 = vmax.f32 %v388_v35, 1e-08  ;;  %v7028_v41 = vld [vmem:[#allocation3 + $0x238] sm:$0xff] }
 0x156   :  { %v5761_v55 = vpop.eup %5760  ;;  %v672_v42 = vsel %vm619_vm1, %v5759_v47, %v6857_v54  ;;  %5774 = vrcp.f32 %v483_v43  ;;  %v391_v54 = vadd.f32 %v6511_v0, %v6953_v36 }
 0x157   :  { %5140 = vmatmul.mubr.msk.f32.gmra.mrb[36].mxu0 %vm726_vm2, %v659_v29  ;;  %v5613_v29 = vld [vmem:[#allocation12 + $0x8] sm:$0xff]   ;;  %v673_v50 = vsel %vm619_vm1, %v5761_v55, %v6868_v48  ;;  %5776 = vrcp.f32 %v484_v38 }
 0x158   :  { %5142 = vmatprep.mubr.msk.f32.mxu0 %vm726_vm2, %v660_v51  ;;  %v6948_v51 = vld [vmem:[#allocation3 + $0x1e8] sm:$0xff]  ;;  %5231 = vmatprep.subr.bf16.mxu1 %v5613_v29  ;;  %5778 = vrcp.f32 %v485_v49  ;;  %v487_v58 = vmax.f32 %v391_v54, 1e-08  ;;  %v7060_v54 = vld [vmem:[#allocation3 + $0x258] sm:$0xff] }
 0x159   :  { %5232 = vmatpush3.bf16.msra.mxu1 %v5613_v29  ;;  %v390_v60 = vadd.f32 %v6511_v0, %v6948_v51  ;;  %v7033_v29 = vld [vmem:[#allocation3 + $0x240] sm:$0xff] }
 0x15b   :  { %5143 = vmatmul.mubr.msk.f32.gmra.mrb[38].mxu0 %vm726_vm2, %v661_v45  ;;  %v5763_v45 = vpop.eup %5762  ;;  %v486_v7 = vmax.f32 %v390_v60, 1e-08 }
 0x15c   :  { %5145 = vmatprep.mubr.msk.f32.mxu0 %vm726_vm2, %v662_v61  ;;  %v6964_v61 = vld [vmem:[#allocation3 + $0x1f8] sm:$0xff]  ;;  %v5765_v2 = vpop.eup %5764  ;;  %v674_v56 = vsel %vm619_vm1, %v5763_v45, %v6873_v1  ;;  %v393_v1 = vadd.f32 %v6511_v0, %v6969_v52  ;;  %v7049_v45 = vld [vmem:[#allocation3 + $0x250] sm:$0xff] }
 0x15d   :  { %v392_v48 = vadd.f32 %v6511_v0, %v6964_v61  ;;  %v675_v53 = vsel %vm619_vm1, %v5765_v2, %v6884_v57  ;;  %5780 = vrcp.f32 %v486_v7 }
 0x15e   :  { %5782 = vrcp.f32 %v487_v58  ;;  %v489_v5 = vmax.f32 %v393_v1, 1e-08  ;;  %v7076_v1 = vld [vmem:[#allocation3 + $0x268] sm:$0xff] }
 0x15f   :  { %5146 = vmatmul.mubr.msk.f32.gmra.mrb[40].mxu0 %vm726_vm2, %v663_v59  ;;  %v5767_v59 = vpop.eup %5766  ;;  %v488_v17 = vmax.f32 %v392_v48, 1e-08 }
 0x160   :  { %5148 = vmatprep.mubr.msk.f32.mxu0 %vm726_vm2, %v664_v8  ;;  %v6980_v8 = vld [vmem:[#allocation3 + $0x208] sm:$0xff]  ;;  %v5769_v14 = vpop.eup %5768  ;;  %v676_v3 = vsel %vm619_vm1, %v5767_v59, %v6889_v13  ;;  %v395_v13 = vadd.f32 %v6511_v0, %v6985_v62  ;;  %v7065_v59 = vld [vmem:[#allocation3 + $0x260] sm:$0xff] }
 0x161   :  { %v394_v57 = vadd.f32 %v6511_v0, %v6980_v8  ;;  %v677_v63 = vsel %vm619_vm1, %v5769_v14, %v6900_v4  ;;  %5784 = vrcp.f32 %v488_v17 }
 0x162   :  { %5786 = vrcp.f32 %v489_v5  ;;  %v491_v16 = vmax.f32 %v395_v13, 1e-08  ;;  %v7092_v13 = vld [vmem:[#allocation3 + $0x278] sm:$0xff] }
 0x163   :  { %5149 = vmatmul.mubr.msk.f32.gmra.mrb[42].mxu0 %vm726_vm2, %v665_v6  ;;  %v5771_v6 = vpop.eup %5770  ;;  %v490_v10 = vmax.f32 %v394_v57, 1e-08 }
 0x164   :  { %5151 = vmatprep.mubr.msk.f32.mxu0 %vm726_vm2, %v666_v19  ;;  %v6996_v19 = vld [vmem:[#allocation3 + $0x218] sm:$0xff]  ;;  %v5773_v18 = vpop.eup %5772  ;;  %v678_v21 = vsel %vm619_vm1, %v5771_v6, %v6905_v20  ;;  %v397_v20 = vadd.f32 %v6511_v0, %v7001_v9  ;;  %v7081_v6 = vld [vmem:[#allocation3 + $0x270] sm:$0xff] }
 0x165   :  { %v396_v4 = vadd.f32 %v6511_v0, %v6996_v19  ;;  %v679_v12 = vsel %vm619_vm1, %v5773_v18, %v6916_v15  ;;  %5788 = vrcp.f32 %v490_v10 }
 0x166   :  { %5790 = vrcp.f32 %v491_v16  ;;  %v493_v32 = vmax.f32 %v397_v20, 1e-08  ;;  %v7108_v20 = vld [vmem:[#allocation3 + $0x288] sm:$0xff] }
 0x167   :  { %5152 = vmatmul.mubr.msk.f32.gmra.mrb[44].mxu0 %vm726_vm2, %v667_v25  ;;  %v5775_v25 = vpop.eup %5774 }
 0x168   :  { %5154 = vmatprep.mubr.msk.f32.mxu0 %vm726_vm2, %v668_v31  ;;  %v7012_v31 = vld [vmem:[#allocation3 + $0x228] sm:$0xff]  ;;  %v5777_v34 = vpop.eup %5776  ;;  %v680_v37 = vsel %vm619_vm1, %v5775_v25, %v6921_v33  ;;  %v399_v33 = vadd.f32 %v6511_v0, %v7017_v11  ;;  %v7097_v25 = vld [vmem:[#allocation3 + $0x280] sm:$0xff] }
 0x169   :  { %v5779_v23 = vpop.eup %5778  ;;  %v398_v15 = vadd.f32 %v6511_v0, %v7012_v31  ;;  %v681_v27 = vsel %vm619_vm1, %v5777_v34, %v6932_v24  ;;  %v400_v24 = vadd.f32 %v6511_v0, %v7028_v41 }
 0x16a   :  { %v682_v47 = vsel %vm619_vm1, %v5779_v23, %v6937_v46  ;;  %v495_v43 = vmax.f32 %v399_v33, 1e-08  ;;  %v401_v46 = vadd.f32 %v6511_v0, %v7033_v29  ;;  %v7113_v23 = vld [vmem:[#allocation3 + $0x290] sm:$0xff] }
 0x16b   :  { %5155 = vmatmul.mubr.msk.f32.gmra.mrb[46].mxu0 %vm726_vm2, %v669_v26  ;;  %v492_v26 = vmax.f32 %v396_v4, 1e-08  ;;  %v494_v35 = vmax.f32 %v398_v15, 1e-08  ;;  %v496_v60 = vmax.f32 %v400_v24, 1e-08 }
 0x16c   :  { %5157 = vmatprep.mubr.msk.f32.mxu0 %vm726_vm2, %v670_v44  ;;  %v5781_v44 = vpop.eup %5780  ;;  %v497_v49 = vmax.f32 %v401_v46, 1e-08  ;;  %v5614_v15 = vld [vmem:[#allocation15] sm:$0xff]  }
 0x16d   :  { %v5783_v28 = vpop.eup %5782  ;;  %5792 = vrcp.f32 %v492_v26  ;;  %5329 = vmatprep.subr.bf16.mxu0 %v5614_v15 }
 0x16e   :  { %5794 = vrcp.f32 %v493_v32  ;;  %v5785_v55 = vpop.eup %5784  ;;  %5330 = vmatpush3.bf16.msra.mxu0 %v5614_v15  ;;  %v326_v15 = vld [vmem:[#allocation3 + $0x2f0] sm:$0xff] }
 0x16f   :  { %5158 = vmatmul.mubr.msk.f32.gmra.mrb[48].mxu0 %vm726_vm2, %v671_v40  ;;  %v683_v40 = vsel %vm619_vm1, %v5781_v44, %v6948_v51  ;;  %v5787_v38 = vpop.eup %5786  ;;  %5796 = vrcp.f32 %v494_v35  ;;  %v402_v51 = vadd.f32 %v6511_v0, %v7044_v39  ;;  %v7124_v44 = vld [vmem:[#allocation3 + $0x298] sm:$0xff]  ;;  %v7129_v35 = vld [vmem:[#allocation3 + $0x2a0] sm:$0xff] }
 0x170   :  { %5160 = vmatprep.mubr.msk.f32.mxu0 %vm726_vm2, %v672_v42  ;;  %v684_v42 = vsel %vm619_vm1, %v5783_v28, %v6953_v36  ;;  %5798 = vrcp.f32 %v495_v43  ;;  %v403_v36 = vadd.f32 %v6511_v0, %v7049_v45  ;;  %v5789_v2 = vpop.eup %5788 }
 0x171   :  { %v5791_v7 = vpop.eup %5790  ;;  %5800 = vrcp.f32 %v496_v60  ;;  %v498_v48 = vmax.f32 %v402_v51, 1e-08  ;;  %v7145_v60 = vld [vmem:[#allocation3 + $0x2b0] sm:$0xff] }
 0x172   :  { %5802 = vrcp.f32 %v497_v49  ;;  %v499_v58 = vmax.f32 %v403_v36, 1e-08 }
 0x173   :  { %5161 = vmatmul.mubr.msk.f32.gmra.mrb[50].mxu0 %vm726_vm2, %v673_v50  ;;  %v685_v50 = vsel %vm619_vm1, %v5785_v55, %v6964_v61  ;;  %v404_v61 = vadd.f32 %v6511_v0, %v7060_v54  ;;  %5804 = vrcp.f32 %v498_v48  ;;  %v7140_v55 = vld [vmem:[#allocation3 + $0x2a8] sm:$0xff]  ;;  %v7161_v48 = vld [vmem:[#allocation3 + $0x2c0] sm:$0xff] }
 0x174   :  { %5163 = vmatprep.mubr.msk.f32.mxu0 %vm726_vm2, %v674_v56  ;;  %v686_v56 = vsel %vm619_vm1, %v5787_v38, %v6969_v52  ;;  %v405_v52 = vadd.f32 %v6511_v0, %v7065_v59  ;;  %5806 = vrcp.f32 %v499_v58 }
 0x175   :  { %v500_v57 = vmax.f32 %v404_v61, 1e-08 }
 0x176   :  { %v501_v5 = vmax.f32 %v405_v52, 1e-08 }
 0x177   :  { %5164 = vmatmul.mubr.msk.f32.gmra.mrb[52].mxu0 %vm726_vm2, %v675_v53  ;;  %v687_v53 = vsel %vm619_vm1, %v5789_v2, %v6980_v8  ;;  %v5793_v14 = vpop.eup %5792  ;;  %v406_v8 = vadd.f32 %v6511_v0, %v7076_v1  ;;  %5808 = vrcp.f32 %v500_v57  ;;  %v7156_v2 = vld [vmem:[#allocation3 + $0x2b8] sm:$0xff]  ;;  %v7177_v57 = vld [vmem:[#allocation3 + $0x2d0] sm:$0xff] }
 0x178   :  { %5166 = vmatprep.mubr.msk.f32.mxu0 %vm726_vm2, %v676_v3  ;;  %v688_v3 = vsel %vm619_vm1, %v5791_v7, %v6985_v62  ;;  %v5795_v17 = vpop.eup %5794  ;;  %v407_v62 = vadd.f32 %v6511_v0, %v7081_v6  ;;  %5810 = vrcp.f32 %v501_v5 }
 0x179   :  { %v5797_v18 = vpop.eup %5796  ;;  %v502_v4 = vmax.f32 %v406_v8, 1e-08 }
 0x17a   :  { %v5799_v10 = vpop.eup %5798  ;;  %v503_v16 = vmax.f32 %v407_v62, 1e-08 }
 0x17b   :  { %5167 = vmatmul.mubr.msk.f32.gmra.mrb[54].mxu0 %vm726_vm2, %v677_v63  ;;  %v689_v63 = vsel %vm619_vm1, %v5793_v14, %v6996_v19  ;;  %v408_v19 = vadd.f32 %v6511_v0, %v7092_v13  ;;  %v5801_v34 = vpop.eup %5800  ;;  %5812 = vrcp.f32 %v502_v4  ;;  %v7172_v14 = vld [vmem:[#allocation3 + $0x2c8] sm:$0xff]  ;;  %v324_v4 = vld [vmem:[#allocation3 + $0x2e0] sm:$0xff] }
 0x17c   :  { %5169 = vmatprep.mubr.msk.f32.mxu0 %vm726_vm2, %v678_v21  ;;  %v690_v21 = vsel %vm619_vm1, %v5795_v17, %v7001_v9  ;;  %v409_v9 = vadd.f32 %v6511_v0, %v7097_v25  ;;  %v5803_v26 = vpop.eup %5802  ;;  %v693_v32 = vsel %vm619_vm1, %v5801_v34, %v7028_v41  ;;  %5814 = vrcp.f32 %v503_v16 }
 0x17d   :  { %v694_v28 = vsel %vm619_vm1, %v5803_v26, %v7033_v29  ;;  %v413_v29 = vadd.f32 %v6511_v0, %v7129_v35  ;;  %v421_v34 = vadd.f32 %v6511_v0, %v324_v4 }
 0x17e   :  { %v505_v33 = vmax.f32 %v409_v9, 1e-08 }
 0x17f   :  { %5170 = vmatmul.mubr.msk.f32.gmra.mrb[56].mxu0 %vm726_vm2, %v679_v12  ;;  %v691_v12 = vsel %vm619_vm1, %v5797_v18, %v7012_v31  ;;  %v504_v31 = vmax.f32 %v408_v19, 1e-08  ;;  %v509_v36 = vmax.f32 %v413_v29, 1e-08  ;;  %v323_v18 = vld [vmem:[#allocation3 + $0x2d8] sm:$0xff] }
 0x180   :  { %5172 = vmatprep.mubr.msk.f32.mxu0 %vm726_vm2, %v680_v37  ;;  %v692_v37 = vsel %vm619_vm1, %v5799_v10, %v7017_v11  ;;  %v411_v11 = vadd.f32 %v6511_v0, %v7113_v23  ;;  %v420_v16 = vadd.f32 %v6511_v0, %v323_v18 }
 0x181   :  { %5816 = vrcp.f32 %v504_v31 }
 0x182   :  { %5818 = vrcp.f32 %v505_v33  ;;  %v507_v46 = vmax.f32 %v411_v11, 1e-08  ;;  %v517_v33 = vmax.f32 %v421_v34, 1e-08  ;;  %v423_v11 = vadd.f32 %v6511_v0, %v326_v15 }
 0x183   :  { %5173 = vmatmul.mubr.msk.f32.gmra.mrb[58].mxu0 %vm726_vm2, %v681_v27  ;;  %v410_v27 = vadd.f32 %v6511_v0, %v7108_v20 }
 0x184   :  { %5175 = vmatprep.mubr.msk.f32.mxu0 %vm726_vm2, %v682_v47  ;;  %v5805_v47 = vpop.eup %5804 }
 0x185   :  { %v5807_v24 = vpop.eup %5806  ;;  %v506_v41 = vmax.f32 %v410_v27, 1e-08  ;;  %v695_v43 = vsel %vm619_vm1, %v5805_v47, %v7044_v39  ;;  %v414_v39 = vadd.f32 %v6511_v0, %v7140_v55  ;;  %v516_v27 = vmax.f32 %v420_v16, 1e-08  ;;  %v327_v47 = vld [vmem:[#allocation3 + $0x2f8] sm:$0xff] }
 0x186   :  { %v696_v38 = vsel %vm619_vm1, %v5807_v24, %v7049_v45  ;;  %v415_v45 = vadd.f32 %v6511_v0, %v7145_v60 }
 0x187   :  { %5176 = vmatmul.mubr.msk.f32.gmra.mrb[60].mxu0 %vm726_vm2, %v683_v40  ;;  %v412_v40 = vadd.f32 %v6511_v0, %v7124_v44  ;;  %5820 = vrcp.f32 %v506_v41 }
 0x188   :  { %5178 = vmatprep.mubr.msk.f32.mxu0 %vm726_vm2, %v684_v42  ;;  %v5809_v42 = vpop.eup %5808  ;;  %5822 = vrcp.f32 %v507_v46  ;;  %v511_v52 = vmax.f32 %v415_v45, 1e-08 }
 0x189   :  { %v5811_v51 = vpop.eup %5810  ;;  %v697_v49 = vsel %vm619_vm1, %v5809_v42, %v7060_v54  ;;  %v416_v54 = vadd.f32 %v6511_v0, %v7156_v2 }
 0x18a   :  { %v698_v7 = vsel %vm619_vm1, %v5811_v51, %v7065_v59  ;;  %v417_v59 = vadd.f32 %v6511_v0, %v7161_v48 }
 0x18b   :  { %5179 = vmatmul.mubr.msk.f32.gmra.mrb[62].mxu0 %vm726_vm2, %v685_v50  ;;  %v508_v50 = vmax.f32 %v412_v40, 1e-08  ;;  %v424_v40 = vadd.f32 %v6511_v0, %v327_v47 }
 0x18c   :  { %5181 = vmatprep.mubr.msk.f32.mxu0 %vm726_vm2, %v686_v56  ;;  %v5813_v56 = vpop.eup %5812  ;;  %v513_v62 = vmax.f32 %v417_v59, 1e-08 }
 0x18d   :  { %v5815_v61 = vpop.eup %5814  ;;  %5824 = vrcp.f32 %v508_v50  ;;  %v699_v58 = vsel %vm619_vm1, %v5813_v56, %v7076_v1  ;;  %v418_v1 = vadd.f32 %v6511_v0, %v7172_v14  ;;  %v520_v42 = vmax.f32 %v424_v40, 1e-08 }
 0x18e   :  { %5826 = vrcp.f32 %v509_v36  ;;  %v700_v17 = vsel %vm619_vm1, %v5815_v61, %v7081_v6  ;;  %v419_v6 = vadd.f32 %v6511_v0, %v7177_v57 }
 0x18f   :  { %5182 = vmatmul.mubr.msk.f32.gmra.mrb[64].mxu0 %vm726_vm2, %v687_v53  ;;  %v510_v53 = vmax.f32 %v414_v39, 1e-08 }
 0x190   :  { %5184 = vmatprep.mubr.msk.f32.mxu0 %vm726_vm2, %v688_v3  ;;  %v5817_v3 = vpop.eup %5816  ;;  %v515_v9 = vmax.f32 %v419_v6, 1e-08 }
 0x191   :  { %v5819_v8 = vpop.eup %5818  ;;  %5828 = vrcp.f32 %v510_v53  ;;  %v701_v5 = vsel %vm619_vm1, %v5817_v3, %v7092_v13  ;;  %v5615_v53 = vld [vmem:[#allocation15 + $0x8] sm:$0xff]  }
 0x192   :  { %5830 = vrcp.f32 %v511_v52  ;;  %v702_v10 = vsel %vm619_vm1, %v5819_v8, %v7097_v25  ;;  %5331 = vmatprep.subr.bf16.mxu0 %v5615_v53 }
 0x193   :  { %5185 = vmatmul.mubr.msk.f32.gmra.mrb[66].mxu0 %vm726_vm2, %v689_v63  ;;  %v512_v63 = vmax.f32 %v416_v54, 1e-08 }
 0x194   :  { %5187 = vmatprep.mubr.msk.f32.mxu0 %vm726_vm2, %v690_v21  ;;  %v5821_v21 = vpop.eup %5820  ;;  %5332 = vmatpush3.bf16.msra.mxu0 %v5615_v53 }
 0x195   :  { %v5823_v19 = vpop.eup %5822  ;;  %5832 = vrcp.f32 %v512_v63  ;;  %v703_v13 = vsel %vm619_vm1, %v5821_v21, %v7108_v20 }
 0x196   :  { %5834 = vrcp.f32 %v513_v62  ;;  %v704_v26 = vsel %vm619_vm1, %v5823_v19, %v7113_v23 }
 0x197   :  { %5188 = vmatmul.mubr.msk.f32.gmra.mrb[68].mxu0 %vm726_vm2, %v691_v12  ;;  %v514_v12 = vmax.f32 %v418_v1, 1e-08  ;;  %v5825_v25 = vpop.eup %5824 }
 0x198   :  { %5190 = vmatprep.mubr.msk.f32.mxu0 %vm726_vm2, %v692_v37  ;;  %v325_v37 = vld [vmem:[#allocation3 + $0x2e8] sm:$0xff]  ;;  %v5827_v31 = vpop.eup %5826  ;;  %v705_v20 = vsel %vm619_vm1, %v5825_v25, %v7124_v44 }
 0x199   :  { %5836 = vrcp.f32 %v514_v12 }
 0x19a   :  { %5838 = vrcp.f32 %v515_v9 }
 0x19b   :  { %5191 = vmatmul.mubr.msk.f32.gmra.mrb[70].mxu0 %vm726_vm2, %v693_v32  ;;  %v422_v32 = vadd.f32 %v6511_v0, %v325_v37  ;;  %v5829_v23 = vpop.eup %5828  ;;  %5840 = vrcp.f32 %v516_v27 }
 0x19c   :  { %5193 = vmatprep.mubr.msk.f32.mxu0 %vm726_vm2, %v694_v28  ;;  %v706_v28 = vsel %vm619_vm1, %v5827_v31, %v7129_v35  ;;  %v5831_v24 = vpop.eup %5830  ;;  %v707_v44 = vsel %vm619_vm1, %v5829_v23, %v7140_v55  ;;  %5842 = vrcp.f32 %v517_v33  ;;  %v5616_v23 = vld [vmem:[#allocation15 + $0x10] sm:$0xff]  }
 0x19d   :  { %v518_v41 = vmax.f32 %v422_v32, 1e-08  ;;  %v708_v35 = vsel %vm619_vm1, %v5831_v24, %v7145_v60  ;;  %5333 = vmatprep.subr.bf16.mxu0 %v5616_v23 }
 0x19e   :  { %5334 = vmatpush3.bf16.msra.mxu0 %v5616_v23 }
 0x19f   :  { %5194 = vmatmul.mubr.msk.f32.gmra.mrb[72].mxu0 %vm726_vm2, %v695_v43  ;;  %v519_v43 = vmax.f32 %v423_v11, 1e-08  ;;  %v5833_v46 = vpop.eup %5832  ;;  %5844 = vrcp.f32 %v518_v41 }
 0x1a0   :  { %5196 = vmatprep.mubr.msk.f32.mxu0 %vm726_vm2, %v696_v38  ;;  %v5835_v29 = vpop.eup %5834  ;;  %v709_v0 = vsel %vm619_vm1, %v5833_v46, %v7156_v2 }
 0x1a1   :  { %5846 = vrcp.f32 %v519_v43  ;;  %v710_v38 = vsel %vm619_vm1, %v5835_v29, %v7161_v48 }
 0x1a2   :  { %5848 = vrcp.f32 %v520_v42 }
 0x1a3   :  { %5197 = vmatmul.mubr.msk.f32.gmra.mrb[74].mxu0 %vm726_vm2, %v697_v49  ;;  %v5837_v55 = vpop.eup %5836 }
 0x1a4   :  { %5199 = vmatprep.mubr.msk.f32.mxu0 %vm726_vm2, %v698_v7  ;;  %v5839_v51 = vpop.eup %5838  ;;  %v711_v60 = vsel %vm619_vm1, %v5837_v55, %v7172_v14 }
 0x1a5   :  { %v5841_v50 = vpop.eup %5840  ;;  %v712_v39 = vsel %vm619_vm1, %v5839_v51, %v7177_v57 }
 0x1a6   :  { %v5843_v49 = vpop.eup %5842  ;;  %v713_v36 = vsel %vm619_vm1, %v5841_v50, %v323_v18 }
 0x1a7   :  { %5200 = vmatmul.mubr.msk.f32.gmra.mrb[76].mxu0 %vm726_vm2, %v699_v58  ;;  %v714_v2 = vsel %vm619_vm1, %v5843_v49, %v324_v4  ;;  %v7253_v58 = vld [vmem:[#allocation11] ss:$0 sm:$0xff] }
 0x1a8   :  { %5202 = vmatprep.mubr.msk.f32.mxu0 %vm726_vm2, %v700_v17 }
 0x1a9   :  { %v5845_v45 = vpop.eup %5844 }
 0x1aa   :  { %v715_v7 = vsel %vm619_vm1, %v5845_v45, %v325_v37 }
 0x1ab   :  { %5203 = vmatmul.mubr.msk.f32.gmra.mrb[78].mxu0 %vm726_vm2, %v701_v5  ;;  %v5847_v56 = vpop.eup %5846 }
 0x1ac   :  { %5205 = vmatprep.mubr.msk.f32.mxu0 %vm726_vm2, %v702_v10  ;;  %v5849_v48 = vpop.eup %5848  ;;  %v716_v61 = vsel %vm619_vm1, %v5847_v56, %v326_v15 }
 0x1ad   :  { %v717_v54 = vsel %vm619_vm1, %v5849_v48, %v327_v47  ;;  %vm3564_vm1 = vcmask 1045509  }
 0x1af   :  { %5206 = vmatmul.mubr.msk.f32.gmra.mrb[80].mxu0 %vm726_vm2, %v703_v13 }
 0x1b0   :  { %5208 = vmatprep.mubr.msk.f32.mxu0 %vm726_vm2, %v704_v26 }
 0x1b3   :  { %5209 = vmatmul.mubr.msk.f32.gmra.mrb[82].mxu0 %vm726_vm2, %v705_v20 }
 0x1b4   :  { %5211 = vmatprep.mubr.msk.f32.mxu0 %vm726_vm2, %v706_v28 }
 0x1b7   :  { %5212 = vmatmul.mubr.msk.f32.gmra.mrb[84].mxu0 %vm726_vm2, %v707_v44 }
 0x1b8   :  { %5214 = vmatprep.mubr.msk.f32.mxu0 %vm726_vm2, %v708_v35 }
 0x1bb   :  { %5215 = vmatmul.mubr.msk.f32.gmra.mrb[86].mxu0 %vm726_vm2, %v709_v0 }
 0x1bc   :  { %5217 = vmatprep.mubr.msk.f32.mxu0 %vm726_vm2, %v710_v38 }
 0x1bf   :  { %5218 = vmatmul.mubr.msk.f32.gmra.mrb[88].mxu0 %vm726_vm2, %v711_v60 }
 0x1c0   :  { %5220 = vmatprep.mubr.msk.f32.mxu0 %vm726_vm2, %v712_v39 }
 0x1c3   :  { %5221 = vmatmul.mubr.msk.f32.gmra.mrb[90].mxu0 %vm726_vm2, %v713_v36 }
 0x1c4   :  { %5223 = vmatprep.mubr.msk.f32.mxu0 %vm726_vm2, %v714_v2 }
 0x1c7   :  { %5224 = vmatmul.mubr.msk.f32.gmra.mrb[92].mxu0 %vm726_vm2, %v715_v7 }
 0x1c8   :  { %5226 = vmatprep.mubr.msk.f32.mxu0 %vm726_vm2, %v716_v61 }
 0x1cb   :  { %5227 = vmatmul.mubr.msk.f32.gmra.mrb[94].mxu0 %vm726_vm2, %v717_v54  ;;  %vm3566_vm2 = vcmask 1046534  }
 0x1e2   :  { %v5087_v52 = vpop.f32.mrb[0].mxu0 }
 0x1e3   :  { %v1091_v59 = vadd.f32 %v5087_v52, %v7253_v58  ;;  %v1085_v14 = vpop.f32.mrb[1].mxu0 }
 0x1e4   :  { %v1086_v3 = vadd.f32 %v7253_v58, %v1085_v14 }
 0x1e6   :  { %v1564_v17 = vpack.c.bf16 %v1091_v59, %v1086_v3  ;;  %v5090_v57 = vpop.f32.mrb[2].mxu0 }
 0x1e7   :  { %v1101_v8 = vadd.f32 %v5090_v57, %v7253_v58  ;;  %v1095_v63 = vpop.f32.mrb[3].mxu0 }
 0x1e8   :  { %v1096_v30 = vadd.f32 %v7253_v58, %v1095_v63  ;;  %v1612_v1 = vmul.bf16 1009007652, %v1564_v17 }
 0x1ea   :  { %v1565_v5 = vpack.c.bf16 %v1101_v8, %v1096_v30  ;;  %v5093_v62 = vpop.f32.mrb[4].mxu0  ;;  %v1660_v6 = vmax.bf16 %v1612_v1, %v1564_v17 }
 0x1eb   :  { %v1111_v18 = vadd.f32 %v5093_v62, %v7253_v58  ;;  %v1105_v21 = vpop.f32.mrb[5].mxu0 }
 0x1ec   :  { %v1613_v10 = vmul.bf16 1009007652, %v1565_v5  ;;  %v1106_v4 = vadd.f32 %v7253_v58, %v1105_v21  ;;  %5233 = vmatprep.mubr.msk.bf16.mxu1 %vm1731_vm3, %v1660_v6 }
 0x1ee   :  { %v1661_v19 = vmax.bf16 %v1613_v10, %v1565_v5  ;;  %v1566_v12 = vpack.c.bf16 %v1111_v18, %v1106_v4  ;;  %v5096_v16 = vpop.f32.mrb[6].mxu0 }
 0x1ef   :  { %v1121_v13 = vadd.f32 %v5096_v16, %v7253_v58  ;;  %v1115_v9 = vpop.f32.mrb[7].mxu0 }
 0x1f0   :  { %v1614_v34 = vmul.bf16 1009007652, %v1566_v12  ;;  %v1116_v37 = vadd.f32 %v7253_v58, %v1115_v9  ;;  %5234 = vmatmul.mubr.msk.bf16.vlgmr.msra.gmra.mrb[0].mxu1 %vm1731_vm3, %v1661_v19 }
 0x1f2   :  { %v1662_v25 = vmax.bf16 %v1614_v34, %v1566_v12  ;;  %v1567_v26 = vpack.c.bf16 %v1121_v13, %v1116_v37  ;;  %v5099_v15 = vpop.f32.mrb[8].mxu0 }
 0x1f3   :  { %v1131_v31 = vadd.f32 %v5099_v15, %v7253_v58  ;;  %v1125_v27 = vpop.f32.mrb[9].mxu0 }
 0x1f4   :  { %v1615_v32 = vmul.bf16 1009007652, %v1567_v26  ;;  %v1126_v20 = vadd.f32 %v7253_v58, %v1125_v27  ;;  %5237 = vmatprep.mubr.msk.bf16.mxu1 %vm1731_vm3, %v1662_v25 }
 0x1f6   :  { %v1663_v33 = vmax.bf16 %v1615_v32, %v1567_v26  ;;  %v1568_v11 = vpack.c.bf16 %v1131_v31, %v1126_v20  ;;  %v5102_v47 = vpop.f32.mrb[10].mxu0 }
 0x1f7   :  { %v1141_v28 = vadd.f32 %v5102_v47, %v7253_v58  ;;  %v1135_v24 = vpop.f32.mrb[11].mxu0 }
 0x1f8   :  { %v1616_v41 = vmul.bf16 1009007652, %v1568_v11  ;;  %v1136_v40 = vadd.f32 %v7253_v58, %v1135_v24  ;;  %5238 = vmatmul.mubr.msk.bf16.gmra.mrb[4].mxu1 %vm1731_vm3, %v1663_v33 }
 0x1fa   :  { %v1664_v44 = vmax.bf16 %v1616_v41, %v1568_v11  ;;  %v1569_v43 = vpack.c.bf16 %v1141_v28, %v1136_v40  ;;  %v5105_v46 = vpop.f32.mrb[12].mxu0 }
 0x1fb   :  { %v1151_v35 = vadd.f32 %v5105_v46, %v7253_v58  ;;  %v1145_v29 = vpop.f32.mrb[13].mxu0 }
 0x1fc   :  { %v1617_v42 = vmul.bf16 1009007652, %v1569_v43  ;;  %v1146_v0 = vadd.f32 %v7253_v58, %v1145_v29  ;;  %5241 = vmatprep.mubr.msk.bf16.mxu1 %vm1731_vm3, %v1664_v44 }
 0x1fe   :  { %v1665_v55 = vmax.bf16 %v1617_v42, %v1569_v43  ;;  %v1570_v38 = vpack.c.bf16 %v1151_v35, %v1146_v0  ;;  %v5108_v51 = vpop.f32.mrb[14].mxu0 }
 0x1ff   :  { %v1161_v60 = vadd.f32 %v5108_v51, %v7253_v58  ;;  %v1155_v50 = vpop.f32.mrb[15].mxu0 }
 0x200   :  { %v1618_v39 = vmul.bf16 1009007652, %v1570_v38  ;;  %v1156_v49 = vadd.f32 %v7253_v58, %v1155_v50  ;;  %5242 = vmatmul.mubr.msk.bf16.gmra.mrb[8].mxu1 %vm1731_vm3, %v1665_v55 }
 0x202   :  { %v1666_v36 = vmax.bf16 %v1618_v39, %v1570_v38  ;;  %v1571_v45 = vpack.c.bf16 %v1161_v60, %v1156_v49  ;;  %v5111_v2 = vpop.f32.mrb[16].mxu0 }
 0x203   :  { %v1171_v56 = vadd.f32 %v5111_v2, %v7253_v58  ;;  %v1165_v7 = vpop.f32.mrb[17].mxu0 }
 0x204   :  { %v1619_v48 = vmul.bf16 1009007652, %v1571_v45  ;;  %v1166_v61 = vadd.f32 %v7253_v58, %v1165_v7  ;;  %5245 = vmatprep.mubr.msk.bf16.mxu1 %vm1731_vm3, %v1666_v36  ;;  %v5617_v7 = vld [vmem:[#allocation15 + $0x18] sm:$0xff]  }
 0x205   :  { %5335 = vmatprep.subr.bf16.mxu0 %v5617_v7 }
 0x206   :  { %v1667_v53 = vmax.bf16 %v1619_v48, %v1571_v45  ;;  %v1572_v54 = vpack.c.bf16 %v1171_v56, %v1166_v61  ;;  %v5114_v52 = vpop.f32.mrb[18].mxu0  ;;  %5336 = vmatpush3.bf16.msra.mxu0 %v5617_v7 }
 0x207   :  { %v1181_v59 = vadd.f32 %v5114_v52, %v7253_v58  ;;  %v1175_v14 = vpop.f32.mrb[19].mxu0 }
 0x208   :  { %v1620_v3 = vmul.bf16 1009007652, %v1572_v54  ;;  %v1176_v17 = vadd.f32 %v7253_v58, %v1175_v14  ;;  %5246 = vmatmul.mubr.msk.bf16.gmra.mrb[12].mxu1 %vm1731_vm3, %v1667_v53 }
 0x20a   :  { %v1668_v57 = vmax.bf16 %v1620_v3, %v1572_v54  ;;  %v1573_v8 = vpack.c.bf16 %v1181_v59, %v1176_v17  ;;  %v5117_v63 = vpop.f32.mrb[20].mxu0 }
 0x20b   :  { %v1191_v30 = vadd.f32 %v5117_v63, %v7253_v58  ;;  %v1185_v1 = vpop.f32.mrb[21].mxu0 }
 0x20c   :  { %v1621_v5 = vmul.bf16 1009007652, %v1573_v8  ;;  %v1186_v62 = vadd.f32 %v7253_v58, %v1185_v1  ;;  %5249 = vmatprep.mubr.msk.bf16.mxu1 %vm1731_vm3, %v1668_v57 }
 0x20e   :  { %v1669_v6 = vmax.bf16 %v1621_v5, %v1573_v8  ;;  %v1574_v18 = vpack.c.bf16 %v1191_v30, %v1186_v62  ;;  %v5120_v21 = vpop.f32.mrb[22].mxu0 }
 0x20f   :  { %v1201_v10 = vadd.f32 %v5120_v21, %v7253_v58  ;;  %v1195_v4 = vpop.f32.mrb[23].mxu0 }
 0x210   :  { %v1622_v19 = vmul.bf16 1009007652, %v1574_v18  ;;  %v1196_v12 = vadd.f32 %v7253_v58, %v1195_v4  ;;  %5250 = vmatmul.mubr.msk.bf16.gmra.mrb[16].mxu1 %vm1731_vm3, %v1669_v6 }
 0x212   :  { %v1670_v16 = vmax.bf16 %v1622_v19, %v1574_v18  ;;  %v1575_v13 = vpack.c.bf16 %v1201_v10, %v1196_v12  ;;  %v5123_v9 = vpop.f32.mrb[24].mxu0 }
 0x213   :  { %v1211_v34 = vadd.f32 %v5123_v9, %v7253_v58  ;;  %v1205_v37 = vpop.f32.mrb[25].mxu0 }
 0x214   :  { %v1623_v25 = vmul.bf16 1009007652, %v1575_v13  ;;  %v1206_v26 = vadd.f32 %v7253_v58, %v1205_v37  ;;  %5253 = vmatprep.mubr.msk.bf16.mxu1 %vm1731_vm3, %v1670_v16 }
 0x216   :  { %v1671_v15 = vmax.bf16 %v1623_v25, %v1575_v13  ;;  %v1576_v31 = vpack.c.bf16 %v1211_v34, %v1206_v26  ;;  %v5126_v27 = vpop.f32.mrb[26].mxu0 }
 0x217   :  { %v1221_v32 = vadd.f32 %v5126_v27, %v7253_v58  ;;  %v1215_v20 = vpop.f32.mrb[27].mxu0 }
 0x218   :  { %v1624_v33 = vmul.bf16 1009007652, %v1576_v31  ;;  %v1216_v11 = vadd.f32 %v7253_v58, %v1215_v20  ;;  %5254 = vmatmul.mubr.msk.bf16.gmra.mrb[20].mxu1 %vm1731_vm3, %v1671_v15 }
 0x21a   :  { %v1672_v47 = vmax.bf16 %v1624_v33, %v1576_v31  ;;  %v1577_v23 = vpack.c.bf16 %v1221_v32, %v1216_v11  ;;  %v5129_v28 = vpop.f32.mrb[28].mxu0 }
 0x21b   :  { %v1231_v24 = vadd.f32 %v5129_v28, %v7253_v58  ;;  %v1225_v41 = vpop.f32.mrb[29].mxu0 }
 0x21c   :  { %v1625_v40 = vmul.bf16 1009007652, %v1577_v23  ;;  %v1226_v44 = vadd.f32 %v7253_v58, %v1225_v41  ;;  %5257 = vmatprep.mubr.msk.bf16.mxu1 %vm1731_vm3, %v1672_v47 }
 0x21e   :  { %v1673_v43 = vmax.bf16 %v1625_v40, %v1577_v23  ;;  %v1578_v46 = vpack.c.bf16 %v1231_v24, %v1226_v44  ;;  %v5132_v35 = vpop.f32.mrb[30].mxu0 }
 0x21f   :  { %v1241_v29 = vadd.f32 %v5132_v35, %v7253_v58  ;;  %v1235_v42 = vpop.f32.mrb[31].mxu0 }
 0x220   :  { %v1626_v0 = vmul.bf16 1009007652, %v1578_v46  ;;  %v1236_v55 = vadd.f32 %v7253_v58, %v1235_v42  ;;  %5258 = vmatmul.mubr.msk.bf16.gmra.mrb[24].mxu1 %vm1731_vm3, %v1673_v43 }
 0x222   :  { %v1674_v38 = vmax.bf16 %v1626_v0, %v1578_v46  ;;  %v1579_v51 = vpack.c.bf16 %v1241_v29, %v1236_v55  ;;  %v5135_v60 = vpop.f32.mrb[32].mxu0 }
 0x223   :  { %v1251_v50 = vadd.f32 %v5135_v60, %v7253_v58  ;;  %v1245_v39 = vpop.f32.mrb[33].mxu0 }
 0x224   :  { %v1627_v49 = vmul.bf16 1009007652, %v1579_v51  ;;  %v1246_v36 = vadd.f32 %v7253_v58, %v1245_v39  ;;  %5261 = vmatprep.mubr.msk.bf16.mxu1 %vm1731_vm3, %v1674_v38 }
 0x226   :  { %v1675_v45 = vmax.bf16 %v1627_v49, %v1579_v51  ;;  %v1580_v2 = vpack.c.bf16 %v1251_v50, %v1246_v36  ;;  %v5138_v56 = vpop.f32.mrb[34].mxu0 }
 0x227   :  { %v1261_v48 = vadd.f32 %v5138_v56, %v7253_v58  ;;  %v1255_v61 = vpop.f32.mrb[35].mxu0 }
 0x228   :  { %v1628_v53 = vmul.bf16 1009007652, %v1580_v2  ;;  %v1256_v54 = vadd.f32 %v7253_v58, %v1255_v61  ;;  %5262 = vmatmul.mubr.msk.bf16.gmra.mrb[28].mxu1 %vm1731_vm3, %v1675_v45 }
 0x22a   :  { %v1676_v52 = vmax.bf16 %v1628_v53, %v1580_v2  ;;  %v1581_v59 = vpack.c.bf16 %v1261_v48, %v1256_v54  ;;  %v5141_v14 = vpop.f32.mrb[36].mxu0 }
 0x22b   :  { %v1271_v3 = vadd.f32 %v5141_v14, %v7253_v58  ;;  %v1265_v17 = vpop.f32.mrb[37].mxu0 }
 0x22c   :  { %v1629_v57 = vmul.bf16 1009007652, %v1581_v59  ;;  %v1266_v8 = vadd.f32 %v7253_v58, %v1265_v17  ;;  %5265 = vmatprep.mubr.msk.bf16.mxu1 %vm1731_vm3, %v1676_v52 }
 0x22e   :  { %v1677_v63 = vmax.bf16 %v1629_v57, %v1581_v59  ;;  %v1582_v30 = vpack.c.bf16 %v1271_v3, %v1266_v8  ;;  %v5144_v1 = vpop.f32.mrb[38].mxu0 }
 0x22f   :  { %v1281_v5 = vadd.f32 %v5144_v1, %v7253_v58  ;;  %v1275_v62 = vpop.f32.mrb[39].mxu0 }
 0x230   :  { %v1630_v6 = vmul.bf16 1009007652, %v1582_v30  ;;  %v1276_v18 = vadd.f32 %v7253_v58, %v1275_v62  ;;  %5266 = vmatmul.mubr.msk.bf16.gmra.mrb[32].mxu1 %vm1731_vm3, %v1677_v63 }
 0x232   :  { %v1678_v21 = vmax.bf16 %v1630_v6, %v1582_v30  ;;  %v1583_v10 = vpack.c.bf16 %v1281_v5, %v1276_v18  ;;  %v5147_v4 = vpop.f32.mrb[40].mxu0 }
 0x233   :  { %v1291_v19 = vadd.f32 %v5147_v4, %v7253_v58  ;;  %v1285_v12 = vpop.f32.mrb[41].mxu0 }
 0x234   :  { %v1631_v16 = vmul.bf16 1009007652, %v1583_v10  ;;  %v1286_v13 = vadd.f32 %v7253_v58, %v1285_v12  ;;  %5269 = vmatprep.mubr.msk.bf16.mxu1 %vm1731_vm3, %v1678_v21 }
 0x236   :  { %v1679_v9 = vmax.bf16 %v1631_v16, %v1583_v10  ;;  %v1584_v34 = vpack.c.bf16 %v1291_v19, %v1286_v13  ;;  %v5150_v37 = vpop.f32.mrb[42].mxu0 }
 0x237   :  { %v1301_v25 = vadd.f32 %v5150_v37, %v7253_v58  ;;  %v1295_v26 = vpop.f32.mrb[43].mxu0 }
 0x238   :  { %v1632_v15 = vmul.bf16 1009007652, %v1584_v34  ;;  %v1296_v31 = vadd.f32 %v7253_v58, %v1295_v26  ;;  %5270 = vmatmul.mubr.msk.bf16.gmra.mrb[36].mxu1 %vm1731_vm3, %v1679_v9 }
 0x23a   :  { %v1680_v27 = vmax.bf16 %v1632_v15, %v1584_v34  ;;  %v1585_v32 = vpack.c.bf16 %v1301_v25, %v1296_v31  ;;  %v5153_v20 = vpop.f32.mrb[44].mxu0 }
 0x23b   :  { %v1311_v33 = vadd.f32 %v5153_v20, %v7253_v58  ;;  %v1305_v11 = vpop.f32.mrb[45].mxu0 }
 0x23c   :  { %v1633_v47 = vmul.bf16 1009007652, %v1585_v32  ;;  %v1306_v23 = vadd.f32 %v7253_v58, %v1305_v11  ;;  %5273 = vmatprep.mubr.msk.bf16.mxu1 %vm1731_vm3, %v1680_v27 }
 0x23e   :  { %v1681_v28 = vmax.bf16 %v1633_v47, %v1585_v32  ;;  %v1586_v24 = vpack.c.bf16 %v1311_v33, %v1306_v23  ;;  %v5156_v41 = vpop.f32.mrb[46].mxu0 }
 0x23f   :  { %v1321_v40 = vadd.f32 %v5156_v41, %v7253_v58  ;;  %v1315_v44 = vpop.f32.mrb[47].mxu0 }
 0x240   :  { %v1634_v43 = vmul.bf16 1009007652, %v1586_v24  ;;  %v1316_v46 = vadd.f32 %v7253_v58, %v1315_v44  ;;  %5274 = vmatmul.mubr.msk.bf16.gmra.mrb[40].mxu1 %vm1731_vm3, %v1681_v28 }
 0x242   :  { %v1682_v35 = vmax.bf16 %v1634_v43, %v1586_v24  ;;  %v1587_v29 = vpack.c.bf16 %v1321_v40, %v1316_v46  ;;  %v5159_v42 = vpop.f32.mrb[48].mxu0 }
 0x243   :  { %v1331_v0 = vadd.f32 %v5159_v42, %v7253_v58  ;;  %v1325_v55 = vpop.f32.mrb[49].mxu0 }
 0x244   :  { %v1635_v38 = vmul.bf16 1009007652, %v1587_v29  ;;  %v1326_v51 = vadd.f32 %v7253_v58, %v1325_v55  ;;  %5277 = vmatprep.mubr.msk.bf16.mxu1 %vm1731_vm3, %v1682_v35 }
 0x246   :  { %v1683_v60 = vmax.bf16 %v1635_v38, %v1587_v29  ;;  %v1588_v50 = vpack.c.bf16 %v1331_v0, %v1326_v51  ;;  %v5162_v39 = vpop.f32.mrb[50].mxu0 }
 0x247   :  { %v1341_v49 = vadd.f32 %v5162_v39, %v7253_v58  ;;  %v1335_v36 = vpop.f32.mrb[51].mxu0 }
 0x248   :  { %v1636_v45 = vmul.bf16 1009007652, %v1588_v50  ;;  %v1336_v2 = vadd.f32 %v7253_v58, %v1335_v36  ;;  %5278 = vmatmul.mubr.msk.bf16.gmra.mrb[44].mxu1 %vm1731_vm3, %v1683_v60 }
 0x24a   :  { %v1684_v56 = vmax.bf16 %v1636_v45, %v1588_v50  ;;  %v1589_v7 = vpack.c.bf16 %v1341_v49, %v1336_v2  ;;  %v5165_v48 = vpop.f32.mrb[52].mxu0 }
 0x24b   :  { %v1351_v61 = vadd.f32 %v5165_v48, %v7253_v58  ;;  %v1345_v53 = vpop.f32.mrb[53].mxu0 }
 0x24c   :  { %v1637_v54 = vmul.bf16 1009007652, %v1589_v7  ;;  %v1346_v52 = vadd.f32 %v7253_v58, %v1345_v53  ;;  %5281 = vmatprep.mubr.msk.bf16.mxu1 %vm1731_vm3, %v1684_v56 }
 0x24e   :  { %v1685_v59 = vmax.bf16 %v1637_v54, %v1589_v7  ;;  %v1590_v14 = vpack.c.bf16 %v1351_v61, %v1346_v52  ;;  %v5168_v3 = vpop.f32.mrb[54].mxu0 }
 0x24f   :  { %v1361_v17 = vadd.f32 %v5168_v3, %v7253_v58  ;;  %v1355_v57 = vpop.f32.mrb[55].mxu0 }
 0x250   :  { %v1638_v8 = vmul.bf16 1009007652, %v1590_v14  ;;  %v1356_v63 = vadd.f32 %v7253_v58, %v1355_v57  ;;  %5282 = vmatmul.mubr.msk.bf16.gmra.mrb[48].mxu1 %vm1731_vm3, %v1685_v59 }
 0x252   :  { %v1686_v30 = vmax.bf16 %v1638_v8, %v1590_v14  ;;  %v1591_v1 = vpack.c.bf16 %v1361_v17, %v1356_v63  ;;  %v5171_v5 = vpop.f32.mrb[56].mxu0 }
 0x253   :  { %v1371_v62 = vadd.f32 %v5171_v5, %v7253_v58  ;;  %v1365_v6 = vpop.f32.mrb[57].mxu0 }
 0x254   :  { %v1639_v18 = vmul.bf16 1009007652, %v1591_v1  ;;  %v1366_v21 = vadd.f32 %v7253_v58, %v1365_v6  ;;  %5285 = vmatprep.mubr.msk.bf16.mxu1 %vm1731_vm3, %v1686_v30 }
 0x256   :  { %v1687_v10 = vmax.bf16 %v1639_v18, %v1591_v1  ;;  %v1592_v4 = vpack.c.bf16 %v1371_v62, %v1366_v21  ;;  %v5174_v19 = vpop.f32.mrb[58].mxu0 }
 0x257   :  { %v1381_v12 = vadd.f32 %v5174_v19, %v7253_v58  ;;  %v1375_v16 = vpop.f32.mrb[59].mxu0 }
 0x258   :  { %v1640_v13 = vmul.bf16 1009007652, %v1592_v4  ;;  %v1376_v9 = vadd.f32 %v7253_v58, %v1375_v16  ;;  %5286 = vmatmul.mubr.msk.bf16.gmra.mrb[52].mxu1 %vm1731_vm3, %v1687_v10 }
 0x25a   :  { %v1688_v34 = vmax.bf16 %v1640_v13, %v1592_v4  ;;  %v1593_v37 = vpack.c.bf16 %v1381_v12, %v1376_v9  ;;  %v5177_v25 = vpop.f32.mrb[60].mxu0 }
 0x25b   :  { %v1391_v26 = vadd.f32 %v5177_v25, %v7253_v58  ;;  %v1385_v15 = vpop.f32.mrb[61].mxu0 }
 0x25c   :  { %v1641_v31 = vmul.bf16 1009007652, %v1593_v37  ;;  %v1386_v27 = vadd.f32 %v7253_v58, %v1385_v15  ;;  %5289 = vmatprep.mubr.msk.bf16.mxu1 %vm1731_vm3, %v1688_v34 }
 0x25e   :  { %v1689_v32 = vmax.bf16 %v1641_v31, %v1593_v37  ;;  %v1594_v20 = vpack.c.bf16 %v1391_v26, %v1386_v27  ;;  %v5180_v33 = vpop.f32.mrb[62].mxu0 }
 0x25f   :  { %v1401_v11 = vadd.f32 %v5180_v33, %v7253_v58  ;;  %v1395_v47 = vpop.f32.mrb[63].mxu0 }
 0x260   :  { %v1642_v23 = vmul.bf16 1009007652, %v1594_v20  ;;  %v1396_v28 = vadd.f32 %v7253_v58, %v1395_v47  ;;  %5290 = vmatmul.mubr.msk.bf16.gmra.mrb[56].mxu1 %vm1731_vm3, %v1689_v32 }
 0x262   :  { %v1690_v24 = vmax.bf16 %v1642_v23, %v1594_v20  ;;  %v1595_v41 = vpack.c.bf16 %v1401_v11, %v1396_v28  ;;  %v5183_v40 = vpop.f32.mrb[64].mxu0 }
 0x263   :  { %v1411_v44 = vadd.f32 %v5183_v40, %v7253_v58  ;;  %v1405_v43 = vpop.f32.mrb[65].mxu0 }
 0x264   :  { %v1643_v46 = vmul.bf16 1009007652, %v1595_v41  ;;  %v1406_v35 = vadd.f32 %v7253_v58, %v1405_v43  ;;  %5293 = vmatprep.mubr.msk.bf16.mxu1 %vm1731_vm3, %v1690_v24 }
 0x266   :  { %v1691_v29 = vmax.bf16 %v1643_v46, %v1595_v41  ;;  %v1596_v42 = vpack.c.bf16 %v1411_v44, %v1406_v35  ;;  %v5186_v0 = vpop.f32.mrb[66].mxu0 }
 0x267   :  { %v1421_v55 = vadd.f32 %v5186_v0, %v7253_v58  ;;  %v1415_v38 = vpop.f32.mrb[67].mxu0 }
 0x268   :  { %v1644_v51 = vmul.bf16 1009007652, %v1596_v42  ;;  %v1416_v60 = vadd.f32 %v7253_v58, %v1415_v38  ;;  %5294 = vmatmul.mubr.msk.bf16.gmra.mrb[60].mxu1 %vm1731_vm3, %v1691_v29 }
 0x26a   :  { %v1692_v50 = vmax.bf16 %v1644_v51, %v1596_v42  ;;  %v1597_v39 = vpack.c.bf16 %v1421_v55, %v1416_v60  ;;  %v5189_v49 = vpop.f32.mrb[68].mxu0 }
 0x26b   :  { %v1431_v36 = vadd.f32 %v5189_v49, %v7253_v58  ;;  %v1425_v45 = vpop.f32.mrb[69].mxu0 }
 0x26c   :  { %v1645_v2 = vmul.bf16 1009007652, %v1597_v39  ;;  %v1426_v56 = vadd.f32 %v7253_v58, %v1425_v45  ;;  %5297 = vmatprep.mubr.msk.bf16.mxu1 %vm1731_vm3, %v1692_v50 }
 0x26e   :  { %v1693_v7 = vmax.bf16 %v1645_v2, %v1597_v39  ;;  %v1598_v48 = vpack.c.bf16 %v1431_v36, %v1426_v56  ;;  %v5192_v61 = vpop.f32.mrb[70].mxu0 }
 0x26f   :  { %v1441_v53 = vadd.f32 %v5192_v61, %v7253_v58  ;;  %v1435_v54 = vpop.f32.mrb[71].mxu0 }
 0x270   :  { %v1646_v52 = vmul.bf16 1009007652, %v1598_v48  ;;  %v1436_v59 = vadd.f32 %v7253_v58, %v1435_v54  ;;  %5298 = vmatmul.mubr.msk.bf16.gmra.mrb[64].mxu1 %vm1731_vm3, %v1693_v7 }
 0x272   :  { %v1694_v14 = vmax.bf16 %v1646_v52, %v1598_v48  ;;  %v1599_v3 = vpack.c.bf16 %v1441_v53, %v1436_v59  ;;  %v5195_v17 = vpop.f32.mrb[72].mxu0 }
 0x273   :  { %v1451_v57 = vadd.f32 %v5195_v17, %v7253_v58  ;;  %v1445_v8 = vpop.f32.mrb[73].mxu0 }
 0x274   :  { %v1647_v63 = vmul.bf16 1009007652, %v1599_v3  ;;  %v1446_v30 = vadd.f32 %v7253_v58, %v1445_v8  ;;  %5301 = vmatprep.mubr.msk.bf16.mxu1 %vm1731_vm3, %v1694_v14 }
 0x276   :  { %v1695_v1 = vmax.bf16 %v1647_v63, %v1599_v3  ;;  %v1600_v5 = vpack.c.bf16 %v1451_v57, %v1446_v30  ;;  %v5198_v62 = vpop.f32.mrb[74].mxu0 }
 0x277   :  { %v1461_v6 = vadd.f32 %v5198_v62, %v7253_v58  ;;  %v1455_v18 = vpop.f32.mrb[75].mxu0 }
 0x278   :  { %v1648_v21 = vmul.bf16 1009007652, %v1600_v5  ;;  %v1456_v10 = vadd.f32 %v7253_v58, %v1455_v18  ;;  %5302 = vmatmul.mubr.msk.bf16.gmra.mrb[68].mxu1 %vm1731_vm3, %v1695_v1 }
 0x27a   :  { %v1696_v4 = vmax.bf16 %v1648_v21, %v1600_v5  ;;  %v1601_v19 = vpack.c.bf16 %v1461_v6, %v1456_v10  ;;  %v5201_v12 = vpop.f32.mrb[76].mxu0 }
 0x27b   :  { %v1471_v16 = vadd.f32 %v5201_v12, %v7253_v58  ;;  %v1465_v13 = vpop.f32.mrb[77].mxu0 }
 0x27c   :  { %v1649_v9 = vmul.bf16 1009007652, %v1601_v19  ;;  %v1466_v34 = vadd.f32 %v7253_v58, %v1465_v13  ;;  %5305 = vmatprep.mubr.msk.bf16.mxu1 %vm1731_vm3, %v1696_v4 }
 0x27e   :  { %v1697_v37 = vmax.bf16 %v1649_v9, %v1601_v19  ;;  %v1602_v25 = vpack.c.bf16 %v1471_v16, %v1466_v34  ;;  %v5204_v26 = vpop.f32.mrb[78].mxu0 }
 0x27f   :  { %v1481_v15 = vadd.f32 %v5204_v26, %v7253_v58  ;;  %v1475_v31 = vpop.f32.mrb[79].mxu0 }
 0x280   :  { %v1650_v27 = vmul.bf16 1009007652, %v1602_v25  ;;  %v1476_v32 = vadd.f32 %v7253_v58, %v1475_v31  ;;  %5306 = vmatmul.mubr.msk.bf16.gmra.mrb[72].mxu1 %vm1731_vm3, %v1697_v37 }
 0x282   :  { %v1698_v20 = vmax.bf16 %v1650_v27, %v1602_v25  ;;  %v1603_v33 = vpack.c.bf16 %v1481_v15, %v1476_v32  ;;  %v5207_v11 = vpop.f32.mrb[80].mxu0  ;;  %v7399_v32 = vld [vmem:[#allocation14] ss:$0 sm:$0xff] }
 0x283   :  { %v1491_v47 = vadd.f32 %v5207_v11, %v7253_v58  ;;  %v1485_v23 = vpop.f32.mrb[81].mxu0 }
 0x284   :  { %v1651_v28 = vmul.bf16 1009007652, %v1603_v33  ;;  %v1486_v24 = vadd.f32 %v7253_v58, %v1485_v23  ;;  %5309 = vmatprep.mubr.msk.bf16.mxu1 %vm1731_vm3, %v1698_v20 }
 0x286   :  { %v1699_v41 = vmax.bf16 %v1651_v28, %v1603_v33  ;;  %v1604_v40 = vpack.c.bf16 %v1491_v47, %v1486_v24  ;;  %v5210_v44 = vpop.f32.mrb[82].mxu0 }
 0x287   :  { %v1501_v43 = vadd.f32 %v5210_v44, %v7253_v58  ;;  %v1495_v46 = vpop.f32.mrb[83].mxu0 }
 0x288   :  { %v1652_v35 = vmul.bf16 1009007652, %v1604_v40  ;;  %v1496_v29 = vadd.f32 %v7253_v58, %v1495_v46  ;;  %5310 = vmatmul.mubr.msk.bf16.gmra.mrb[76].mxu1 %vm1731_vm3, %v1699_v41 }
 0x28a   :  { %v1700_v42 = vmax.bf16 %v1652_v35, %v1604_v40  ;;  %v1605_v0 = vpack.c.bf16 %v1501_v43, %v1496_v29  ;;  %v5213_v55 = vpop.f32.mrb[84].mxu0 }
 0x28b   :  { %v1511_v38 = vadd.f32 %v5213_v55, %v7253_v58  ;;  %v1505_v51 = vpop.f32.mrb[85].mxu0 }
 0x28c   :  { %v1653_v60 = vmul.bf16 1009007652, %v1605_v0  ;;  %v1506_v50 = vadd.f32 %v7253_v58, %v1505_v51  ;;  %5313 = vmatprep.mubr.msk.bf16.mxu1 %vm1731_vm3, %v1700_v42 }
 0x28e   :  { %v1701_v39 = vmax.bf16 %v1653_v60, %v1605_v0  ;;  %v1606_v49 = vpack.c.bf16 %v1511_v38, %v1506_v50  ;;  %v5216_v36 = vpop.f32.mrb[86].mxu0 }
 0x28f   :  { %v1521_v45 = vadd.f32 %v5216_v36, %v7253_v58  ;;  %v1515_v2 = vpop.f32.mrb[87].mxu0 }
 0x290   :  { %v1654_v56 = vmul.bf16 1009007652, %v1606_v49  ;;  %v1516_v7 = vadd.f32 %v7253_v58, %v1515_v2  ;;  %5314 = vmatmul.mubr.msk.bf16.gmra.mrb[80].mxu1 %vm1731_vm3, %v1701_v39 }
 0x292   :  { %v1702_v48 = vmax.bf16 %v1654_v56, %v1606_v49  ;;  %v1607_v61 = vpack.c.bf16 %v1521_v45, %v1516_v7  ;;  %v5219_v53 = vpop.f32.mrb[88].mxu0 }
 0x293   :  { %v1531_v54 = vadd.f32 %v5219_v53, %v7253_v58  ;;  %v1525_v52 = vpop.f32.mrb[89].mxu0 }
 0x294   :  { %v1655_v59 = vmul.bf16 1009007652, %v1607_v61  ;;  %v1526_v14 = vadd.f32 %v7253_v58, %v1525_v52  ;;  %5317 = vmatprep.mubr.msk.bf16.mxu1 %vm1731_vm3, %v1702_v48 }
 0x296   :  { %v1703_v3 = vmax.bf16 %v1655_v59, %v1607_v61  ;;  %v1608_v17 = vpack.c.bf16 %v1531_v54, %v1526_v14  ;;  %v5222_v57 = vpop.f32.mrb[90].mxu0 }
 0x297   :  { %v1541_v8 = vadd.f32 %v5222_v57, %v7253_v58  ;;  %v1535_v63 = vpop.f32.mrb[91].mxu0 }
 0x298   :  { %v1656_v30 = vmul.bf16 1009007652, %v1608_v17  ;;  %v1536_v1 = vadd.f32 %v7253_v58, %v1535_v63  ;;  %5318 = vmatmul.mubr.msk.bf16.gmra.mrb[84].mxu1 %vm1731_vm3, %v1703_v3 }
 0x29a   :  { %v1704_v5 = vmax.bf16 %v1656_v30, %v1608_v17  ;;  %v1609_v62 = vpack.c.bf16 %v1541_v8, %v1536_v1  ;;  %v5225_v6 = vpop.f32.mrb[92].mxu0 }
 0x29b   :  { %v1551_v18 = vadd.f32 %v5225_v6, %v7253_v58  ;;  %v1545_v21 = vpop.f32.mrb[93].mxu0 }
 0x29c   :  { %v1657_v10 = vmul.bf16 1009007652, %v1609_v62  ;;  %v1546_v4 = vadd.f32 %v7253_v58, %v1545_v21  ;;  %5321 = vmatprep.mubr.msk.bf16.mxu1 %vm1731_vm3, %v1704_v5 }
 0x29e   :  { %v1705_v19 = vmax.bf16 %v1657_v10, %v1609_v62  ;;  %v1610_v12 = vpack.c.bf16 %v1551_v18, %v1546_v4  ;;  %v5228_v16 = vpop.f32.mrb[94].mxu0 }
 0x29f   :  { %v1561_v13 = vadd.f32 %v5228_v16, %v7253_v58  ;;  %v1555_v9 = vpop.f32.mrb[95].mxu0 }
 0x2a0   :  { %v1658_v34 = vmul.bf16 1009007652, %v1610_v12  ;;  %v1556_v37 = vadd.f32 %v7253_v58, %v1555_v9  ;;  %5322 = vmatmul.mubr.msk.bf16.gmra.mrb[88].mxu1 %vm1731_vm3, %v1705_v19 }
 0x2a2   :  { %v1706_v25 = vmax.bf16 %v1658_v34, %v1610_v12  ;;  %v1611_v26 = vpack.c.bf16 %v1561_v13, %v1556_v37 }
 0x2a4   :  { %v1659_v15 = vmul.bf16 1009007652, %v1611_v26  ;;  %5325 = vmatprep.mubr.msk.bf16.mxu1 %vm1731_vm3, %v1706_v25 }
 0x2a6   :  { %v1707_v31 = vmax.bf16 %v1659_v15, %v1611_v26 }
 0x2a8   :  { %5326 = vmatmul.mubr.msk.bf16.gmra.mrb[92].mxu1 %vm1731_vm3, %v1707_v31  ;;  %vm3568_vm3 = vcmask 1047559  }
 0x2c3   :  { %v5235_v27 = vpop.f32.mrb[0].mxu1 }
 0x2c4   :  { %v1910_v20 = vpop.f32.mrb[1].mxu1  ;;  %v1919_v11 = vadd.f32 %v5235_v27, %v7399_v32 }
 0x2c5   :  { %v5236_v33 = vpop.f32.mrb[2].mxu1  ;;  %v1911_v23 = vadd.f32 %v7399_v32, %v1910_v20 }
 0x2c6   :  { %v1922_v47 = vadd.f32 %v5236_v33, %v7399_v32  ;;  %v1913_v58 = vpop.f32.mrb[3].mxu1 }
 0x2c7   :  { %v1914_v28 = vadd.f32 %v7399_v32, %v1913_v58 }
 0x2c8   :  { %v2294_v24 = vpack.c.bf16 %v1922_v47, %v1919_v11 }
 0x2c9   :  { %v2293_v41 = vpack.c.bf16 %v1914_v28, %v1911_v23 }
 0x2ca   :  { %v2342_v40 = vmul.bf16 1009007652, %v2294_v24 }
 0x2cb   :  { %v2341_v44 = vmul.bf16 1009007652, %v2293_v41  ;;  %v5239_v43 = vpop.f32.mrb[4].mxu1 }
 0x2cc   :  { %v1926_v46 = vpop.f32.mrb[5].mxu1  ;;  %v2390_v42 = vmax.bf16 %v2342_v40, %v2294_v24  ;;  %v1935_v0 = vadd.f32 %v5239_v43, %v7399_v32 }
 0x2cd   :  { %v2389_v35 = vmax.bf16 %v2341_v44, %v2293_v41  ;;  %v5240_v29 = vpop.f32.mrb[6].mxu1  ;;  %v1927_v51 = vadd.f32 %v7399_v32, %v1926_v46 }
 0x2ce   :  { %v1938_v55 = vadd.f32 %v5240_v29, %v7399_v32  ;;  %v1929_v38 = vpop.f32.mrb[7].mxu1 }
 0x2cf   :  { %v1930_v60 = vadd.f32 %v7399_v32, %v1929_v38  ;;  %5337 = vmatprep.mubr.msk.bf16.mxu0 %vm2476_vm4, %v2389_v35 }
 0x2d0   :  { %v2296_v50 = vpack.c.bf16 %v1938_v55, %v1935_v0  ;;  %5338 = vmatmul.mubr.msk.bf16.vlgmr.msra.gmra.mrb[96].mxu0 %vm2476_vm4, %v2390_v42 }
 0x2d1   :  { %v2295_v39 = vpack.c.bf16 %v1930_v60, %v1927_v51 }
 0x2d2   :  { %v2344_v49 = vmul.bf16 1009007652, %v2296_v50 }
 0x2d3   :  { %v2343_v36 = vmul.bf16 1009007652, %v2295_v39  ;;  %v5243_v45 = vpop.f32.mrb[8].mxu1 }
 0x2d4   :  { %v1942_v2 = vpop.f32.mrb[9].mxu1  ;;  %v2392_v48 = vmax.bf16 %v2344_v49, %v2296_v50  ;;  %v1951_v61 = vadd.f32 %v5243_v45, %v7399_v32 }
 0x2d5   :  { %v2391_v56 = vmax.bf16 %v2343_v36, %v2295_v39  ;;  %v5244_v7 = vpop.f32.mrb[10].mxu1  ;;  %v1943_v52 = vadd.f32 %v7399_v32, %v1942_v2 }
 0x2d6   :  { %v1954_v53 = vadd.f32 %v5244_v7, %v7399_v32  ;;  %v1945_v54 = vpop.f32.mrb[11].mxu1 }
 0x2d7   :  { %v1946_v59 = vadd.f32 %v7399_v32, %v1945_v54  ;;  %5341 = vmatprep.mubr.msk.bf16.mxu0 %vm2476_vm4, %v2391_v56 }
 0x2d8   :  { %v2298_v14 = vpack.c.bf16 %v1954_v53, %v1951_v61  ;;  %5342 = vmatmul.mubr.msk.bf16.gmra.mrb[100].mxu0 %vm2476_vm4, %v2392_v48 }
 0x2d9   :  { %v2297_v3 = vpack.c.bf16 %v1946_v59, %v1943_v52 }
 0x2da   :  { %v2346_v17 = vmul.bf16 1009007652, %v2298_v14 }
 0x2db   :  { %v2345_v57 = vmul.bf16 1009007652, %v2297_v3  ;;  %v5247_v8 = vpop.f32.mrb[12].mxu1 }
 0x2dc   :  { %v1958_v63 = vpop.f32.mrb[13].mxu1  ;;  %v2394_v5 = vmax.bf16 %v2346_v17, %v2298_v14  ;;  %v1967_v62 = vadd.f32 %v5247_v8, %v7399_v32 }
 0x2dd   :  { %v2393_v30 = vmax.bf16 %v2345_v57, %v2297_v3  ;;  %v5248_v1 = vpop.f32.mrb[14].mxu1  ;;  %v1959_v21 = vadd.f32 %v7399_v32, %v1958_v63 }
 0x2de   :  { %v1970_v6 = vadd.f32 %v5248_v1, %v7399_v32  ;;  %v1961_v18 = vpop.f32.mrb[15].mxu1 }
 0x2df   :  { %v1962_v10 = vadd.f32 %v7399_v32, %v1961_v18  ;;  %5345 = vmatprep.mubr.msk.bf16.mxu0 %vm2476_vm4, %v2393_v30 }
 0x2e0   :  { %v2300_v4 = vpack.c.bf16 %v1970_v6, %v1967_v62  ;;  %5346 = vmatmul.mubr.msk.bf16.gmra.mrb[104].mxu0 %vm2476_vm4, %v2394_v5 }
 0x2e1   :  { %v2299_v19 = vpack.c.bf16 %v1962_v10, %v1959_v21 }
 0x2e2   :  { %v2348_v12 = vmul.bf16 1009007652, %v2300_v4 }
 0x2e3   :  { %v2347_v16 = vmul.bf16 1009007652, %v2299_v19  ;;  %v5251_v13 = vpop.f32.mrb[16].mxu1 }
 0x2e4   :  { %v1974_v9 = vpop.f32.mrb[17].mxu1  ;;  %v2396_v25 = vmax.bf16 %v2348_v12, %v2300_v4  ;;  %v1983_v26 = vadd.f32 %v5251_v13, %v7399_v32 }
 0x2e5   :  { %v2395_v34 = vmax.bf16 %v2347_v16, %v2299_v19  ;;  %v5252_v37 = vpop.f32.mrb[18].mxu1  ;;  %v1975_v27 = vadd.f32 %v7399_v32, %v1974_v9 }
 0x2e6   :  { %v1986_v15 = vadd.f32 %v5252_v37, %v7399_v32  ;;  %v1977_v31 = vpop.f32.mrb[19].mxu1 }
 0x2e7   :  { %v1978_v20 = vadd.f32 %v7399_v32, %v1977_v31  ;;  %5349 = vmatprep.mubr.msk.bf16.mxu0 %vm2476_vm4, %v2395_v34 }
 0x2e8   :  { %v2302_v33 = vpack.c.bf16 %v1986_v15, %v1983_v26  ;;  %5350 = vmatmul.mubr.msk.bf16.gmra.mrb[108].mxu0 %vm2476_vm4, %v2396_v25 }
 0x2e9   :  { %v2301_v11 = vpack.c.bf16 %v1978_v20, %v1975_v27 }
 0x2ea   :  { %v2350_v47 = vmul.bf16 1009007652, %v2302_v33 }
 0x2eb   :  { %v2349_v58 = vmul.bf16 1009007652, %v2301_v11  ;;  %v5255_v23 = vpop.f32.mrb[20].mxu1 }
 0x2ec   :  { %v1990_v28 = vpop.f32.mrb[21].mxu1  ;;  %v2398_v40 = vmax.bf16 %v2350_v47, %v2302_v33  ;;  %v1999_v44 = vadd.f32 %v5255_v23, %v7399_v32 }
 0x2ed   :  { %v2397_v24 = vmax.bf16 %v2349_v58, %v2301_v11  ;;  %v5256_v41 = vpop.f32.mrb[22].mxu1  ;;  %v1991_v35 = vadd.f32 %v7399_v32, %v1990_v28 }
 0x2ee   :  { %v2002_v43 = vadd.f32 %v5256_v41, %v7399_v32  ;;  %v1993_v46 = vpop.f32.mrb[23].mxu1 }
 0x2ef   :  { %v1994_v29 = vadd.f32 %v7399_v32, %v1993_v46  ;;  %5353 = vmatprep.mubr.msk.bf16.mxu0 %vm2476_vm4, %v2397_v24 }
 0x2f0   :  { %v2304_v42 = vpack.c.bf16 %v2002_v43, %v1999_v44  ;;  %5354 = vmatmul.mubr.msk.bf16.gmra.mrb[112].mxu0 %vm2476_vm4, %v2398_v40 }
 0x2f1   :  { %v2303_v0 = vpack.c.bf16 %v1994_v29, %v1991_v35 }
 0x2f2   :  { %v2352_v55 = vmul.bf16 1009007652, %v2304_v42 }
 0x2f3   :  { %v2351_v38 = vmul.bf16 1009007652, %v2303_v0  ;;  %v5259_v51 = vpop.f32.mrb[24].mxu1 }
 0x2f4   :  { %v2006_v60 = vpop.f32.mrb[25].mxu1  ;;  %v2400_v49 = vmax.bf16 %v2352_v55, %v2304_v42  ;;  %v2015_v36 = vadd.f32 %v5259_v51, %v7399_v32 }
 0x2f5   :  { %v2399_v50 = vmax.bf16 %v2351_v38, %v2303_v0  ;;  %v5260_v39 = vpop.f32.mrb[26].mxu1  ;;  %v2007_v56 = vadd.f32 %v7399_v32, %v2006_v60 }
 0x2f6   :  { %v2018_v45 = vadd.f32 %v5260_v39, %v7399_v32  ;;  %v2009_v2 = vpop.f32.mrb[27].mxu1 }
 0x2f7   :  { %v2010_v7 = vadd.f32 %v7399_v32, %v2009_v2  ;;  %5357 = vmatprep.mubr.msk.bf16.mxu0 %vm2476_vm4, %v2399_v50 }
 0x2f8   :  { %v2306_v48 = vpack.c.bf16 %v2018_v45, %v2015_v36  ;;  %5358 = vmatmul.mubr.msk.bf16.gmra.mrb[116].mxu0 %vm2476_vm4, %v2400_v49 }
 0x2f9   :  { %v2305_v61 = vpack.c.bf16 %v2010_v7, %v2007_v56 }
 0x2fa   :  { %v2354_v53 = vmul.bf16 1009007652, %v2306_v48 }
 0x2fb   :  { %v2353_v54 = vmul.bf16 1009007652, %v2305_v61  ;;  %v5263_v52 = vpop.f32.mrb[28].mxu1 }
 0x2fc   :  { %v2022_v59 = vpop.f32.mrb[29].mxu1  ;;  %v2402_v17 = vmax.bf16 %v2354_v53, %v2306_v48  ;;  %v2031_v57 = vadd.f32 %v5263_v52, %v7399_v32 }
 0x2fd   :  { %v2401_v14 = vmax.bf16 %v2353_v54, %v2305_v61  ;;  %v5264_v3 = vpop.f32.mrb[30].mxu1  ;;  %v2023_v30 = vadd.f32 %v7399_v32, %v2022_v59 }
 0x2fe   :  { %v2034_v8 = vadd.f32 %v5264_v3, %v7399_v32  ;;  %v2025_v63 = vpop.f32.mrb[31].mxu1 }
 0x2ff   :  { %v2026_v1 = vadd.f32 %v7399_v32, %v2025_v63  ;;  %5361 = vmatprep.mubr.msk.bf16.mxu0 %vm2476_vm4, %v2401_v14 }
 0x300   :  { %v2308_v5 = vpack.c.bf16 %v2034_v8, %v2031_v57  ;;  %5362 = vmatmul.mubr.msk.bf16.gmra.mrb[120].mxu0 %vm2476_vm4, %v2402_v17 }
 0x301   :  { %v2307_v62 = vpack.c.bf16 %v2026_v1, %v2023_v30 }
 0x302   :  { %v2356_v6 = vmul.bf16 1009007652, %v2308_v5 }
 0x303   :  { %v2355_v18 = vmul.bf16 1009007652, %v2307_v62  ;;  %v5267_v21 = vpop.f32.mrb[32].mxu1 }
 0x304   :  { %v2038_v10 = vpop.f32.mrb[33].mxu1  ;;  %v2404_v12 = vmax.bf16 %v2356_v6, %v2308_v5  ;;  %v2047_v16 = vadd.f32 %v5267_v21, %v7399_v32 }
 0x305   :  { %v2403_v4 = vmax.bf16 %v2355_v18, %v2307_v62  ;;  %v5268_v19 = vpop.f32.mrb[34].mxu1  ;;  %v2039_v34 = vadd.f32 %v7399_v32, %v2038_v10 }
 0x306   :  { %v2050_v13 = vadd.f32 %v5268_v19, %v7399_v32  ;;  %v2041_v9 = vpop.f32.mrb[35].mxu1 }
 0x307   :  { %v2042_v37 = vadd.f32 %v7399_v32, %v2041_v9  ;;  %5365 = vmatprep.mubr.msk.bf16.mxu0 %vm2476_vm4, %v2403_v4 }
 0x308   :  { %v2310_v25 = vpack.c.bf16 %v2050_v13, %v2047_v16  ;;  %5366 = vmatmul.mubr.msk.bf16.gmra.mrb[124].mxu0 %vm2476_vm4, %v2404_v12 }
 0x309   :  { %v2309_v26 = vpack.c.bf16 %v2042_v37, %v2039_v34 }
 0x30a   :  { %v2358_v15 = vmul.bf16 1009007652, %v2310_v25 }
 0x30b   :  { %v2357_v31 = vmul.bf16 1009007652, %v2309_v26  ;;  %v5271_v27 = vpop.f32.mrb[36].mxu1 }
 0x30c   :  { %v2054_v20 = vpop.f32.mrb[37].mxu1  ;;  %v2406_v47 = vmax.bf16 %v2358_v15, %v2310_v25  ;;  %v2063_v58 = vadd.f32 %v5271_v27, %v7399_v32 }
 0x30d   :  { %v2405_v33 = vmax.bf16 %v2357_v31, %v2309_v26  ;;  %v5272_v11 = vpop.f32.mrb[38].mxu1  ;;  %v2055_v24 = vadd.f32 %v7399_v32, %v2054_v20 }
 0x30e   :  { %v2066_v23 = vadd.f32 %v5272_v11, %v7399_v32  ;;  %v2057_v28 = vpop.f32.mrb[39].mxu1 }
 0x30f   :  { %v2058_v41 = vadd.f32 %v7399_v32, %v2057_v28  ;;  %5369 = vmatprep.mubr.msk.bf16.mxu0 %vm2476_vm4, %v2405_v33  ;;  %v6234_v28 = vmov 0.0  }
 0x310   :  { %v2312_v40 = vpack.c.bf16 %v2066_v23, %v2063_v58  ;;  %5370 = vmatmul.mubr.msk.bf16.gmra.mrb[128].mxu0 %vm2476_vm4, %v2406_v47  ;;  %v3465_v58 = vld [vmem:[#allocation21] sm:$0xff]  ;;  %5433 = vmatprep.subr.mxu1 %v6234_v28 }
 0x311   :  { %v2311_v44 = vpack.c.bf16 %v2058_v41, %v2055_v24  ;;  %5434 = vmatpush3.msra.mxu1 %v3465_v58  ;;  %5435 = vmatprep.mubr.msk.f32.mxu1 %vm6237_vm11, %v6234_v28 }
 0x312   :  { %v2360_v43 = vmul.bf16 1009007652, %v2312_v40  ;;  %5438 = vmatprep.subr.bf16.mxu1 %v6234_v28 }
 0x313   :  { %v2359_v46 = vmul.bf16 1009007652, %v2311_v44  ;;  %v5275_v35 = vpop.f32.mrb[40].mxu1 }
 0x314   :  { %v2070_v29 = vpop.f32.mrb[41].mxu1  ;;  %v2408_v55 = vmax.bf16 %v2360_v43, %v2312_v40  ;;  %v2079_v38 = vadd.f32 %v5275_v35, %v7399_v32 }
 0x315   :  { %v2407_v42 = vmax.bf16 %v2359_v46, %v2311_v44  ;;  %v5276_v0 = vpop.f32.mrb[42].mxu1  ;;  %v2071_v50 = vadd.f32 %v7399_v32, %v2070_v29 }
 0x316   :  { %v2082_v51 = vadd.f32 %v5276_v0, %v7399_v32  ;;  %v2073_v60 = vpop.f32.mrb[43].mxu1 }
 0x317   :  { %v2074_v39 = vadd.f32 %v7399_v32, %v2073_v60  ;;  %5373 = vmatprep.mubr.msk.bf16.mxu0 %vm2476_vm4, %v2407_v42 }
 0x318   :  { %v2314_v49 = vpack.c.bf16 %v2082_v51, %v2079_v38  ;;  %5374 = vmatmul.mubr.msk.bf16.gmra.mrb[132].mxu0 %vm2476_vm4, %v2408_v55 }
 0x319   :  { %v2313_v36 = vpack.c.bf16 %v2074_v39, %v2071_v50 }
 0x31a   :  { %v2362_v45 = vmul.bf16 1009007652, %v2314_v49 }
 0x31b   :  { %v2361_v2 = vmul.bf16 1009007652, %v2313_v36  ;;  %v5279_v56 = vpop.f32.mrb[44].mxu1 }
 0x31c   :  { %v2086_v7 = vpop.f32.mrb[45].mxu1  ;;  %v2410_v53 = vmax.bf16 %v2362_v45, %v2314_v49  ;;  %v2095_v54 = vadd.f32 %v5279_v56, %v7399_v32 }
 0x31d   :  { %v2409_v48 = vmax.bf16 %v2361_v2, %v2313_v36  ;;  %v5280_v61 = vpop.f32.mrb[46].mxu1  ;;  %v2087_v14 = vadd.f32 %v7399_v32, %v2086_v7 }
 0x31e   :  { %v2098_v52 = vadd.f32 %v5280_v61, %v7399_v32  ;;  %v2089_v59 = vpop.f32.mrb[47].mxu1 }
 0x31f   :  { %v2090_v3 = vadd.f32 %v7399_v32, %v2089_v59  ;;  %5377 = vmatprep.mubr.msk.bf16.mxu0 %vm2476_vm4, %v2409_v48 }
 0x320   :  { %v2316_v17 = vpack.c.bf16 %v2098_v52, %v2095_v54  ;;  %5378 = vmatmul.mubr.msk.bf16.gmra.mrb[136].mxu0 %vm2476_vm4, %v2410_v53 }
 0x321   :  { %v2315_v57 = vpack.c.bf16 %v2090_v3, %v2087_v14 }
 0x322   :  { %v2364_v8 = vmul.bf16 1009007652, %v2316_v17 }
 0x323   :  { %v2363_v63 = vmul.bf16 1009007652, %v2315_v57  ;;  %v5283_v30 = vpop.f32.mrb[48].mxu1 }
 0x324   :  { %v2102_v1 = vpop.f32.mrb[49].mxu1  ;;  %v2412_v6 = vmax.bf16 %v2364_v8, %v2316_v17  ;;  %v2111_v18 = vadd.f32 %v5283_v30, %v7399_v32 }
 0x325   :  { %v2411_v5 = vmax.bf16 %v2363_v63, %v2315_v57  ;;  %v5284_v62 = vpop.f32.mrb[50].mxu1  ;;  %v2103_v4 = vadd.f32 %v7399_v32, %v2102_v1 }
 0x326   :  { %v2114_v21 = vadd.f32 %v5284_v62, %v7399_v32  ;;  %v2105_v10 = vpop.f32.mrb[51].mxu1 }
 0x327   :  { %v2106_v19 = vadd.f32 %v7399_v32, %v2105_v10  ;;  %5381 = vmatprep.mubr.msk.bf16.mxu0 %vm2476_vm4, %v2411_v5 }
 0x328   :  { %v2318_v12 = vpack.c.bf16 %v2114_v21, %v2111_v18  ;;  %5382 = vmatmul.mubr.msk.bf16.gmra.mrb[140].mxu0 %vm2476_vm4, %v2412_v6 }
 0x329   :  { %v2317_v16 = vpack.c.bf16 %v2106_v19, %v2103_v4 }
 0x32a   :  { %v2366_v13 = vmul.bf16 1009007652, %v2318_v12 }
 0x32b   :  { %v2365_v9 = vmul.bf16 1009007652, %v2317_v16  ;;  %v5287_v34 = vpop.f32.mrb[52].mxu1 }
 0x32c   :  { %v2118_v37 = vpop.f32.mrb[53].mxu1  ;;  %v2414_v15 = vmax.bf16 %v2366_v13, %v2318_v12  ;;  %v2127_v31 = vadd.f32 %v5287_v34, %v7399_v32 }
 0x32d   :  { %v2413_v25 = vmax.bf16 %v2365_v9, %v2317_v16  ;;  %v5288_v26 = vpop.f32.mrb[54].mxu1  ;;  %v2119_v33 = vadd.f32 %v7399_v32, %v2118_v37 }
 0x32e   :  { %v2130_v27 = vadd.f32 %v5288_v26, %v7399_v32  ;;  %v2121_v20 = vpop.f32.mrb[55].mxu1 }
 0x32f   :  { %v2122_v11 = vadd.f32 %v7399_v32, %v2121_v20  ;;  %5385 = vmatprep.mubr.msk.bf16.mxu0 %vm2476_vm4, %v2413_v25 }
 0x330   :  { %v2320_v47 = vpack.c.bf16 %v2130_v27, %v2127_v31  ;;  %5386 = vmatmul.mubr.msk.bf16.gmra.mrb[144].mxu0 %vm2476_vm4, %v2414_v15 }
 0x331   :  { %v2319_v23 = vpack.c.bf16 %v2122_v11, %v2119_v33 }
 0x332   :  { %v2368_v24 = vmul.bf16 1009007652, %v2320_v47 }
 0x333   :  { %v2367_v41 = vmul.bf16 1009007652, %v2319_v23  ;;  %v5291_v40 = vpop.f32.mrb[56].mxu1 }
 0x334   :  { %v2134_v44 = vpop.f32.mrb[57].mxu1  ;;  %v2416_v35 = vmax.bf16 %v2368_v24, %v2320_v47  ;;  %v2143_v29 = vadd.f32 %v5291_v40, %v7399_v32 }
 0x335   :  { %v2415_v43 = vmax.bf16 %v2367_v41, %v2319_v23  ;;  %v5292_v46 = vpop.f32.mrb[58].mxu1  ;;  %v2135_v55 = vadd.f32 %v7399_v32, %v2134_v44 }
 0x336   :  { %v2146_v42 = vadd.f32 %v5292_v46, %v7399_v32  ;;  %v2137_v0 = vpop.f32.mrb[59].mxu1 }
 0x337   :  { %v2138_v38 = vadd.f32 %v7399_v32, %v2137_v0  ;;  %5389 = vmatprep.mubr.msk.bf16.mxu0 %vm2476_vm4, %v2415_v43 }
 0x338   :  { %v2322_v51 = vpack.c.bf16 %v2146_v42, %v2143_v29  ;;  %5390 = vmatmul.mubr.msk.bf16.gmra.mrb[148].mxu0 %vm2476_vm4, %v2416_v35 }
 0x339   :  { %v2321_v60 = vpack.c.bf16 %v2138_v38, %v2135_v55 }
 0x33a   :  { %v2370_v50 = vmul.bf16 1009007652, %v2322_v51 }
 0x33b   :  { %v2369_v39 = vmul.bf16 1009007652, %v2321_v60  ;;  %v5295_v49 = vpop.f32.mrb[60].mxu1 }
 0x33c   :  { %v2150_v36 = vpop.f32.mrb[61].mxu1  ;;  %v2418_v56 = vmax.bf16 %v2370_v50, %v2322_v51  ;;  %v2159_v7 = vadd.f32 %v5295_v49, %v7399_v32 }
 0x33d   :  { %v2417_v45 = vmax.bf16 %v2369_v39, %v2321_v60  ;;  %v5296_v2 = vpop.f32.mrb[62].mxu1  ;;  %v2151_v53 = vadd.f32 %v7399_v32, %v2150_v36 }
 0x33e   :  { %v2162_v48 = vadd.f32 %v5296_v2, %v7399_v32  ;;  %v2153_v61 = vpop.f32.mrb[63].mxu1 }
 0x33f   :  { %v2154_v54 = vadd.f32 %v7399_v32, %v2153_v61  ;;  %5393 = vmatprep.mubr.msk.bf16.mxu0 %vm2476_vm4, %v2417_v45 }
 0x340   :  { %v2324_v52 = vpack.c.bf16 %v2162_v48, %v2159_v7  ;;  %5394 = vmatmul.mubr.msk.bf16.gmra.mrb[152].mxu0 %vm2476_vm4, %v2418_v56 }
 0x341   :  { %v2323_v59 = vpack.c.bf16 %v2154_v54, %v2151_v53 }
 0x342   :  { %v2372_v14 = vmul.bf16 1009007652, %v2324_v52 }
 0x343   :  { %v2371_v3 = vmul.bf16 1009007652, %v2323_v59  ;;  %v5299_v17 = vpop.f32.mrb[64].mxu1 }
 0x344   :  { %v2166_v57 = vpop.f32.mrb[65].mxu1  ;;  %v2420_v30 = vmax.bf16 %v2372_v14, %v2324_v52  ;;  %v2175_v1 = vadd.f32 %v5299_v17, %v7399_v32 }
 0x345   :  { %v2419_v8 = vmax.bf16 %v2371_v3, %v2323_v59  ;;  %v5300_v63 = vpop.f32.mrb[66].mxu1  ;;  %v2167_v6 = vadd.f32 %v7399_v32, %v2166_v57 }
 0x346   :  { %v2178_v5 = vadd.f32 %v5300_v63, %v7399_v32  ;;  %v2169_v62 = vpop.f32.mrb[67].mxu1 }
 0x347   :  { %v2170_v18 = vadd.f32 %v7399_v32, %v2169_v62  ;;  %5397 = vmatprep.mubr.msk.bf16.mxu0 %vm2476_vm4, %v2419_v8 }
 0x348   :  { %v2326_v21 = vpack.c.bf16 %v2178_v5, %v2175_v1  ;;  %5398 = vmatmul.mubr.msk.bf16.gmra.mrb[156].mxu0 %vm2476_vm4, %v2420_v30 }
 0x349   :  { %v2325_v10 = vpack.c.bf16 %v2170_v18, %v2167_v6 }
 0x34a   :  { %v2374_v4 = vmul.bf16 1009007652, %v2326_v21 }
 0x34b   :  { %v2373_v19 = vmul.bf16 1009007652, %v2325_v10  ;;  %v5303_v12 = vpop.f32.mrb[68].mxu1 }
 0x34c   :  { %v2182_v16 = vpop.f32.mrb[69].mxu1  ;;  %v2422_v34 = vmax.bf16 %v2374_v4, %v2326_v21  ;;  %v2191_v37 = vadd.f32 %v5303_v12, %v7399_v32 }
 0x34d   :  { %v2421_v13 = vmax.bf16 %v2373_v19, %v2325_v10  ;;  %v5304_v9 = vpop.f32.mrb[70].mxu1  ;;  %v2183_v15 = vadd.f32 %v7399_v32, %v2182_v16 }
 0x34e   :  { %v2194_v25 = vadd.f32 %v5304_v9, %v7399_v32  ;;  %v2185_v26 = vpop.f32.mrb[71].mxu1 }
 0x34f   :  { %v2186_v31 = vadd.f32 %v7399_v32, %v2185_v26  ;;  %5401 = vmatprep.mubr.msk.bf16.mxu0 %vm2476_vm4, %v2421_v13 }
 0x350   :  { %v2328_v27 = vpack.c.bf16 %v2194_v25, %v2191_v37  ;;  %5402 = vmatmul.mubr.msk.bf16.gmra.mrb[160].mxu0 %vm2476_vm4, %v2422_v34 }
 0x351   :  { %v2327_v20 = vpack.c.bf16 %v2186_v31, %v2183_v15 }
 0x352   :  { %v2376_v33 = vmul.bf16 1009007652, %v2328_v27 }
 0x353   :  { %v2375_v11 = vmul.bf16 1009007652, %v2327_v20  ;;  %v5307_v47 = vpop.f32.mrb[72].mxu1 }
 0x354   :  { %v2198_v58 = vpop.f32.mrb[73].mxu1  ;;  %v2424_v41 = vmax.bf16 %v2376_v33, %v2328_v27  ;;  %v2207_v40 = vadd.f32 %v5307_v47, %v7399_v32 }
 0x355   :  { %v2423_v23 = vmax.bf16 %v2375_v11, %v2327_v20  ;;  %v5308_v24 = vpop.f32.mrb[74].mxu1  ;;  %v2199_v46 = vadd.f32 %v7399_v32, %v2198_v58 }
 0x356   :  { %v2210_v44 = vadd.f32 %v5308_v24, %v7399_v32  ;;  %v2201_v43 = vpop.f32.mrb[75].mxu1 }
 0x357   :  { %v2202_v35 = vadd.f32 %v7399_v32, %v2201_v43  ;;  %5405 = vmatprep.mubr.msk.bf16.mxu0 %vm2476_vm4, %v2423_v23 }
 0x358   :  { %v2330_v29 = vpack.c.bf16 %v2210_v44, %v2207_v40  ;;  %5406 = vmatmul.mubr.msk.bf16.gmra.mrb[164].mxu0 %vm2476_vm4, %v2424_v41 }
 0x359   :  { %v2329_v42 = vpack.c.bf16 %v2202_v35, %v2199_v46 }
 0x35a   :  { %v2378_v0 = vmul.bf16 1009007652, %v2330_v29 }
 0x35b   :  { %v2377_v55 = vmul.bf16 1009007652, %v2329_v42  ;;  %v5311_v38 = vpop.f32.mrb[76].mxu1 }
 0x35c   :  { %v2214_v51 = vpop.f32.mrb[77].mxu1  ;;  %v2426_v39 = vmax.bf16 %v2378_v0, %v2330_v29  ;;  %v2223_v49 = vadd.f32 %v5311_v38, %v7399_v32 }
 0x35d   :  { %v2425_v60 = vmax.bf16 %v2377_v55, %v2329_v42  ;;  %v5312_v50 = vpop.f32.mrb[78].mxu1  ;;  %v2215_v2 = vadd.f32 %v7399_v32, %v2214_v51 }
 0x35e   :  { %v2226_v36 = vadd.f32 %v5312_v50, %v7399_v32  ;;  %v2217_v45 = vpop.f32.mrb[79].mxu1 }
 0x35f   :  { %v2218_v56 = vadd.f32 %v7399_v32, %v2217_v45  ;;  %5409 = vmatprep.mubr.msk.bf16.mxu0 %vm2476_vm4, %v2425_v60 }
 0x360   :  { %v2332_v7 = vpack.c.bf16 %v2226_v36, %v2223_v49  ;;  %5410 = vmatmul.mubr.msk.bf16.gmra.mrb[168].mxu0 %vm2476_vm4, %v2426_v39 }
 0x361   :  { %v2331_v48 = vpack.c.bf16 %v2218_v56, %v2215_v2 }
 0x362   :  { %v2380_v61 = vmul.bf16 1009007652, %v2332_v7 }
 0x363   :  { %v2379_v53 = vmul.bf16 1009007652, %v2331_v48  ;;  %v5315_v54 = vpop.f32.mrb[80].mxu1 }
 0x364   :  { %v2230_v52 = vpop.f32.mrb[81].mxu1  ;;  %v2428_v3 = vmax.bf16 %v2380_v61, %v2332_v7  ;;  %v2239_v17 = vadd.f32 %v5315_v54, %v7399_v32  ;;  %v7547_v61 = vld [vmem:[#allocation17] ss:$0 sm:$0xff] }
 0x365   :  { %v2427_v59 = vmax.bf16 %v2379_v53, %v2331_v48  ;;  %v5316_v14 = vpop.f32.mrb[82].mxu1  ;;  %v2231_v63 = vadd.f32 %v7399_v32, %v2230_v52  ;;  %v6236_v53 = vmov 0  }
 0x366   :  { %v2242_v57 = vadd.f32 %v5316_v14, %v7399_v32  ;;  %v2233_v8 = vpop.f32.mrb[83].mxu1  ;;  %v3243_v54 = vsel %vm3231_vm6, 65537, %v6236_v53 }
 0x367   :  { %v2234_v30 = vadd.f32 %v7399_v32, %v2233_v8  ;;  %5413 = vmatprep.mubr.msk.bf16.mxu0 %vm2476_vm4, %v2427_v59 }
 0x368   :  { %v2334_v1 = vpack.c.bf16 %v2242_v57, %v2239_v17  ;;  %5414 = vmatmul.mubr.msk.bf16.gmra.mrb[172].mxu0 %vm2476_vm4, %v2428_v3  ;;  %v4771_v57 = vcombine.low %v3243_v54, %v3243_v54 }
 0x369   :  { %v2333_v5 = vpack.c.bf16 %v2234_v30, %v2231_v63 }
 0x36a   :  { %v2382_v62 = vmul.bf16 1009007652, %v2334_v1  ;;  %vm7556_vm7 = vcmp.ne.s16.totalorder %v4771_v57, 0 }
 0x36b   :  { %v2381_v6 = vmul.bf16 1009007652, %v2333_v5  ;;  %v5319_v18 = vpop.f32.mrb[84].mxu1 }
 0x36c   :  { %v2246_v21 = vpop.f32.mrb[85].mxu1  ;;  %v2430_v19 = vmax.bf16 %v2382_v62, %v2334_v1  ;;  %v2255_v12 = vadd.f32 %v5319_v18, %v7399_v32  ;;  %v7554_v1 = vshrl.u32 %v617_v22, 7 }
 0x36d   :  { %v2429_v10 = vmax.bf16 %v2381_v6, %v2333_v5  ;;  %v5320_v4 = vpop.f32.mrb[86].mxu1  ;;  %v2247_v9 = vadd.f32 %v7399_v32, %v2246_v21 }
 0x36e   :  { %v2258_v16 = vadd.f32 %v5320_v4, %v7399_v32  ;;  %v2249_v13 = vpop.f32.mrb[87].mxu1 }
 0x36f   :  { %v2250_v34 = vadd.f32 %v7399_v32, %v2249_v13  ;;  %5417 = vmatprep.mubr.msk.bf16.mxu0 %vm2476_vm4, %v2429_v10 }
 0x370   :  { %v2336_v37 = vpack.c.bf16 %v2258_v16, %v2255_v12  ;;  %5418 = vmatmul.mubr.msk.bf16.gmra.mrb[176].mxu0 %vm2476_vm4, %v2430_v19  ;;  %v3194_v12 = vadd.s32 88, %v7554_v1 }
 0x371   :  { %v2335_v25 = vpack.c.bf16 %v2250_v34, %v2247_v9 }
 0x372   :  { %v2384_v26 = vmul.bf16 1009007652, %v2336_v37  ;;  %vm3206_vm8 = vcmp.lt.s32.totalorder %v3194_v12, 90 }
 0x373   :  { %v2383_v15 = vmul.bf16 1009007652, %v2335_v25  ;;  %v5323_v31 = vpop.f32.mrb[88].mxu1  ;;  %vm3242_vm9 = vmpackc.low %vm3206_vm8, %vm3206_vm8  ;;  %vm4255_vm8 = vcmask 130048  }
 0x374   :  { %v2262_v27 = vpop.f32.mrb[89].mxu1  ;;  %v2432_v11 = vmax.bf16 %v2384_v26, %v2336_v37  ;;  %v2271_v47 = vadd.f32 %v5323_v31, %v7399_v32 }
 0x375   :  { %v2431_v20 = vmax.bf16 %v2383_v15, %v2335_v25  ;;  %v5324_v33 = vpop.f32.mrb[90].mxu1  ;;  %v2263_v24 = vadd.f32 %v7399_v32, %v2262_v27 }
 0x376   :  { %v2274_v58 = vadd.f32 %v5324_v33, %v7399_v32  ;;  %v2265_v23 = vpop.f32.mrb[91].mxu1 }
 0x377   :  { %v2266_v41 = vadd.f32 %v7399_v32, %v2265_v23  ;;  %5421 = vmatprep.mubr.msk.bf16.mxu0 %vm2476_vm4, %v2431_v20 }
 0x378   :  { %v2338_v40 = vpack.c.bf16 %v2274_v58, %v2271_v47  ;;  %5422 = vmatmul.mubr.msk.bf16.gmra.mrb[180].mxu0 %vm2476_vm4, %v2432_v11 }
 0x379   :  { %v2337_v44 = vpack.c.bf16 %v2266_v41, %v2263_v24 }
 0x37a   :  { %v2386_v43 = vmul.bf16 1009007652, %v2338_v40 }
 0x37b   :  { %v2385_v46 = vmul.bf16 1009007652, %v2337_v44  ;;  %v5327_v35 = vpop.f32.mrb[92].mxu1 }
 0x37c   :  { %v2278_v29 = vpop.f32.mrb[93].mxu1  ;;  %v2434_v55 = vmax.bf16 %v2386_v43, %v2338_v40  ;;  %v2287_v38 = vadd.f32 %v5327_v35, %v7399_v32 }
 0x37d   :  { %v2433_v42 = vmax.bf16 %v2385_v46, %v2337_v44  ;;  %v5328_v0 = vpop.f32.mrb[94].mxu1  ;;  %v2279_v50 = vadd.f32 %v7399_v32, %v2278_v29  ;;  %v3254_v46 = vsel %vm3242_vm9, 65537, %v6236_v53  ;;  %vm4344_vm9 = vcmask 1041408  }
 0x37e   :  { %v2290_v51 = vadd.f32 %v5328_v0, %v7399_v32  ;;  %v2281_v60 = vpop.f32.mrb[95].mxu1 }
 0x37f   :  { %v2282_v39 = vadd.f32 %v7399_v32, %v2281_v60  ;;  %5425 = vmatprep.mubr.msk.bf16.mxu0 %vm2476_vm4, %v2433_v42 }
 0x380   :  { %v2340_v49 = vpack.c.bf16 %v2290_v51, %v2287_v38  ;;  %5426 = vmatmul.mubr.msk.bf16.gmra.mrb[184].mxu0 %vm2476_vm4, %v2434_v55  ;;  %v4776_v51 = vcombine.low %v3243_v54, %v3254_v46 }
 0x381   :  { %v2339_v36 = vpack.c.bf16 %v2282_v39, %v2279_v50 }
 0x382   :  { %v2388_v45 = vmul.bf16 1009007652, %v2340_v49  ;;  %vm7577_vm10 = vcmp.ne.s16.totalorder %v4776_v51, 0 }
 0x383   :  { %v2387_v2 = vmul.bf16 1009007652, %v2339_v36 }
 0x384   :  { %v2436_v7 = vmax.bf16 %v2388_v45, %v2340_v49 }
 0x385   :  { %v2435_v56 = vmax.bf16 %v2387_v2, %v2339_v36 }
 0x387   :  { %5429 = vmatprep.mubr.msk.bf16.mxu0 %vm2476_vm4, %v2435_v56  ;;  %v5627_v56 = vld [vmem:[#allocation18 + $0x48] sm:$0xff]  }
 0x388   :  { %5430 = vmatmul.mubr.msk.bf16.gmra.mrb[188].mxu0 %vm2476_vm4, %v2436_v7  ;;  %vm4123_vm4 = vcmask 31744  }
 0x3a3   :  { %v5339_v48 = vpop.f32.mrb[96].mxu0 }
 0x3a4   :  { %v2655_v32 = vpop.f32.mrb[97].mxu0  ;;  %v2664_v59 = vadd.f32 %v5339_v48, %v7547_v61 }
 0x3a5   :  { %v5340_v52 = vpop.f32.mrb[98].mxu0  ;;  %v2656_v17 = vadd.f32 %v7547_v61, %v2655_v32 }
 0x3a6   :  { %v2667_v14 = vadd.f32 %v5340_v52, %v7547_v61  ;;  %v2658_v3 = vpop.f32.mrb[99].mxu0 }
 0x3a7   :  { %v2659_v8 = vadd.f32 %v7547_v61, %v2658_v3 }
 0x3a8   :  { %v3039_v63 = vpack.c.bf16 %v2667_v14, %v2664_v59 }
 0x3a9   :  { %v3038_v30 = vpack.c.bf16 %v2659_v8, %v2656_v17 }
 0x3aa   :  { %v3087_v5 = vmul.bf16 1009007652, %v3039_v63 }
 0x3ab   :  { %v3086_v6 = vmul.bf16 1009007652, %v3038_v30  ;;  %v5343_v18 = vpop.f32.mrb[100].mxu0 }
 0x3ac   :  { %v3135_v21 = vmax.bf16 %v3087_v5, %v3039_v63  ;;  %v2671_v10 = vpop.f32.mrb[101].mxu0  ;;  %v2680_v13 = vadd.f32 %v5343_v18, %v7547_v61 }
 0x3ad   :  { %v3134_v4 = vmax.bf16 %v3086_v6, %v3038_v30  ;;  %v5344_v19 = vpop.f32.mrb[102].mxu0  ;;  %v2672_v37 = vadd.f32 %v7547_v61, %v2671_v10 }
 0x3ae   :  { %v3280_v16 = vsel %vm7556_vm7, %v3135_v21, 4286578559  ;;  %v2683_v22 = vadd.f32 %v5344_v19, %v7547_v61  ;;  %v2674_v9 = vpop.f32.mrb[103].mxu0 }
 0x3af   :  { %v3279_v34 = vsel %vm7556_vm7, %v3134_v4, 4286578559  ;;  %v2675_v25 = vadd.f32 %v7547_v61, %v2674_v9 }
 0x3b0   :  { %v3327_v26 = vmax.bf16 %v3280_v16, %v3279_v34  ;;  %v3041_v15 = vpack.c.bf16 %v2683_v22, %v2680_v13 }
 0x3b1   :  { %v3040_v31 = vpack.c.bf16 %v2675_v25, %v2672_v37 }
 0x3b2   :  { %v3089_v27 = vmul.bf16 1009007652, %v3041_v15 }
 0x3b3   :  { %v3088_v20 = vmul.bf16 1009007652, %v3040_v31  ;;  %v5347_v33 = vpop.f32.mrb[104].mxu0 }
 0x3b4   :  { %v2687_v11 = vpop.f32.mrb[105].mxu0  ;;  %v3137_v47 = vmax.bf16 %v3089_v27, %v3041_v15  ;;  %v2696_v24 = vadd.f32 %v5347_v33, %v7547_v61 }
 0x3b5   :  { %v3136_v58 = vmax.bf16 %v3088_v20, %v3040_v31  ;;  %v5348_v23 = vpop.f32.mrb[106].mxu0  ;;  %v2688_v43 = vadd.f32 %v7547_v61, %v2687_v11 }
 0x3b6   :  { %v2699_v41 = vadd.f32 %v5348_v23, %v7547_v61  ;;  %v2690_v40 = vpop.f32.mrb[107].mxu0  ;;  %v3282_v0 = vsel %vm7556_vm7, %v3137_v47, 4286578559 }
 0x3b7   :  { %v3281_v44 = vsel %vm7556_vm7, %v3136_v58, 4286578559  ;;  %v2691_v35 = vadd.f32 %v7547_v61, %v2690_v40 }
 0x3b8   :  { %v3328_v29 = vmax.bf16 %v3327_v26, %v3281_v44  ;;  %v3043_v42 = vpack.c.bf16 %v2699_v41, %v2696_v24 }
 0x3b9   :  { %v3042_v55 = vpack.c.bf16 %v2691_v35, %v2688_v43 }
 0x3ba   :  { %v3091_v38 = vmul.bf16 1009007652, %v3043_v42  ;;  %v3329_v60 = vmax.bf16 %v3328_v29, %v3282_v0 }
 0x3bb   :  { %v3090_v50 = vmul.bf16 1009007652, %v3042_v55  ;;  %v5351_v39 = vpop.f32.mrb[108].mxu0 }
 0x3bc   :  { %v2703_v49 = vpop.f32.mrb[109].mxu0  ;;  %v3139_v36 = vmax.bf16 %v3091_v38, %v3043_v42  ;;  %v2712_v7 = vadd.f32 %v5351_v39, %v7547_v61 }
 0x3bd   :  { %v3138_v45 = vmax.bf16 %v3090_v50, %v3042_v55  ;;  %v5352_v2 = vpop.f32.mrb[110].mxu0  ;;  %v2704_v54 = vadd.f32 %v7547_v61, %v2703_v49 }
 0x3be   :  { %v2715_v48 = vadd.f32 %v5352_v2, %v7547_v61  ;;  %v2706_v32 = vpop.f32.mrb[111].mxu0  ;;  %v3284_v3 = vsel %vm7577_vm10, %v3139_v36, 4286578559 }
 0x3bf   :  { %v3283_v53 = vsel %vm7556_vm7, %v3138_v45, 4286578559  ;;  %v2707_v52 = vadd.f32 %v7547_v61, %v2706_v32 }
 0x3c0   :  { %v3330_v59 = vmax.bf16 %v3329_v60, %v3283_v53  ;;  %v3045_v14 = vpack.c.bf16 %v2715_v48, %v2712_v7 }
 0x3c1   :  { %v3044_v17 = vpack.c.bf16 %v2707_v52, %v2704_v54 }
 0x3c2   :  { %v3331_v57 = vmax.bf16 %v3330_v59, %v3284_v3  ;;  %v3093_v8 = vmul.bf16 1009007652, %v3045_v14 }
 0x3c3   :  { %v3092_v63 = vmul.bf16 1009007652, %v3044_v17  ;;  %v5355_v30 = vpop.f32.mrb[112].mxu0 }
 0x3c4   :  { %v3141_v5 = vmax.bf16 %v3093_v8, %v3045_v14  ;;  %v2719_v6 = vpop.f32.mrb[113].mxu0  ;;  %v2728_v4 = vadd.f32 %v5355_v30, %v7547_v61  ;;  %v3332_v37 = vunpack.i.l.bf16 %v3331_v57  ;;  %v3333_v25 = vunpack.i.h.bf16 %v3331_v57 }
 0x3c5   :  { %v3140_v18 = vmax.bf16 %v3092_v63, %v3044_v17  ;;  %v5356_v21 = vpop.f32.mrb[114].mxu0  ;;  %v2720_v13 = vadd.f32 %v7547_v61, %v2719_v6 }
 0x3c6   :  { %v3286_v10 = vsel %vm7556_vm7, %v3141_v5, 4286578559  ;;  %v2731_v19 = vadd.f32 %v5356_v21, %v7547_v61  ;;  %v2722_v12 = vpop.f32.mrb[115].mxu0  ;;  %v3334_v33 = vmax.f32 %v3332_v37, %v3333_v25 }
 0x3c7   :  { %v3285_v16 = vsel %vm7556_vm7, %v3140_v18, 4286578559  ;;  %v2723_v22 = vadd.f32 %v7547_v61, %v2722_v12 }
 0x3c8   :  { %v3342_v9 = vmax.bf16 %v3286_v10, %v3285_v16  ;;  %v3047_v34 = vpack.c.bf16 %v2731_v19, %v2728_v4  ;;  %v3335_v29 = vrot.slane %v3334_v33, 4 }
 0x3c9   :  { %v3046_v26 = vpack.c.bf16 %v2723_v22, %v2720_v13 }
 0x3ca   :  { %v3095_v15 = vmul.bf16 1009007652, %v3047_v34  ;;  %v3336_v39 = vmax.f32 %v3334_v33, %v3335_v29 }
 0x3cb   :  { %v3094_v31 = vmul.bf16 1009007652, %v3046_v26  ;;  %v5359_v27 = vpop.f32.mrb[116].mxu0 }
 0x3cc   :  { %v2735_v20 = vpop.f32.mrb[117].mxu0  ;;  %v3143_v11 = vmax.bf16 %v3095_v15, %v3047_v34  ;;  %v2744_v23 = vadd.f32 %v5359_v27, %v7547_v61  ;;  %v3337_v14 = vrot.slane %v3336_v39, 2 }
 0x3cd   :  { %v3142_v47 = vmax.bf16 %v3094_v31, %v3046_v26  ;;  %v5360_v58 = vpop.f32.mrb[118].mxu0  ;;  %v2736_v44 = vadd.f32 %v7547_v61, %v2735_v20 }
 0x3ce   :  { %v2747_v24 = vadd.f32 %v5360_v58, %v7547_v61  ;;  %v2738_v41 = vpop.f32.mrb[119].mxu0  ;;  %v3288_v42 = vsel %vm7556_vm7, %v3143_v11, 4286578559  ;;  %v3338_v10 = vmax.f32 %v3336_v39, %v3337_v14  ;;  %v5618_v58 = vld [vmem:[#allocation18] sm:$0xff]  }
 0x3cf   :  { %v3287_v40 = vsel %vm7556_vm7, %v3142_v47, 4286578559  ;;  %v2739_v43 = vadd.f32 %v7547_v61, %v2738_v41  ;;  %v3447_v47 = vld [vmem:[#allocation6] sm:$0xff] }
 0x3d0   :  { %v3343_v46 = vmax.bf16 %v3342_v9, %v3287_v40  ;;  %v3049_v35 = vpack.c.bf16 %v2747_v24, %v2744_v23  ;;  %v3339_v20 = vrot.slane %v3338_v10, 1  ;;  %5436 = vmatmul.mubr.msk.f32.vlgmr.msra.gmra.mrb[96].mxu1 %vm3466_vm12, %v3447_v47 }
 0x3d1   :  { %v3048_v0 = vpack.c.bf16 %v2739_v43, %v2736_v44  ;;  %5439 = vmatpush3.bf16.msra.mxu1 %v5618_v58  ;;  %5454 = vmatprep.mubr.msk.bf16.mxu1 %vm6237_vm11, %v6234_v28 }
 0x3d2   :  { %v3097_v55 = vmul.bf16 1009007652, %v3049_v35  ;;  %v3344_v38 = vmax.bf16 %v3343_v46, %v3288_v42  ;;  %5440 = vmatprep.subr.bf16.mxu1 %v6234_v28 }
 0x3d3   :  { %v3096_v51 = vmul.bf16 1009007652, %v3048_v0  ;;  %v5363_v60 = vpop.f32.mrb[120].mxu0 }
 0x3d4   :  { %v2751_v50 = vpop.f32.mrb[121].mxu0  ;;  %v3145_v49 = vmax.bf16 %v3097_v55, %v3049_v35  ;;  %v2760_v2 = vadd.f32 %v5363_v60, %v7547_v61  ;;  %v3340_v35 = vmax.f32 %v3338_v10, %v3339_v20 }
 0x3d5   :  { %v3144_v36 = vmax.bf16 %v3096_v51, %v3048_v0  ;;  %v5364_v45 = vpop.f32.mrb[122].mxu0  ;;  %v2752_v53 = vadd.f32 %v7547_v61, %v2751_v50 }
 0x3d6   :  { %v2763_v7 = vadd.f32 %v5364_v45, %v7547_v61  ;;  %v2754_v48 = vpop.f32.mrb[123].mxu0  ;;  %v3290_v3 = vsel %vm7577_vm10, %v3145_v49, 4286578559 }
 0x3d7   :  { %v3289_v32 = vsel %vm7556_vm7, %v3144_v36, 4286578559  ;;  %v2755_v54 = vadd.f32 %v7547_v61, %v2754_v48 }
 0x3d8   :  { %v3345_v52 = vmax.bf16 %v3344_v38, %v3289_v32  ;;  %v3051_v59 = vpack.c.bf16 %v2763_v7, %v2760_v2  ;;  %v5619_v38 = vld [vmem:[#allocation18 + $0x8] sm:$0xff]   ;;  %v3341_v7 = vpack.i.bf16 %v3340_v35, %v3340_v35 }
 0x3d9   :  { %v3050_v17 = vpack.c.bf16 %v2755_v54, %v2752_v53  ;;  %5441 = vmatpush3.bf16.msra.mxu1 %v5619_v38  ;;  %v5620_v54 = vld [vmem:[#allocation18 + $0x10] sm:$0xff]  }
 0x3da   :  { %v3346_v57 = vmax.bf16 %v3345_v52, %v3290_v3  ;;  %v3099_v8 = vmul.bf16 1009007652, %v3051_v59  ;;  %5442 = vmatprep.subr.bf16.mxu1 %v6234_v28 }
 0x3db   :  { %v3098_v63 = vmul.bf16 1009007652, %v3050_v17  ;;  %v5367_v30 = vpop.f32.mrb[124].mxu0 }
 0x3dc   :  { %v3347_v5 = vunpack.i.l.bf16 %v3346_v57  ;;  %v3348_v6 = vunpack.i.h.bf16 %v3346_v57  ;;  %v3147_v18 = vmax.bf16 %v3099_v8, %v3051_v59  ;;  %v2767_v21 = vpop.f32.mrb[125].mxu0  ;;  %v2776_v13 = vadd.f32 %v5367_v30, %v7547_v61 }
 0x3dd   :  { %v3146_v4 = vmax.bf16 %v3098_v63, %v3050_v17  ;;  %v5368_v19 = vpop.f32.mrb[126].mxu0  ;;  %v2768_v37 = vadd.f32 %v7547_v61, %v2767_v21  ;;  %5443 = vmatpush3.bf16.msra.mxu1 %v5620_v54  ;;  %v3548_v63 = vunpack.c.l.b16 %v3341_v7  ;;  %v5621_v21 = vld [vmem:[#allocation18 + $0x18] sm:$0xff]  }
 0x3de   :  { %v3349_v12 = vmax.f32 %v3347_v5, %v3348_v6  ;;  %v3292_v16 = vsel %vm7556_vm7, %v3147_v18, 4286578559  ;;  %v2779_v22 = vadd.f32 %v5368_v19, %v7547_v61  ;;  %v2770_v9 = vpop.f32.mrb[127].mxu0  ;;  %5444 = vmatprep.subr.bf16.mxu1 %v6234_v28 }
 0x3df   :  { %v3291_v34 = vsel %vm7556_vm7, %v3146_v4, 4286578559  ;;  %v2771_v25 = vadd.f32 %v7547_v61, %v2770_v9 }
 0x3e0   :  { %v3350_v26 = vrot.slane %v3349_v12, 4  ;;  %v3357_v15 = vmax.bf16 %v3292_v16, %v3291_v34  ;;  %v3053_v31 = vpack.c.bf16 %v2779_v22, %v2776_v13 }
 0x3e1   :  { %v3052_v27 = vpack.c.bf16 %v2771_v25, %v2768_v37  ;;  %5445 = vmatpush3.bf16.msra.mxu1 %v5621_v21  ;;  %v5622_v25 = vld [vmem:[#allocation18 + $0x20] sm:$0xff]  }
 0x3e2   :  { %v3351_v33 = vmax.f32 %v3349_v12, %v3350_v26  ;;  %v3101_v11 = vmul.bf16 1009007652, %v3053_v31  ;;  %5446 = vmatprep.subr.bf16.mxu1 %v6234_v28 }
 0x3e3   :  { %v3100_v23 = vmul.bf16 1009007652, %v3052_v27  ;;  %v5371_v24 = vpop.f32.mrb[128].mxu0 }
 0x3e4   :  { %v3352_v41 = vrot.slane %v3351_v33, 2  ;;  %v2783_v40 = vpop.f32.mrb[129].mxu0  ;;  %v3149_v44 = vmax.bf16 %v3101_v11, %v3053_v31  ;;  %v2792_v42 = vadd.f32 %v5371_v24, %v7547_v61  ;;  %v5623_v11 = vld [vmem:[#allocation18 + $0x28] sm:$0xff]  }
 0x3e5   :  { %v3148_v43 = vmax.bf16 %v3100_v23, %v3052_v27  ;;  %v5372_v46 = vpop.f32.mrb[130].mxu0  ;;  %v2784_v60 = vadd.f32 %v7547_v61, %v2783_v40  ;;  %5447 = vmatpush3.bf16.msra.mxu1 %v5622_v25 }
 0x3e6   :  { %v3353_v29 = vmax.f32 %v3351_v33, %v3352_v41  ;;  %v2795_v0 = vadd.f32 %v5372_v46, %v7547_v61  ;;  %v2786_v55 = vpop.f32.mrb[131].mxu0  ;;  %v3294_v45 = vsel %vm7556_vm7, %v3149_v44, 4286578559  ;;  %5448 = vmatprep.subr.bf16.mxu1 %v6234_v28 }
 0x3e7   :  { %v3293_v51 = vsel %vm7556_vm7, %v3148_v43, 4286578559  ;;  %v2787_v50 = vadd.f32 %v7547_v61, %v2786_v55  ;;  %v5624_v55 = vld [vmem:[#allocation18 + $0x30] sm:$0xff]  }
 0x3e8   :  { %v3354_v39 = vrot.slane %v3353_v29, 1  ;;  %v3358_v49 = vmax.bf16 %v3357_v15, %v3293_v51  ;;  %v3055_v36 = vpack.c.bf16 %v2795_v0, %v2792_v42 }
 0x3e9   :  { %v3054_v2 = vpack.c.bf16 %v2787_v50, %v2784_v60  ;;  %5449 = vmatpush3.bf16.msra.mxu1 %v5623_v11 }
 0x3ea   :  { %v3355_v48 = vmax.f32 %v3353_v29, %v3354_v39  ;;  %v3103_v32 = vmul.bf16 1009007652, %v3055_v36  ;;  %v3359_v53 = vmax.bf16 %v3358_v49, %v3294_v45  ;;  %5450 = vmatprep.subr.bf16.mxu1 %v6234_v28  ;;  %v5625_v45 = vld [vmem:[#allocation18 + $0x38] sm:$0xff]  }
 0x3eb   :  { %v3102_v52 = vmul.bf16 1009007652, %v3054_v2  ;;  %v5375_v59 = vpop.f32.mrb[132].mxu0 }
 0x3ec   :  { %v3356_v14 = vpack.i.bf16 %v3355_v48, %v3355_v48  ;;  %v2799_v3 = vpop.f32.mrb[133].mxu0  ;;  %v3151_v17 = vmax.bf16 %v3103_v32, %v3055_v36  ;;  %v2808_v5 = vadd.f32 %v5375_v59, %v7547_v61 }
 0x3ed   :  { %v3150_v57 = vmax.bf16 %v3102_v52, %v3054_v2  ;;  %v5376_v8 = vpop.f32.mrb[134].mxu0  ;;  %v2800_v4 = vadd.f32 %v7547_v61, %v2799_v3  ;;  %5451 = vmatpush3.bf16.msra.mxu1 %v5624_v55 }
 0x3ee   :  { %v3549_v30 = vunpack.c.l.b16 %v3356_v14  ;;  %v2811_v6 = vadd.f32 %v5376_v8, %v7547_v61  ;;  %v2802_v18 = vpop.f32.mrb[135].mxu0  ;;  %v3296_v22 = vsel %vm7577_vm10, %v3151_v17, 4286578559  ;;  %5452 = vmatprep.subr.bf16.mxu1 %v6234_v28 }
 0x3ef   :  { %v3295_v10 = vsel %vm7556_vm7, %v3150_v57, 4286578559  ;;  %v2803_v19 = vadd.f32 %v7547_v61, %v2802_v18 }
 0x3f0   :  { %v3360_v12 = vmax.bf16 %v3359_v53, %v3295_v10  ;;  %v3057_v16 = vpack.c.bf16 %v2811_v6, %v2808_v5  ;;  %v7643_v13 = vsel %vm3556_vm13, %v3549_v30, %v3548_v63 }
 0x3f1   :  { %v3056_v9 = vpack.c.bf16 %v2803_v19, %v2800_v4  ;;  %5453 = vmatpush3.bf16.msra.mxu1 %v5625_v45 }
 0x3f2   :  { %v3361_v34 = vmax.bf16 %v3360_v12, %v3296_v22  ;;  %v3105_v37 = vmul.bf16 1009007652, %v3057_v16  ;;  %5458 = vmatprep.subr.bf16.mxu1 %v6234_v28 }
 0x3f3   :  { %v3104_v26 = vmul.bf16 1009007652, %v3056_v9  ;;  %v5379_v15 = vpop.f32.mrb[136].mxu0 }
 0x3f4   :  { %v3362_v31 = vunpack.i.l.bf16 %v3361_v34  ;;  %v3363_v27 = vunpack.i.h.bf16 %v3361_v34  ;;  %v3153_v20 = vmax.bf16 %v3105_v37, %v3057_v16  ;;  %v2815_v33 = vpop.f32.mrb[137].mxu0  ;;  %v2824_v41 = vadd.f32 %v5379_v15, %v7547_v61 }
 0x3f5   :  { %v3152_v47 = vmax.bf16 %v3104_v26, %v3056_v9  ;;  %v5380_v58 = vpop.f32.mrb[138].mxu0  ;;  %v2816_v46 = vadd.f32 %v7547_v61, %v2815_v33 }
 0x3f6   :  { %v3364_v23 = vmax.f32 %v3362_v31, %v3363_v27  ;;  %v3298_v24 = vsel %vm7556_vm7, %v3153_v20, 4286578559  ;;  %v2827_v40 = vadd.f32 %v5380_v58, %v7547_v61  ;;  %v2818_v44 = vpop.f32.mrb[139].mxu0 }
 0x3f7   :  { %v3297_v43 = vsel %vm7556_vm7, %v3152_v47, 4286578559  ;;  %v2819_v35 = vadd.f32 %v7547_v61, %v2818_v44 }
 0x3f8   :  { %v3365_v29 = vrot.slane %v3364_v23, 4  ;;  %v3372_v42 = vmax.bf16 %v3298_v24, %v3297_v43  ;;  %v3059_v0 = vpack.c.bf16 %v2827_v40, %v2824_v41 }
 0x3f9   :  { %v3058_v38 = vpack.c.bf16 %v2819_v35, %v2816_v46 }
 0x3fa   :  { %v3366_v51 = vmax.f32 %v3364_v23, %v3365_v29  ;;  %v3107_v60 = vmul.bf16 1009007652, %v3059_v0 }
 0x3fb   :  { %v3106_v50 = vmul.bf16 1009007652, %v3058_v38  ;;  %v5383_v39 = vpop.f32.mrb[140].mxu0 }
 0x3fc   :  { %v3367_v49 = vrot.slane %v3366_v51, 2  ;;  %v2831_v36 = vpop.f32.mrb[141].mxu0  ;;  %v3155_v2 = vmax.bf16 %v3107_v60, %v3059_v0  ;;  %v2840_v53 = vadd.f32 %v5383_v39, %v7547_v61 }
 0x3fd   :  { %v3154_v7 = vmax.bf16 %v3106_v50, %v3058_v38  ;;  %v5384_v48 = vpop.f32.mrb[142].mxu0  ;;  %v2832_v14 = vadd.f32 %v7547_v61, %v2831_v36 }
 0x3fe   :  { %v3368_v32 = vmax.f32 %v3366_v51, %v3367_v49  ;;  %v2843_v54 = vadd.f32 %v5384_v48, %v7547_v61  ;;  %v2834_v52 = vpop.f32.mrb[143].mxu0  ;;  %v3300_v63 = vsel %vm7556_vm7, %v3155_v2, 4286578559 }
 0x3ff   :  { %v3299_v59 = vsel %vm7556_vm7, %v3154_v7, 4286578559  ;;  %v2835_v3 = vadd.f32 %v7547_v61, %v2834_v52 }
 0x400   :  { %v3369_v17 = vrot.slane %v3368_v32, 1  ;;  %v3373_v57 = vmax.bf16 %v3372_v42, %v3299_v59  ;;  %v3061_v8 = vpack.c.bf16 %v2843_v54, %v2840_v53 }
 0x401   :  { %v3060_v30 = vpack.c.bf16 %v2835_v3, %v2832_v14 }
 0x402   :  { %v3370_v5 = vmax.f32 %v3368_v32, %v3369_v17  ;;  %v3109_v6 = vmul.bf16 1009007652, %v3061_v8  ;;  %v3374_v18 = vmax.bf16 %v3373_v57, %v3300_v63 }
 0x403   :  { %v3108_v21 = vmul.bf16 1009007652, %v3060_v30  ;;  %v5387_v10 = vpop.f32.mrb[144].mxu0 }
 0x404   :  { %v3371_v4 = vpack.i.bf16 %v3370_v5, %v3370_v5  ;;  %v2847_v19 = vpop.f32.mrb[145].mxu0  ;;  %v3157_v12 = vmax.bf16 %v3109_v6, %v3061_v8  ;;  %v2856_v34 = vadd.f32 %v5387_v10, %v7547_v61 }
 0x405   :  { %v3156_v16 = vmax.bf16 %v3108_v21, %v3060_v30  ;;  %v5388_v22 = vpop.f32.mrb[146].mxu0  ;;  %v2848_v15 = vadd.f32 %v7547_v61, %v2847_v19 }
 0x406   :  { %v3550_v9 = vunpack.c.l.b16 %v3371_v4  ;;  %v2859_v37 = vadd.f32 %v5388_v22, %v7547_v61  ;;  %v2850_v25 = vpop.f32.mrb[147].mxu0  ;;  %v3302_v11 = vsel %vm7577_vm10, %v3157_v12, 4286578559 }
 0x407   :  { %v3301_v26 = vsel %vm7556_vm7, %v3156_v16, 4286578559  ;;  %v2851_v31 = vadd.f32 %v7547_v61, %v2850_v25 }
 0x408   :  { %v3375_v27 = vmax.bf16 %v3374_v18, %v3301_v26  ;;  %v3063_v20 = vpack.c.bf16 %v2859_v37, %v2856_v34  ;;  %v7675_v33 = vsel %vm3558_vm14, %v3550_v9, %v7643_v13 }
 0x409   :  { %v3062_v47 = vpack.c.bf16 %v2851_v31, %v2848_v15 }
 0x40a   :  { %v3376_v58 = vmax.bf16 %v3375_v27, %v3302_v11  ;;  %v3111_v23 = vmul.bf16 1009007652, %v3063_v20 }
 0x40b   :  { %v3110_v24 = vmul.bf16 1009007652, %v3062_v47  ;;  %v5391_v41 = vpop.f32.mrb[148].mxu0 }
 0x40c   :  { %v3377_v40 = vunpack.i.l.bf16 %v3376_v58  ;;  %v3378_v44 = vunpack.i.h.bf16 %v3376_v58  ;;  %v3159_v43 = vmax.bf16 %v3111_v23, %v3063_v20  ;;  %v2863_v46 = vpop.f32.mrb[149].mxu0  ;;  %v2872_v13 = vadd.f32 %v5391_v41, %v7547_v61 }
 0x40d   :  { %v3158_v35 = vmax.bf16 %v3110_v24, %v3062_v47  ;;  %v5392_v29 = vpop.f32.mrb[150].mxu0  ;;  %v2864_v60 = vadd.f32 %v7547_v61, %v2863_v46 }
 0x40e   :  { %v3379_v42 = vmax.f32 %v3377_v40, %v3378_v44  ;;  %v3304_v0 = vsel %vm7556_vm7, %v3159_v43, 4286578559  ;;  %v2875_v55 = vadd.f32 %v5392_v29, %v7547_v61  ;;  %v2866_v38 = vpop.f32.mrb[151].mxu0 }
 0x40f   :  { %v3303_v51 = vsel %vm7556_vm7, %v3158_v35, 4286578559  ;;  %v2867_v50 = vadd.f32 %v7547_v61, %v2866_v38 }
 0x410   :  { %v3380_v39 = vrot.slane %v3379_v42, 4  ;;  %v3387_v49 = vmax.bf16 %v3304_v0, %v3303_v51  ;;  %v3065_v36 = vpack.c.bf16 %v2875_v55, %v2872_v13 }
 0x411   :  { %v3064_v45 = vpack.c.bf16 %v2867_v50, %v2864_v60 }
 0x412   :  { %v3381_v2 = vmax.f32 %v3379_v42, %v3380_v39  ;;  %v3113_v7 = vmul.bf16 1009007652, %v3065_v36 }
 0x413   :  { %v3112_v48 = vmul.bf16 1009007652, %v3064_v45  ;;  %v5395_v32 = vpop.f32.mrb[152].mxu0 }
 0x414   :  { %v3382_v53 = vrot.slane %v3381_v2, 2  ;;  %v2879_v54 = vpop.f32.mrb[153].mxu0  ;;  %v3161_v52 = vmax.bf16 %v3113_v7, %v3065_v36  ;;  %v2888_v17 = vadd.f32 %v5395_v32, %v7547_v61 }
 0x415   :  { %v3160_v59 = vmax.bf16 %v3112_v48, %v3064_v45  ;;  %v5396_v14 = vpop.f32.mrb[154].mxu0  ;;  %v2880_v30 = vadd.f32 %v7547_v61, %v2879_v54 }
 0x416   :  { %v3383_v3 = vmax.f32 %v3381_v2, %v3382_v53  ;;  %v2891_v57 = vadd.f32 %v5396_v14, %v7547_v61  ;;  %v2882_v8 = vpop.f32.mrb[155].mxu0  ;;  %v3306_v10 = vsel %vm7556_vm7, %v3161_v52, 4286578559 }
 0x417   :  { %v3305_v63 = vsel %vm7556_vm7, %v3160_v59, 4286578559  ;;  %v2883_v5 = vadd.f32 %v7547_v61, %v2882_v8 }
 0x418   :  { %v3384_v6 = vrot.slane %v3383_v3, 1  ;;  %v3388_v18 = vmax.bf16 %v3387_v49, %v3305_v63  ;;  %v3067_v21 = vpack.c.bf16 %v2891_v57, %v2888_v17 }
 0x419   :  { %v3066_v4 = vpack.c.bf16 %v2883_v5, %v2880_v30 }
 0x41a   :  { %v3385_v19 = vmax.f32 %v3383_v3, %v3384_v6  ;;  %v3115_v12 = vmul.bf16 1009007652, %v3067_v21  ;;  %v3389_v16 = vmax.bf16 %v3388_v18, %v3306_v10 }
 0x41b   :  { %v3114_v22 = vmul.bf16 1009007652, %v3066_v4  ;;  %v5399_v9 = vpop.f32.mrb[156].mxu0 }
 0x41c   :  { %v3386_v34 = vpack.i.bf16 %v3385_v19, %v3385_v19  ;;  %v2895_v37 = vpop.f32.mrb[157].mxu0  ;;  %v3163_v25 = vmax.bf16 %v3115_v12, %v3067_v21  ;;  %v2904_v27 = vadd.f32 %v5399_v9, %v7547_v61 }
 0x41d   :  { %v3162_v26 = vmax.bf16 %v3114_v22, %v3066_v4  ;;  %v5400_v15 = vpop.f32.mrb[158].mxu0  ;;  %v2896_v58 = vadd.f32 %v7547_v61, %v2895_v37 }
 0x41e   :  { %v3551_v31 = vunpack.c.l.b16 %v3386_v34  ;;  %v2907_v20 = vadd.f32 %v5400_v15, %v7547_v61  ;;  %v2898_v11 = vpop.f32.mrb[159].mxu0  ;;  %v3308_v44 = vsel %vm7577_vm10, %v3163_v25, 4286578559 }
 0x41f   :  { %v3307_v47 = vsel %vm7556_vm7, %v3162_v26, 4286578559  ;;  %v2899_v23 = vadd.f32 %v7547_v61, %v2898_v11 }
 0x420   :  { %v3390_v24 = vmax.bf16 %v3389_v16, %v3307_v47  ;;  %v3069_v41 = vpack.c.bf16 %v2907_v20, %v2904_v27  ;;  %v7702_v40 = vsel %vm3560_vm15, %v3551_v31, %v7675_v33 }
 0x421   :  { %v3068_v43 = vpack.c.bf16 %v2899_v23, %v2896_v58 }
 0x422   :  { %v3391_v46 = vmax.bf16 %v3390_v24, %v3308_v44  ;;  %v3117_v35 = vmul.bf16 1009007652, %v3069_v41 }
 0x423   :  { %v3116_v29 = vmul.bf16 1009007652, %v3068_v43  ;;  %v5403_v42 = vpop.f32.mrb[160].mxu0 }
 0x424   :  { %v3392_v0 = vunpack.i.l.bf16 %v3391_v46  ;;  %v3393_v13 = vunpack.i.h.bf16 %v3391_v46  ;;  %v3165_v55 = vmax.bf16 %v3117_v35, %v3069_v41  ;;  %v2911_v38 = vpop.f32.mrb[161].mxu0  ;;  %v2920_v33 = vadd.f32 %v5403_v42, %v7547_v61 }
 0x425   :  { %v3164_v51 = vmax.bf16 %v3116_v29, %v3068_v43  ;;  %v5404_v60 = vpop.f32.mrb[162].mxu0  ;;  %v2912_v2 = vadd.f32 %v7547_v61, %v2911_v38 }
 0x426   :  { %v3394_v50 = vmax.f32 %v3392_v0, %v3393_v13  ;;  %v3310_v39 = vsel %vm7556_vm7, %v3165_v55, 4286578559  ;;  %v2923_v49 = vadd.f32 %v5404_v60, %v7547_v61  ;;  %v2914_v36 = vpop.f32.mrb[163].mxu0 }
 0x427   :  { %v3309_v45 = vsel %vm7556_vm7, %v3164_v51, 4286578559  ;;  %v2915_v7 = vadd.f32 %v7547_v61, %v2914_v36 }
 0x428   :  { %v3395_v48 = vrot.slane %v3394_v50, 4  ;;  %v3402_v32 = vmax.bf16 %v3310_v39, %v3309_v45  ;;  %v3071_v53 = vpack.c.bf16 %v2923_v49, %v2920_v33 }
 0x429   :  { %v3070_v54 = vpack.c.bf16 %v2915_v7, %v2912_v2 }
 0x42a   :  { %v3396_v52 = vmax.f32 %v3394_v50, %v3395_v48  ;;  %v3119_v59 = vmul.bf16 1009007652, %v3071_v53 }
 0x42b   :  { %v3118_v14 = vmul.bf16 1009007652, %v3070_v54  ;;  %v5407_v3 = vpop.f32.mrb[164].mxu0 }
 0x42c   :  { %v3397_v17 = vrot.slane %v3396_v52, 2  ;;  %v2927_v57 = vpop.f32.mrb[165].mxu0  ;;  %v3167_v8 = vmax.bf16 %v3119_v59, %v3071_v53  ;;  %v2936_v6 = vadd.f32 %v5407_v3, %v7547_v61 }
 0x42d   :  { %v3166_v63 = vmax.bf16 %v3118_v14, %v3070_v54  ;;  %v5408_v30 = vpop.f32.mrb[166].mxu0  ;;  %v2928_v4 = vadd.f32 %v7547_v61, %v2927_v57 }
 0x42e   :  { %v3398_v5 = vmax.f32 %v3396_v52, %v3397_v17  ;;  %v2939_v18 = vadd.f32 %v5408_v30, %v7547_v61  ;;  %v2930_v21 = vpop.f32.mrb[167].mxu0  ;;  %v3312_v9 = vsel %vm7556_vm7, %v3167_v8, 4286578559 }
 0x42f   :  { %v3311_v10 = vsel %vm7556_vm7, %v3166_v63, 4286578559  ;;  %v2931_v19 = vadd.f32 %v7547_v61, %v2930_v21 }
 0x430   :  { %v3399_v12 = vrot.slane %v3398_v5, 1  ;;  %v3403_v16 = vmax.bf16 %v3402_v32, %v3311_v10  ;;  %v3073_v22 = vpack.c.bf16 %v2939_v18, %v2936_v6 }
 0x431   :  { %v3072_v34 = vpack.c.bf16 %v2931_v19, %v2928_v4 }
 0x432   :  { %v3400_v37 = vmax.f32 %v3398_v5, %v3399_v12  ;;  %v3121_v25 = vmul.bf16 1009007652, %v3073_v22  ;;  %v3404_v26 = vmax.bf16 %v3403_v16, %v3312_v9 }
 0x433   :  { %v3120_v15 = vmul.bf16 1009007652, %v3072_v34  ;;  %v5411_v31 = vpop.f32.mrb[168].mxu0 }
 0x434   :  { %v2943_v27 = vpop.f32.mrb[169].mxu0  ;;  %v3401_v20 = vpack.i.bf16 %v3400_v37, %v3400_v37  ;;  %v3169_v11 = vmax.bf16 %v3121_v25, %v3073_v22  ;;  %v2952_v23 = vadd.f32 %v5411_v31, %v7547_v61 }
 0x435   :  { %v3168_v47 = vmax.bf16 %v3120_v15, %v3072_v34  ;;  %v5412_v58 = vpop.f32.mrb[170].mxu0  ;;  %v2944_v46 = vadd.f32 %v7547_v61, %v2943_v27 }
 0x436   :  { %v2955_v24 = vadd.f32 %v5412_v58, %v7547_v61  ;;  %v2946_v41 = vpop.f32.mrb[171].mxu0  ;;  %v3552_v44 = vunpack.c.l.b16 %v3401_v20  ;;  %v3314_v13 = vsel %vm7577_vm10, %v3169_v11, 4286578559 }
 0x437   :  { %v3313_v43 = vsel %vm7556_vm7, %v3168_v47, 4286578559  ;;  %v2947_v35 = vadd.f32 %v7547_v61, %v2946_v41 }
 0x438   :  { %v3405_v29 = vmax.bf16 %v3404_v26, %v3313_v43  ;;  %v3075_v42 = vpack.c.bf16 %v2955_v24, %v2952_v23  ;;  %v7729_v0 = vsel %vm3562_vm0, %v3552_v44, %v7702_v40 }
 0x439   :  { %v3074_v55 = vpack.c.bf16 %v2947_v35, %v2944_v46 }
 0x43a   :  { %v3406_v38 = vmax.bf16 %v3405_v29, %v3314_v13  ;;  %v3123_v51 = vmul.bf16 1009007652, %v3075_v42 }
 0x43b   :  { %v3122_v60 = vmul.bf16 1009007652, %v3074_v55  ;;  %v5415_v50 = vpop.f32.mrb[172].mxu0 }
 0x43c   :  { %v3407_v39 = vunpack.i.l.bf16 %v3406_v38  ;;  %v3408_v33 = vunpack.i.h.bf16 %v3406_v38  ;;  %v3171_v49 = vmax.bf16 %v3123_v51, %v3075_v42  ;;  %v2959_v36 = vpop.f32.mrb[173].mxu0  ;;  %v2968_v40 = vadd.f32 %v5415_v50, %v7547_v61 }
 0x43d   :  { %v3170_v45 = vmax.bf16 %v3122_v60, %v3074_v55  ;;  %v5416_v2 = vpop.f32.mrb[174].mxu0  ;;  %v2960_v52 = vadd.f32 %v7547_v61, %v2959_v36 }
 0x43e   :  { %v3409_v7 = vmax.f32 %v3407_v39, %v3408_v33  ;;  %v3316_v48 = vsel %vm7556_vm7, %v3171_v49, 4286578559  ;;  %v2971_v32 = vadd.f32 %v5416_v2, %v7547_v61  ;;  %v2962_v53 = vpop.f32.mrb[175].mxu0 }
 0x43f   :  { %v3315_v54 = vsel %vm7556_vm7, %v3170_v45, 4286578559  ;;  %v2963_v59 = vadd.f32 %v7547_v61, %v2962_v53 }
 0x440   :  { %v3410_v14 = vrot.slane %v3409_v7, 4  ;;  %v3417_v3 = vmax.bf16 %v3316_v48, %v3315_v54  ;;  %v3077_v17 = vpack.c.bf16 %v2971_v32, %v2968_v40 }
 0x441   :  { %v3076_v57 = vpack.c.bf16 %v2963_v59, %v2960_v52 }
 0x442   :  { %v3411_v8 = vmax.f32 %v3409_v7, %v3410_v14  ;;  %v3125_v63 = vmul.bf16 1009007652, %v3077_v17 }
 0x443   :  { %v3124_v30 = vmul.bf16 1009007652, %v3076_v57  ;;  %v5419_v5 = vpop.f32.mrb[176].mxu0 }
 0x444   :  { %v3412_v6 = vrot.slane %v3411_v8, 2  ;;  %v2975_v18 = vpop.f32.mrb[177].mxu0  ;;  %v3173_v21 = vmax.bf16 %v3125_v63, %v3077_v17  ;;  %v2984_v12 = vadd.f32 %v5419_v5, %v7547_v61 }
 0x445   :  { %v3172_v10 = vmax.bf16 %v3124_v30, %v3076_v57  ;;  %v5420_v4 = vpop.f32.mrb[178].mxu0  ;;  %v2976_v34 = vadd.f32 %v7547_v61, %v2975_v18 }
 0x446   :  { %v3413_v19 = vmax.f32 %v3411_v8, %v3412_v6  ;;  %v2987_v16 = vadd.f32 %v5420_v4, %v7547_v61  ;;  %v2978_v22 = vpop.f32.mrb[179].mxu0  ;;  %v3318_v31 = vsel %vm7556_vm7, %v3173_v21, 4286578559  ;;  %v5866_v8 = vld [vmem:[#allocation17] ss:$0 sm:$0xff] }
 0x447   :  { %v3317_v9 = vsel %vm7556_vm7, %v3172_v10, 4286578559  ;;  %v2979_v37 = vadd.f32 %v7547_v61, %v2978_v22 }
 0x448   :  { %v3414_v25 = vrot.slane %v3413_v19, 1  ;;  %v3418_v26 = vmax.bf16 %v3417_v3, %v3317_v9  ;;  %v3079_v15 = vpack.c.bf16 %v2987_v16, %v2984_v12 }
 0x449   :  { %v3078_v27 = vpack.c.bf16 %v2979_v37, %v2976_v34 }
 0x44a   :  { %v3127_v20 = vmul.bf16 1009007652, %v3079_v15  ;;  %v3419_v11 = vmax.bf16 %v3418_v26, %v3318_v31  ;;  %v3415_v47 = vmax.f32 %v3413_v19, %v3414_v25 }
 0x44b   :  { %v3126_v58 = vmul.bf16 1009007652, %v3078_v27  ;;  %v5423_v23 = vpop.f32.mrb[180].mxu0 }
 0x44c   :  { %v2991_v24 = vpop.f32.mrb[181].mxu0  ;;  %v3416_v41 = vpack.i.bf16 %v3415_v47, %v3415_v47  ;;  %v3175_v44 = vmax.bf16 %v3127_v20, %v3079_v15  ;;  %v3000_v35 = vadd.f32 %v5423_v23, %v7547_v61 }
 0x44d   :  { %v3174_v43 = vmax.bf16 %v3126_v58, %v3078_v27  ;;  %v5424_v46 = vpop.f32.mrb[182].mxu0  ;;  %v2992_v38 = vadd.f32 %v7547_v61, %v2991_v24 }
 0x44e   :  { %v3003_v29 = vadd.f32 %v5424_v46, %v7547_v61  ;;  %v2994_v42 = vpop.f32.mrb[183].mxu0  ;;  %v3553_v13 = vunpack.c.l.b16 %v3416_v41  ;;  %v3320_v33 = vsel %vm7577_vm10, %v3175_v44, 4286578559 }
 0x44f   :  { %v3319_v55 = vsel %vm7556_vm7, %v3174_v43, 4286578559  ;;  %v2995_v51 = vadd.f32 %v7547_v61, %v2994_v42 }
 0x450   :  { %v3420_v60 = vmax.bf16 %v3419_v11, %v3319_v55  ;;  %v3081_v50 = vpack.c.bf16 %v3003_v29, %v3000_v35  ;;  %v3565_v39 = vsel %vm3564_vm1, %v3553_v13, %v7729_v0 }
 0x451   :  { %v3080_v49 = vpack.c.bf16 %v2995_v51, %v2992_v38 }
 0x452   :  { %v3421_v36 = vmax.bf16 %v3420_v60, %v3320_v33  ;;  %v3129_v45 = vmul.bf16 1009007652, %v3081_v50 }
 0x453   :  { %v3128_v2 = vmul.bf16 1009007652, %v3080_v49  ;;  %v5427_v7 = vpop.f32.mrb[184].mxu0 }
 0x454   :  { %v3422_v48 = vunpack.i.l.bf16 %v3421_v36  ;;  %v3423_v40 = vunpack.i.h.bf16 %v3421_v36  ;;  %v3177_v32 = vmax.bf16 %v3129_v45, %v3081_v50  ;;  %v3007_v53 = vpop.f32.mrb[185].mxu0  ;;  %v3016_v0 = vadd.f32 %v5427_v7, %v7547_v61 }
 0x455   :  { %v3176_v54 = vmax.bf16 %v3128_v2, %v3080_v49  ;;  %v5428_v52 = vpop.f32.mrb[186].mxu0  ;;  %v3008_v63 = vadd.f32 %v5866_v8, %v3007_v53 }
 0x456   :  { %v3424_v59 = vmax.f32 %v3422_v48, %v3423_v40  ;;  %v3322_v14 = vsel %vm7556_vm7, %v3177_v32, 4286578559  ;;  %v3019_v3 = vadd.f32 %v5428_v52, %v7547_v61  ;;  %v3010_v17 = vpop.f32.mrb[187].mxu0  ;;  %v5626_v52 = vld [vmem:[#allocation18 + $0x40] sm:$0xff]  }
 0x457   :  { %v3321_v57 = vsel %vm7556_vm7, %v3176_v54, 4286578559  ;;  %v3011_v30 = vadd.f32 %v5866_v8, %v3010_v17 }
 0x458   :  { %v3425_v5 = vrot.slane %v3424_v59, 4  ;;  %v3432_v6 = vmax.bf16 %v3322_v14, %v3321_v57  ;;  %v3083_v18 = vpack.c.bf16 %v3019_v3, %v3016_v0  ;;  %v5629_v14 = vld [vmem:[#allocation18 + $0x58] sm:$0xff]   ;;  %v5630_v0 = vld [vmem:[#allocation18 + $0x60] sm:$0xff]   ;;  %v5631_v57 = vld [vmem:[#allocation18 + $0x68] sm:$0xff]  }
 0x459   :  { %v3082_v21 = vpack.c.bf16 %v3011_v30, %v3008_v63  ;;  %v5633_v63 = vld [vmem:[#allocation18 + $0x78] sm:$0xff]   ;;  %v3662_v30 = vsub.s32 0, %v7554_v1 }
 0x45a   :  { %v3426_v10 = vmax.f32 %v3424_v59, %v3425_v5  ;;  %v3131_v4 = vmul.bf16 1009007652, %v3083_v18  ;;  %v7783_v5 = vld [vmem:[#allocation20] sm:$0xf] }
 0x45b   :  { %v3130_v19 = vmul.bf16 1009007652, %v3082_v21  ;;  %v5431_v12 = vpop.f32.mrb[188].mxu0 }
 0x45c   :  { %v3427_v16 = vrot.slane %v3426_v10, 2  ;;  %v3023_v22 = vpop.f32.mrb[189].mxu0  ;;  %v3179_v9 = vmax.bf16 %v3131_v4, %v3083_v18  ;;  %v3032_v37 = vadd.f32 %v5866_v8, %v5431_v12 }
 0x45d   :  { %v3178_v34 = vmax.bf16 %v3130_v19, %v3082_v21  ;;  %v5432_v61 = vpop.f32.mrb[190].mxu0  ;;  %v3024_v27 = vadd.f32 %v5866_v8, %v3023_v22 }
 0x45e   :  { %v3035_v25 = vadd.f32 %v5866_v8, %v5432_v61  ;;  %v3026_v26 = vpop.f32.mrb[191].mxu0  ;;  %v3428_v15 = vmax.f32 %v3426_v10, %v3427_v16  ;;  %v3324_v23 = vsel %vm7556_vm7, %v3179_v9, 4286578559  ;;  %v5634_v9 = vld [vmem:[#allocation18 + $0x80] sm:$0xff]   ;;  %v5635_v61 = vld [vmem:[#allocation18 + $0x88] sm:$0xff]  }
 0x45f   :  { %v3323_v31 = vsel %vm7556_vm7, %v3178_v34, 4286578559  ;;  %v3027_v20 = vadd.f32 %v5866_v8, %v3026_v26  ;;  %v5632_v8 = vld [vmem:[#allocation18 + $0x70] sm:$0xff]   ;;  %v5638_v26 = vld [vmem:[#allocation18 + $0xa0] sm:$0xff]  }
 0x460   :  { %v3433_v11 = vmax.bf16 %v3432_v6, %v3323_v31  ;;  %v3085_v47 = vpack.c.bf16 %v3035_v25, %v3032_v37  ;;  %v3429_v58 = vrot.slane %v3428_v15, 1  ;;  %v3663_v6 = vrot.slane %v7783_v5, %v3662_v30  ;;  %v5636_v37 = vld [vmem:[#allocation18 + $0x90] sm:$0xff]   ;;  %v5637_v25 = vld [vmem:[#allocation18 + $0x98] sm:$0xff]  }
 0x461   :  { %v3084_v24 = vpack.c.bf16 %v3027_v20, %v3024_v27  ;;  %v5640_v31 = vld [vmem:[#allocation18 + $0xb0] sm:$0xff]   ;;  %v5641_v27 = vld [vmem:[#allocation18 + $0xb8] sm:$0xff]   ;;  %v3687_v20 = vsub.s32 1, %v7554_v1 }
 0x462   :  { %v3133_v41 = vmul.bf16 1009007652, %v3085_v47  ;;  %v3434_v44 = vmax.bf16 %v3433_v11, %v3324_v23  ;;  %v3430_v43 = vmax.f32 %v3428_v15, %v3429_v58  ;;  %v5639_v15 = vld [vmem:[#allocation18 + $0xa8] sm:$0xff]  }
 0x463   :  { %v3132_v46 = vmul.bf16 1009007652, %v3084_v24  ;;  %v3688_v11 = vrot.slane %v7783_v5, %v3687_v20 }
 0x464   :  { %v3431_v35 = vpack.i.bf16 %v3430_v43, %v3430_v43  ;;  %v3181_v29 = vmax.bf16 %v3133_v41, %v3085_v47 }
 0x465   :  { %v3180_v42 = vmax.bf16 %v3132_v46, %v3084_v24  ;;  %v5642_v46 = vld [vmem:[#allocation18 + $0xc0] sm:$0xff]  }
 0x466   :  { %v3554_v13 = vunpack.c.l.b16 %v3431_v35  ;;  %v3326_v60 = vsel %vm7577_vm10, %v3181_v29, 4286578559  ;;  %v5643_v29 = vld [vmem:[#allocation18 + $0xc8] sm:$0xff]   ;;  %vm4340_vm10 = vcmask 15360  }
 0x467   :  { %v3325_v55 = vsel %vm7556_vm7, %v3180_v42, 4286578559  ;;  %v5644_v42 = vld [vmem:[#allocation18 + $0xd0] sm:$0xff]  }
 0x468   :  { %v3435_v38 = vmax.bf16 %v3434_v44, %v3325_v55  ;;  %v3567_v51 = vsel %vm3566_vm2, %v3554_v13, %v3565_v39  ;;  %v5628_v39 = vld [vmem:[#allocation18 + $0x50] sm:$0xff]   ;;  %v5645_v13 = vld [vmem:[#allocation18 + $0xd8] sm:$0xff]   ;;  %v5646_v55 = vld [vmem:[#allocation18 + $0xe0] sm:$0xff]  }
 0x46a   :  { %v3436_v50 = vmax.bf16 %v3435_v38, %v3326_v60  ;;  %v5647_v38 = vld [vmem:[#allocation18 + $0xe8] sm:$0xff]   ;;  %v5649_v60 = vld [vmem:[#allocation18 + $0xf8] sm:$0xff]  }
 0x46c   :  { %v3437_v33 = vunpack.i.l.bf16 %v3436_v50  ;;  %v3438_v49 = vunpack.i.h.bf16 %v3436_v50  ;;  %v3799_v50 = vsub.s32 2, %v7554_v1 }
 0x46e   :  { %v3439_v36 = vmax.f32 %v3437_v33, %v3438_v49  ;;  %v3800_v33 = vrot.slane %v7783_v5, %v3799_v50 }
 0x470   :  { %v3440_v45 = vrot.slane %v3439_v36, 4 }
 0x472   :  { %v3441_v2 = vmax.f32 %v3439_v36, %v3440_v45 }
 0x474   :  { %v3442_v7 = vrot.slane %v3441_v2, 2 }
 0x476   :  { %v3443_v48 = vmax.f32 %v3441_v2, %v3442_v7 }
 0x478   :  { %v3444_v40 = vrot.slane %v3443_v48, 1 }
 0x47a   :  { %v3445_v32 = vmax.f32 %v3443_v48, %v3444_v40 }
 0x47c   :  { %v3446_v53 = vpack.i.bf16 %v3445_v32, %v3445_v32  ;;  %v5650_v32 = vld [vmem:[#allocation23] sm:$0xff]  }
 0x47e   :  { %v3555_v54 = vunpack.c.l.b16 %v3446_v53 }
 0x480   :  { %v3569_v62 = vsel %vm3568_vm3, %v3555_v54, %v3567_v51  ;;  %v5648_v51 = vld [vmem:[#allocation18 + $0xf0] sm:$0xff]  }
 0x481   :  { %v3570_v59 = vpack.c.b16 %v3569_v62, %v3569_v62  ;;  %v5651_v54 = vld [vmem:[#allocation23 + $0x8] sm:$0xff]   ;;  %v5652_v62 = vld [vmem:[#allocation23 + $0x10] sm:$0xff]  }
 0x483   :  { %5455 = vmatmul.mubr.bf16.vlgmr.msra.gmra.mrb[100].mxu1 %v3570_v59  ;;  %v5654_v59 = vld [vmem:[#allocation23 + $0x20] sm:$0xff]  }
 0x484   :  { %5459 = vmatpush3.bf16.msra.mxu1 %v5626_v52  ;;  %5474 = vmatprep.mubr.msk.bf16.mxu1 %vm6237_vm11, %v6234_v28  ;;  %v5653_v52 = vld [vmem:[#allocation23 + $0x18] sm:$0xff]  }
 0x485   :  { %5460 = vmatprep.subr.bf16.mxu1 %v6234_v28 }
 0x488   :  { %5461 = vmatpush3.bf16.msra.mxu1 %v5627_v56  ;;  %v5655_v56 = vld [vmem:[#allocation23 + $0x28] sm:$0xff]  }
 0x489   :  { %5462 = vmatprep.subr.bf16.mxu1 %v6234_v28 }
 0x48c   :  { %5463 = vmatpush3.bf16.msra.mxu1 %v5628_v39  ;;  %v5656_v39 = vld [vmem:[#allocation23 + $0x30] sm:$0xff]  }
 0x48d   :  { %5464 = vmatprep.subr.bf16.mxu1 %v6234_v28 }
 0x490   :  { %5465 = vmatpush3.bf16.msra.mxu1 %v5629_v14  ;;  %v5657_v14 = vld [vmem:[#allocation23 + $0x38] sm:$0xff]  }
 0x491   :  { %5466 = vmatprep.subr.bf16.mxu1 %v6234_v28 }
 0x494   :  { %5467 = vmatpush3.bf16.msra.mxu1 %v5630_v0  ;;  %v3911_v0 = vsub.s32 3, %v7554_v1 }
 0x495   :  { %5468 = vmatprep.subr.bf16.mxu1 %v6234_v28 }
 0x498   :  { %5469 = vmatpush3.bf16.msra.mxu1 %v5631_v57 }
 0x499   :  { %5470 = vmatprep.subr.bf16.mxu1 %v6234_v28 }
 0x49c   :  { %5471 = vmatpush3.bf16.msra.mxu1 %v5632_v8 }
 0x49d   :  { %5472 = vmatprep.subr.bf16.mxu1 %v6234_v28 }
 0x4a0   :  { %5473 = vmatpush3.bf16.msra.mxu1 %v5633_v63 }
 0x4a1   :  { %5478 = vmatprep.subr.bf16.mxu1 %v6234_v28 }
 0x4a3   :  { %v3536_v3 = vpop.f32.mrb[96].mxu1 }
 0x4a4   :  { %v5437_v17 = vpop.f32.mrb[97].mxu1 }
 0x556   :  { %v3654_v18 = vpop.f32.mrb[100].mxu1 }
 0x557   :  { %v3655_v21 = vadd.f32 %v3654_v18, %v3536_v3  ;;  %v5456_v10 = vpop.f32.mrb[101].mxu1  ;;  %v3912_v3 = vrot.slane %v7783_v5, %v3911_v0 }
 0x558   :  { %v3657_v4 = vpop.f32.mrb[102].mxu1  ;;  %v4810_v10 = vld [vmem:[#allocation24] ss:$0 sm:$0xff] }
 0x559   :  { %v3664_v19 = vadd.f32 %v3663_v6, %v3655_v21  ;;  %v5457_v12 = vpop.f32.mrb[103].mxu1 }
 0x55b   :  { %v3665_v16 = vmul.f32 0.01, %v3664_v19 }
 0x55d   :  { %v3666_v22 = vmax.f32 %v3664_v19, %v3665_v16 }
 0x55f   :  { %v3667_v34 = vpack.c.bf16 %v3666_v22, %v3666_v22 }
 0x561   :  { %5475 = vmatmul.mubr.bf16.vlgmr.msra.gmra.mrb[104].mxu1 %v3667_v34 }
 0x562   :  { %5479 = vmatpush3.bf16.msra.mxu1 %v5634_v9  ;;  %5494 = vmatprep.mubr.msk.bf16.mxu1 %vm6237_vm11, %v6234_v28 }
 0x563   :  { %5480 = vmatprep.subr.bf16.mxu1 %v6234_v28 }
 0x566   :  { %5481 = vmatpush3.bf16.msra.mxu1 %v5635_v61 }
 0x567   :  { %5482 = vmatprep.subr.bf16.mxu1 %v6234_v28 }
 0x56a   :  { %5483 = vmatpush3.bf16.msra.mxu1 %v5636_v37 }
 0x56b   :  { %5484 = vmatprep.subr.bf16.mxu1 %v6234_v28 }
 0x56e   :  { %5485 = vmatpush3.bf16.msra.mxu1 %v5637_v25 }
 0x56f   :  { %5486 = vmatprep.subr.bf16.mxu1 %v6234_v28 }
 0x572   :  { %5487 = vmatpush3.bf16.msra.mxu1 %v5638_v26  ;;  %v7835_v26 = vld [vmem:[#allocation8] sm:$0xff] }
 0x573   :  { %5488 = vmatprep.subr.bf16.mxu1 %v6234_v28 }
 0x576   :  { %5489 = vmatpush3.bf16.msra.mxu1 %v5639_v15  ;;  %v6238_v15 = vmov 8  }
 0x577   :  { %5490 = vmatprep.subr.bf16.mxu1 %v6234_v28  ;;  %5600 = vset.pattern.permute.xlu1 %v6238_v15 }
 0x578   :  { %5611 = vset.pattern.permute.xlu0 %v6238_v15 }
 0x57a   :  { %5491 = vmatpush3.bf16.msra.mxu1 %v5640_v31  ;;  %v5867_v31 = vld [vmem:[#allocation6] sm:$0xff] }
 0x57b   :  { %5492 = vmatprep.subr.bf16.mxu1 %v6234_v28  ;;  %4213 = vperm.xlu1 %5600, %v5867_v31  }
 0x57e   :  { %5493 = vmatpush3.bf16.msra.mxu1 %v5641_v27 }
 0x57f   :  { %5498 = vmatprep.subr.bf16.mxu1 %v6234_v28 }
 0x634   :  { %v3771_v47 = vpop.f32.mrb[104].mxu1 }
 0x635   :  { %v3772_v58 = vadd.f32 %v3771_v47, %v3688_v11  ;;  %v5476_v23 = vpop.f32.mrb[105].mxu1  ;;  %v4214_v47 = vpop.permute.xlu1 %4213 }
 0x636   :  { %v3774_v24 = vpop.f32.mrb[106].mxu1 }
 0x637   :  { %v3777_v41 = vmul.f32 0.01, %v3772_v58  ;;  %v5477_v44 = vpop.f32.mrb[107].mxu1 }
 0x638   :  { %v4226_v44 = vrot.slane %v7835_v26, %v3799_v50 }
 0x639   :  { %v3778_v43 = vmax.f32 %v3772_v58, %v3777_v41 }
 0x63b   :  { %v3779_v35 = vpack.c.bf16 %v3778_v43, %v3778_v43 }
 0x63d   :  { %5495 = vmatmul.mubr.bf16.vlgmr.msra.gmra.mrb[108].mxu1 %v3779_v35 }
 0x63e   :  { %5499 = vmatpush3.bf16.msra.mxu1 %v5642_v46  ;;  %5514 = vmatprep.mubr.msk.bf16.mxu1 %vm6237_vm11, %v6234_v28 }
 0x63f   :  { %5500 = vmatprep.subr.bf16.mxu1 %v6234_v28 }
 0x642   :  { %5501 = vmatpush3.bf16.msra.mxu1 %v5643_v29  ;;  %v4116_v29 = vld [vmem:[#allocation8 + $0x8] sm:$0xff] }
 0x643   :  { %5502 = vmatprep.subr.bf16.mxu1 %v6234_v28 }
 0x646   :  { %5503 = vmatpush3.bf16.msra.mxu1 %v5644_v42  ;;  %v5601_v42 = vpack.i.bf16 %v4116_v29, %v7835_v26 }
 0x647   :  { %5504 = vmatprep.subr.bf16.mxu1 %v6234_v28 }
 0x64a   :  { %5505 = vmatpush3.bf16.msra.mxu1 %v5645_v13 }
 0x64b   :  { %5506 = vmatprep.subr.bf16.mxu1 %v6234_v28 }
 0x64e   :  { %5507 = vmatpush3.bf16.msra.mxu1 %v5646_v55 }
 0x64f   :  { %5508 = vmatprep.subr.bf16.mxu1 %v6234_v28 }
 0x652   :  { %5509 = vmatpush3.bf16.msra.mxu1 %v5647_v38 }
 0x653   :  { %5510 = vmatprep.subr.bf16.mxu1 %v6234_v28 }
 0x656   :  { %5511 = vmatpush3.bf16.msra.mxu1 %v5648_v51 }
 0x657   :  { %5512 = vmatprep.subr.bf16.mxu1 %v6234_v28 }
 0x65a   :  { %5513 = vmatpush3.bf16.msra.mxu1 %v5649_v60  ;;  %v6241_v60 = vmov 0.0|0.0  }
 0x65b   :  { %5518 = vmatprep.subr.bf16.mxu1 %v6234_v28 }
 0x710   :  { %v3883_v49 = vpop.f32.mrb[108].mxu1 }
 0x711   :  { %v3884_v36 = vadd.f32 %v3883_v49, %v3800_v33  ;;  %v5496_v45 = vpop.f32.mrb[109].mxu1 }
 0x712   :  { %v3886_v2 = vpop.f32.mrb[110].mxu1 }
 0x713   :  { %v3889_v7 = vmul.f32 0.01, %v3884_v36  ;;  %v5497_v48 = vpop.f32.mrb[111].mxu1 }
 0x715   :  { %v3890_v40 = vmax.f32 %v3884_v36, %v3889_v7 }
 0x717   :  { %v3891_v53 = vpack.c.bf16 %v3890_v40, %v3890_v40 }
 0x719   :  { %5515 = vmatmul.mubr.bf16.vlgmr.msra.gmra.mrb[112].mxu1 %v3891_v53 }
 0x71a   :  { %5519 = vmatpush3.bf16.msra.mxu1 %v5650_v32  ;;  %5534 = vmatprep.mubr.msk.bf16.mxu1 %vm6237_vm11, %v6234_v28 }
 0x71b   :  { %5520 = vmatprep.subr.bf16.mxu1 %v6234_v28 }
 0x71e   :  { %5521 = vmatpush3.bf16.msra.mxu1 %v5651_v54 }
 0x71f   :  { %5522 = vmatprep.subr.bf16.mxu1 %v6234_v28 }
 0x722   :  { %5523 = vmatpush3.bf16.msra.mxu1 %v5652_v62 }
 0x723   :  { %5524 = vmatprep.subr.bf16.mxu1 %v6234_v28 }
 0x726   :  { %5525 = vmatpush3.bf16.msra.mxu1 %v5653_v52 }
 0x727   :  { %5526 = vmatprep.subr.bf16.mxu1 %v6234_v28 }
 0x72a   :  { %5527 = vmatpush3.bf16.msra.mxu1 %v5654_v59 }
 0x72b   :  { %5528 = vmatprep.subr.bf16.mxu1 %v6234_v28 }
 0x72e   :  { %5529 = vmatpush3.bf16.msra.mxu1 %v5655_v56 }
 0x72f   :  { %5530 = vmatprep.subr.bf16.mxu1 %v6234_v28 }
 0x732   :  { %5531 = vmatpush3.bf16.msra.mxu1 %v5656_v39 }
 0x733   :  { %5532 = vmatprep.subr.bf16.mxu1 %v6234_v28 }
 0x736   :  { %5533 = vmatpush3.bf16.msra.mxu1 %v5657_v14 }
 0x737   :  { %5538 = vmatprep.subr.mxu1 %v6234_v28 }
 0x7ec   :  { %v3995_v17 = vpop.f32.mrb[112].mxu1 }
 0x7ed   :  { %v3996_v57 = vadd.f32 %v3995_v17, %v3912_v3  ;;  %v5516_v8 = vpop.f32.mrb[113].mxu1 }
 0x7ee   :  { %v3998_v63 = vpop.f32.mrb[114].mxu1 }
 0x7ef   :  { %v4001_v30 = vmul.f32 0.01, %v3996_v57  ;;  %v5517_v6 = vpop.f32.mrb[115].mxu1 }
 0x7f1   :  { %v4002_v18 = vmax.f32 %v3996_v57, %v4001_v30 }
 0x7f3   :  { %v4003_v21 = vpack.c.bf16 %v4002_v18, %v4002_v18 }
 0x7f5   :  { %5535 = vmatmul.mubr.bf16.vlgmr.msra.gmra.mrb[116].mxu1 %v4003_v21 }
 0x7f6   :  { %5540 = vmatprep.mubr.msk.f32.mxu1 %vm6237_vm11, %v6234_v28  ;;  %5539 = vmatpush3.msk.msra.mxu1 %vm4138_vm5, %v7835_v26 }
 0x7f7   :  { %5562 = vmatprep.subr.bf16.mxu1 %v6241_v60 }
 0x8c8   :  { %v4109_v4 = vpop.f32.mrb[116].mxu1 }
 0x8c9   :  { %v7826_v19 = vadd.f32 %v4810_v10, %v4109_v4  ;;  %v5536_v12 = vpop.f32.mrb[117].mxu1 }
 0x8ca   :  { %v4112_v16 = vpop.f32.mrb[118].mxu1 }
 0x8cb   :  { %v5537_v5 = vpop.f32.mrb[119].mxu1  ;;  %v4124_v22 = vsel %vm4123_vm4, %v7826_v19, -inf }
 0x8cc   :  { %4125 = vmax.xlane.f32.xlu0 %v4124_v22 }
 0x959   :  { %v7830_v9 = vpop.xlane.xlu0 %4125 }
 0x95a   :  { %v4127_v34 = vsub.f32 %v7826_v19, %v7830_v9 }
 0x95c   :  { %v4128_v61 = vmul.f32 1.442695, %v4127_v34 }
 0x95e   :  { %5850 = vpow2.f32 %v4128_v61 }
 0x968   :  { %v5851_v37 = vpop.eup %5850 }
 0x969   :  { %v4130_v25 = vsel %vm4123_vm4, %v5851_v37, 0.0 }
 0x96a   :  { %4131 = vadd.xlane.f32.xlu0 %v4130_v25 }
 0x9f7   :  { %v7838_v27 = vpop.xlane.xlu0 %4131 }
 0x9f8   :  { %5852 = vrcp.f32 %v7838_v27 }
 0x9f9   :  { %5854 = vtanh.f32 %v7826_v19 }
 0xa02   :  { %v5853_v20 = vpop.eup %5852 }
 0xa03   :  { %v4134_v11 = vmul.f32 %v5853_v20, %v5851_v37  ;;  %v5855_v1 = vpop.eup %5854 }
 0xa04   :  { %v4118_v13 = vadd.f32 1.0, %v5855_v1 }
 0xa05   :  { %5541 = vmatmul.mubr.msk.f32.vlgmr.msra.gmra.mrb[98].mxu1 %vm4123_vm4, %v4134_v11 }
 0xa06   :  { %5547 = vmatprep.mubr.msk.f32.mxu1 %vm6237_vm11, %v6234_v28  ;;  %v4119_v55 = vmul.f32 11.0, %v4118_v13 }
 0xa08   :  { %v4120_v38 = vadd.f32 -20.0, %v4119_v55 }
 0xa0a   :  { %v4121_v51 = vmul.f32 1.442695, %v4120_v38  ;;  %v4422_v50 = vsub.f32 0.0, %v4120_v38 }
 0xa0c   :  { %5856 = vpow2.f32 %v4121_v51  ;;  %v4423_v33 = vmul.f32 1.442695, %v4422_v50 }
 0xa0e   :  { %5858 = vpow2.f32 %v4423_v33 }
 0xa16   :  { %v5857_v45 = vpop.eup %5856 }
 0xa18   :  { %v5859_v53 = vpop.eup %5858 }
 0xad8   :  { %v4208_v58 = vpop.f32.mrb[98].mxu1 }
 0xad9   :  { %vm4216_vm6 = vcmp.lt.f32.partialorder %v4208_v58, %v4214_v47  ;;  %v5542_v23 = vpop.f32.mrb[99].mxu1 }
 0xada   :  { %v4821_v24 = vsel %vm4216_vm6, 1.0, %v6234_v28 }
 0xadb   :  { %v4219_v41 = vsel %vm4123_vm4, %v4821_v24, 0.0 }
 0xadc   :  { %4220 = vadd.xlane.f32.xlu1 %v4219_v41 }
 0xb69   :  { %v4221_v43 = vpop.xlane.xlu1 %4220 }
 0xb6a   :  { %v4222_v46 = vmin.f32 %v4221_v43, 3.0 }
 0xb6c   :  { %vm4227_vm7 = vcmp.eq.f32.partialorder %v4226_v44, %v4222_v46 }
 0xb6d   :  { %v4822_v35 = vsel %vm4227_vm7, 1.0, %v6234_v28 }
 0xb6e   :  { %4231 = vrot.lane.b32.xlu0 %v4822_v35, %s6239_s3 }
 0xb72   :  { %4235 = vrot.lane.b32.xlu0 %v4822_v35, %s6240_s14 }
 0xb76   :  { %5602 = vrot.lane.b32.xlu0 %v5601_v42, %s6240_s14 }
 0xbe0   :  { %v4232_v49 = vpop.permute.xlu0 %4231 }
 0xbe1   :  { %v4234_v36 = vmul.f32 %v4232_v49, %v7826_v19 }
 0xbe3   :  { %4240 = vrot.lane.b32.xlu0 %v4234_v36, %s6240_s14 }
 0xbe4   :  { %v4236_v2 = vpop.permute.xlu0 %4235 }
 0xbe5   :  { %v4238_v7 = vmul.f32 %v5857_v45, %v4236_v2 }
 0xbe7   :  { %4244 = vrot.lane.b32.xlu1 %v4238_v7, %s6240_s14  ;;  %4329 = vrot.lane.b32.xlu0 %v5867_v31, %s6242_s9 }
 0xbe8   :  { %v5603_v48 = vpop.permute.xlu0 %5602 }
 0xbe9   :  { %v5605_v40 = vunpack.i.h.bf16 %v5603_v48  ;;  %v5604_v32 = vunpack.i.l.bf16 %v5603_v48 }
 0xbeb   :  { %4426 = vrot.lane.b32.xlu1 %v5859_v53, %s6239_s3  ;;  %v5563_v54 = vpack.c.bf16 %v5605_v40, %v5604_v32 }
 0xbed   :  { %5564 = vmatpush3.bf16.msra.mxu1 %v5563_v54 }
 0xbee   :  { %5550 = vmatprep.subr.mxu1 %v6234_v28 }
 0xbef   :  { %4432 = vrot.lane.b32.xlu1 %v4120_v38, %s6240_s14 }
 0xc55   :  { %v4241_v62 = vpop.permute.xlu0 %4240 }
 0xc59   :  { %v4245_v52 = vpop.permute.xlu1 %4244  ;;  %v4330_v56 = vpop.permute.xlu0 %4329 }
 0xc5a   :  { %v4247_v59 = vsel %vm3466_vm12, %v4241_v62, %v4245_v52 }
 0xc5b   :  { %5548 = vmatmul.mubr.msk.f32.vlgmr.msra.gmra.mrb[120].mxu1 %vm4255_vm8, %v4247_v59 }
 0xc5c   :  { %5552 = vmatprep.mubr.msk.f32.mxu1 %vm6237_vm11, %v6234_v28 }
 0xc5d   :  { %v4427_v21 = vpop.permute.xlu1 %4426 }
 0xc61   :  { %v4433_v22 = vpop.permute.xlu1 %4432 }
 0xd2e   :  { %v7865_v39 = vpop.f32.mrb[120].mxu1 }
 0xd2f   :  { %v4332_v14 = vmul.f32 %v4330_v56, %v7865_v39  ;;  %v5549_v0 = vpop.f32.mrb[121].mxu1 }
 0xd31   :  { %4334 = vrot.lane.b32.xlu0 %v4332_v14, %s6243_s8 }
 0xd35   :  { %4338 = vrot.lane.b32.xlu0 %v7835_v26, %s6244_s26 }
 0xd39   :  { %4418 = vrot.lane.b32.xlu0 %v7826_v19, %s6240_s14 }
 0xd3d   :  { %5607 = vrot.lane.b32.xlu0 %v5601_v42, %s6245_s29 }
 0xda3   :  { %v4335_v3 = vpop.permute.xlu0 %4334 }
 0xda4   :  { %v4337_v17 = vadd.f32 %v4335_v3, %v7865_v39 }
 0xda7   :  { %v4339_v57 = vpop.permute.xlu0 %4338 }
 0xda8   :  { %5551 = vmatpush3.msk.msra.mxu1 %vm4344_vm9, %v4339_v57 }
 0xda9   :  { %5553 = vmatmul.mubr.msk.f32.vlgmr.msra.gmra.mrb[122].mxu1 %vm4340_vm10, %v4337_v17  ;;  %5565 = vmatprep.subr.bf16.mxu1 %v6241_v60 }
 0xdaa   :  { %5559 = vmatprep.mubr.msk.f32.mxu1 %vm6237_vm11, %v6234_v28  ;;  %vm4544_vm11 = vcmask 39936  }
 0xdab   :  { %v4419_v8 = vpop.permute.xlu0 %4418 }
 0xdaf   :  { %v5608_v63 = vpop.permute.xlu0 %5607 }
 0xdb0   :  { %v5610_v30 = vunpack.i.h.bf16 %v5608_v63  ;;  %v5609_v6 = vunpack.i.l.bf16 %v5608_v63 }
 0xdb2   :  { %v5566_v18 = vpack.c.bf16 %v5610_v30, %v5609_v6 }
 0xdb4   :  { %5567 = vmatpush3.bf16.msra.mxu1 %v5566_v18 }
 0xe7c   :  { %v4413_v10 = vpop.f32.mrb[122].mxu1 }
 0xe7d   :  { %v4421_v4 = vsub.f32 %v4413_v10, %v4419_v8  ;;  %v5554_v12 = vpop.f32.mrb[123].mxu1 }
 0xe7f   :  { %v4429_v16 = vmul.f32 %v4427_v21, %v4421_v4 }
 0xe81   :  { %v4430_v5 = vmul.f32 %v4429_v16, %v4429_v16 }
 0xe83   :  { %v4435_v34 = vsel %vm3466_vm12, %v4430_v5, %v4433_v22 }
 0xe84   :  { %5560 = vmatmul.mubr.msk.f32.vlgmr.msra.gmra.mrb[124].mxu1 %vm4255_vm8, %v4435_v34 }
 0xf57   :  { %v4511_v61 = vpop.f32.mrb[124].mxu1 }
 0xf58   :  { %v4516_v37 = vadd.f32 1.837877, %v4511_v61  ;;  %v5561_v28 = vpop.f32.mrb[125].mxu1  ;;  %v4515_v25 = vmul.f32 -0.5, %v4511_v61 }
 0xf5a   :  { %4518 = vrot.lane.b32.xlu0 %v4516_v37, %s6240_s14 }
 0xfcc   :  { %v4519_v26 = vpop.permute.xlu0 %4518 }
 0xfcd   :  { %v4521_v15 = vsub.f32 %v4515_v25, %v4519_v26 }
 0xfcf   :  { %v4522_v31 = vadd.f32 %v4521_v15, %v7826_v19 }
 0xfd1   :  { %v4523_v20 = vsel %vm4123_vm4, %v4522_v31, -inf }
 0xfd2   :  { %4524 = vmax.xlane.f32.xlu1 %v4523_v20 }
0x105f   :  { %v4525_v11 = vpop.xlane.xlu1 %4524 }
0x1060   :  { %v4526_v47 = vsub.f32 %v4522_v31, %v4525_v11 }
0x1062   :  { %v4527_v58 = vmul.f32 1.442695, %v4526_v47 }
0x1064   :  { %5860 = vpow2.f32 %v4527_v58 }
0x1065   :  { %5862 = vlog2.f32 %v7838_v27 }
0x106e   :  { %v5861_v23 = vpop.eup %5860 }
0x106f   :  { %v4529_v24 = vsel %vm4123_vm4, %v5861_v23, 0.0  ;;  %v5863_v44 = vpop.eup %5862 }
0x1070   :  { %4530 = vadd.xlane.f32.xlu0 %v4529_v24  ;;  %v4536_v43 = vmul.f32 0.6931472, %v5863_v44 }
0x1072   :  { %v4537_v35 = vadd.f32 %v4536_v43, %v7830_v9 }
0x1086   :  { %4539 = vrot.lane.b32.xlu0 %v4337_v17, %s6246_s27 }
0x10fd   :  { %v4531_v41 = vpop.xlane.xlu0 %4530 }
0x10fe   :  { %5864 = vlog2.f32 %v4531_v41 }
0x1101   :  { %v4540_v42 = vpop.permute.xlu0 %4539 }
0x1102   :  { %v4542_v13 = vsel %vm4340_vm10, %v7865_v39, %v4540_v42 }
0x1108   :  { %v5865_v19 = vpop.eup %5864 }
0x1109   :  { %v4533_v46 = vmul.f32 0.6931472, %v5865_v19 }
0x110b   :  { %v4534_v29 = vadd.f32 %v4533_v46, %v4525_v11 }
0x110d   :  { %v4538_v1 = vsub.f32 %v4534_v29, %v4537_v35 }
0x110f   :  { %v4543_v55 = vsel %vm4123_vm4, %v4542_v13, %v4538_v1 }
0x1110   :  { %v4545_v27 = vsel %vm4544_vm11, %v4543_v55, 0.0 }
0x1111   :  { %4546 = vst.msk [vmem:[#allocation26] sm:$0xff] %vm3466_vm12, %v4545_v27 }
0x1112   :  { %6187 = shalt.err (!%p6184_p4)
}
0x1113   :  { %s6188_s17 = scalar_lea.hbm %s7914_s15, 128 }
0x1114   :  { %p6189_p5 = scmp.ne.s32.totalorder %s7914_s15, %s6188_s17  ;;  %p6192_p6 = scmp.lt.u32.totalorder %s6188_s17, %s7914_s15 }
0x1116   :  { %p6194_p7 = pnand %p6192_p6, %p6189_p5 }
0x1118   :  { %6197 = shalt.err (!%p6194_p7)
}
0x1119   :  { %4556 = dma.vmem_to_hbm [thread:$0]  %s4554_s16, 128, %s7914_s15, [#allocation5]  }
0x111a   :  { %6214 = dma.done.wait [#allocation5], 128  }
0x111b   :  { %6215 = vsyncadd [#allocation5], 4294967168 }
0x111c   :  { %4560 = vsyncpa [#allocation4], 1 }
0x111d   :  { %4561 = vsyncpa [#allocation7], 1 }
0x111e   :  { %4562 = vsyncpa [#allocation10], 1 }
0x111f   :  { %4563 = vsyncpa [#allocation13], 1 }
0x1120   :  { %4564 = vsyncpa [#allocation16], 1 }
0x1121   :  { %4565 = vsyncpa [#allocation19], 1 }
0x1122   :  { %4566 = vsyncpa [#allocation22], 1 }
0x1123   :  { %4567 = vsyncpa [#allocation25], 1 }
0x1124   :  { %4568 = vsyncpa [#allocation5], 1 }

</bundles_post_ra>
